<compile_context>
chip_gen: v5e
topology: v5e:2x2
jax: 0.10.0
libtpu: 0.0.40
codegen_flags: <defaults>
</compile_context>

<pallas_src>
import functools

import jax
import jax.numpy as jnp
import numpy as np
from jax.experimental import pallas as pl
from jax.experimental.pallas import tpu as pltpu


def _round_up(x, m):
    return ((x + m - 1) // m) * m


# ----------------------------------------------------------------------------
# Fused LSTM stack: one pallas_call, grid over layers ("arbitrary", serial).
# All three modalities are carried in one (Bp, Hp3) state; the output block is
# resident in VMEM across layers and doubles as the inter-layer activation.
# ----------------------------------------------------------------------------
def _fused_lstm_kernel(x_ref, wih_ref, whh_ref, b_ref, out_ref, xg_ref):
    T, Bp, Hp3 = out_ref.shape
    layer = pl.program_id(0)

    wih = wih_ref[0]          # (Din, 4*Hp3)  zero-padded, gate-type-grouped columns
    whh = whh_ref[0]          # (Hp3, 4*Hp3)  block-structured recurrence weights
    bias = b_ref[0]           # (1,   4*Hp3)  combined b_ih + b_hh

    # Hoisted input projection: one MXU matmul for the whole sequence per layer.
    @pl.when(layer == 0)
    def _():
        xg_ref[...] = jnp.dot(x_ref[...], wih,
                              preferred_element_type=jnp.float32) + bias

    @pl.when(layer > 0)
    def _():
        # Previous layer's hidden sequence lives in out_ref (same block every layer).
        prev = out_ref[...].reshape(T * Bp, Hp3)      # layout-preserving reshape
        xg_ref[...] = jnp.dot(prev, wih[:Hp3, :],
                              preferred_element_type=jnp.float32) + bias

    def step(t, carry):
        h, c = carry
        row = pl.multiple_of(t * Bp, 8)               # Bp % 8 == 0 -> tile-aligned slice
        g = xg_ref[pl.ds(row, Bp), :] + jnp.dot(
            h, whh, preferred_element_type=jnp.float32)           # (Bp, 4*Hp3)
        # Gate groups are each Hp3 (multiple of 128) lanes wide -> clean vreg slices.
        i = jax.nn.sigmoid(g[:, 0:Hp3])
        f = jax.nn.sigmoid(g[:, Hp3:2 * Hp3])
        gg = jnp.tanh(g[:, 2 * Hp3:3 * Hp3])
        o = jax.nn.sigmoid(g[:, 3 * Hp3:4 * Hp3])
        c = f * c + i * gg
        h = o * jnp.tanh(c)
        out_ref[t] = h                                # per-step lane-dense (8,128) store
        return (h, c)

    h0 = jnp.zeros((Bp, Hp3), jnp.float32)
    c0 = jnp.zeros((Bp, Hp3), jnp.float32)
    jax.lax.fori_loop(0, T, step, (h0, c0), unroll=True)


def fused_lstm_pallas(x_flat, wih, whh, b, *, T, Bp, Hp3):
    L, Din, G = wih.shape
    return pl.pallas_call(
        _fused_lstm_kernel,
        out_shape=jax.ShapeDtypeStruct((T, Bp, Hp3), jnp.float32),
        grid_spec=pltpu.PrefetchScalarGridSpec(
            num_scalar_prefetch=0,
            grid=(L,),
            in_specs=[
                pl.BlockSpec((T * Bp, Din), lambda l: (0, 0)),
                pl.BlockSpec((1, Din, G), lambda l: (l, 0, 0)),
                pl.BlockSpec((1, Hp3, G), lambda l: (l, 0, 0)),
                pl.BlockSpec((1, 1, G), lambda l: (l, 0, 0)),
            ],
            out_specs=pl.BlockSpec((T, Bp, Hp3), lambda l: (0, 0, 0)),
            scratch_shapes=[pltpu.VMEM((T * Bp, G), jnp.float32)],
        ),
        compiler_params=pltpu.CompilerParams(dimension_semantics=("arbitrary",)),
    )(x_flat, wih, whh, b)


# ----------------------------------------------------------------------------
# Fused (attention_audio + attention_vision + MLP head) kernel.
# enc rows are ordered (modality, batch, time) so the softmax over T is lane-major.
# ----------------------------------------------------------------------------
def _attn_head_kernel(h_ref, enc_ref, wh_ref, we_ref, ba_ref, v_ref,
                      w1h_ref, w1a_ref, w1v_ref, b1_ref, w2_ref, b2_ref, o_ref):
    Bp, H = h_ref.shape
    T = enc_ref.shape[0] // (2 * Bp)

    hid = h_ref[...]                                              # (Bp, H)
    enc = enc_ref[...]                                            # (2*Bp*T, H)

    ep = jnp.dot(enc, we_ref[...], preferred_element_type=jnp.float32)            # (2BpT, H)
    hp = jnp.dot(hid, wh_ref[...], preferred_element_type=jnp.float32) + ba_ref[...]  # (Bp, H)

    ep3 = ep.reshape(2 * Bp, T, H)                 # splits the sublane dim at x8 -> cheap
    hp3 = jnp.concatenate([hp, hp], axis=0).reshape(2 * Bp, 1, H)
    energy = jnp.tanh(ep3 + hp3)                                  # (2Bp, T, H)

    scores = jnp.sum(energy * v_ref[...].reshape(1, 1, H), axis=2)   # (2Bp, T): T on lanes
    m = jnp.max(scores, axis=1, keepdims=True)
    e = jnp.exp(scores - m)
    w = e / jnp.sum(e, axis=1, keepdims=True)                     # lane-major softmax over T

    ctx = jnp.sum(enc.reshape(2 * Bp, T, H) * w[:, :, None], axis=1)   # (2Bp, H)
    ctx_a = ctx[:Bp]
    ctx_v = ctx[Bp:]

    # Head: Linear(3H -> 3H//3) as three row-block matmuls (no in-kernel concat),
    # ReLU, Dropout(eval = identity), Linear(-> num_classes padded to 128 lanes).
    h1 = (jnp.dot(hid, w1h_ref[...], preferred_element_type=jnp.float32)
          + jnp.dot(ctx_a, w1a_ref[...], preferred_element_type=jnp.float32)
          + jnp.dot(ctx_v, w1v_ref[...], preferred_element_type=jnp.float32)
          + b1_ref[...])
    h1 = jnp.maximum(h1, 0.0)
    o_ref[...] = jnp.dot(h1, w2_ref[...], preferred_element_type=jnp.float32) + b2_ref[...]


def attn_head_pallas(h_text, enc, wh, we, ba, v, w1h, w1a, w1v, b1, w2, b2):
    Bp = h_text.shape[0]
    Cp = w2.shape[1]
    return pl.pallas_call(
        _attn_head_kernel,
        out_shape=jax.ShapeDtypeStruct((Bp, Cp), jnp.float32),
        in_specs=[pl.BlockSpec(memory_space=pltpu.MemorySpace.VMEM)] * 12,
        out_specs=pl.BlockSpec(memory_space=pltpu.MemorySpace.VMEM),
    )(h_text, enc, wh, we, ba, v, w1h, w1a, w1v, b1, w2, b2)


# ----------------------------------------------------------------------------
# One-time weight fusion / padding (hoisted out of the per-call forward).
# ----------------------------------------------------------------------------
def prepare_fused(params):
    names = ("text", "audio", "vision")
    L = len(params["rnn"]["text"])
    H = params["rnn"]["text"][0]["whh_t"].shape[0]
    H3 = 3 * H
    Hp3 = _round_up(H3, 128)            # fused hidden width (lane-dense)
    G = 4 * Hp3                         # gate columns grouped by type (i, f, g, o)
    Ds = [int(params["rnn"][n][0]["wih_t"].shape[0]) for n in names]
    offs = [0, Ds[0], Ds[0] + Ds[1]]
    Din = _round_up(max(sum(Ds), H3), 128)

    wih_f = np.zeros((L, Din, G), np.float32)
    whh_f = np.zeros((L, Hp3, G), np.float32)
    b_f = np.zeros((L, 1, G), np.float32)
    for l in range(L):
        for m, n in enumerate(names):
            p = params["rnn"][n][l]
            wih = np.asarray(p["wih_t"])        # (d_in, 4H), gate order (i, f, g, o)
            whh = np.asarray(p["whh_t"])        # (H, 4H)
            b = np.asarray(p["b"])              # (4H,)  combined b_ih + b_hh
            r0 = offs[m] if l == 0 else m * H
            d_in = wih.shape[0]
            for gt in range(4):
                cs = gt * Hp3 + m * H
                wih_f[l, r0:r0 + d_in, cs:cs + H] = wih[:, gt * H:(gt + 1) * H]
                whh_f[l, m * H:(m + 1) * H, cs:cs + H] = whh[:, gt * H:(gt + 1) * H]
                b_f[l, 0, cs:cs + H] = b[gt * H:(gt + 1) * H]

    a = params["attn"]
    o = params["out"]
    w_t = np.asarray(a["w_t"])                  # (2H, H): rows [:H] hit the decoder hidden
    w1 = np.asarray(o["w1_t"])                  # (3H, mid)
    mid = w1.shape[1]
    C = int(o["w2_t"].shape[1])
    Cp = _round_up(C, 128)
    w2p = np.zeros((mid, Cp), np.float32)
    w2p[:, :C] = np.asarray(o["w2_t"])
    b2p = np.zeros((1, Cp), np.float32)
    b2p[0, :C] = np.asarray(o["b2"])

    return {
        "wih": jnp.asarray(wih_f), "whh": jnp.asarray(whh_f), "b": jnp.asarray(b_f),
        "wh": jnp.asarray(w_t[:H]), "we": jnp.asarray(w_t[H:]),
        "ba": jnp.asarray(a["b"]).reshape(1, H),
        "v": jnp.asarray(a["v"]).reshape(1, H),
        "w1h": jnp.asarray(w1[:H]), "w1a": jnp.asarray(w1[H:2 * H]),
        "w1v": jnp.asarray(w1[2 * H:]),
        "b1": jnp.asarray(o["b1"]).reshape(1, mid),
        "w2": jnp.asarray(w2p), "b2": jnp.asarray(b2p),
    }


# ----------------------------------------------------------------------------
# Forward (Pallas): one LSTM-stack call + one attention/head call.
# ----------------------------------------------------------------------------
def forward_pallas(fused, X_text, X_audio, X_vision, *, num_classes):
    L, Din, G = fused["wih"].shape
    Hp3 = fused["whh"].shape[1]
    H = fused["wh"].shape[0]
    B, T, _ = X_text.shape
    Bp = _round_up(B, 8)

    # Layer-0 input: time-major, batch padded to a full sublane tile, features
    # concatenated across modalities and zero-padded to the lane-dense fused width.
    xcat = jnp.concatenate([X_text, X_audio, X_vision], axis=2)        # (B, T, Dcat)
    x = jnp.swapaxes(xcat, 0, 1)                                       # (T, B, Dcat)
    x = jnp.pad(x, ((0, 0), (0, Bp - B), (0, Din - x.shape[-1])))
    x_flat = x.reshape(T * Bp, Din)                                    # wrapper-side layout work

    out = fused_lstm_pallas(x_flat, fused["wih"], fused["whh"], fused["b"],
                            T=T, Bp=Bp, Hp3=Hp3)                       # (T, Bp, Hp3)

    # Wrapper-side layout plumbing for the attention/head kernel.
    h_text = out[T - 1, :, 0:H]                                        # (Bp, H)
    enc = jnp.stack([out[:, :, H:2 * H], out[:, :, 2 * H:3 * H]], axis=0)   # (2, T, Bp, H)
    enc = jnp.transpose(enc, (0, 2, 1, 3)).reshape(2 * Bp * T, H)      # rows (m, b, t)

    logits_p = attn_head_pallas(h_text, enc, fused["wh"], fused["we"], fused["ba"],
                                fused["v"], fused["w1h"], fused["w1a"], fused["w1v"],
                                fused["b1"], fused["w2"], fused["b2"])  # (Bp, Cp)
    return logits_p[:B, :num_classes]


# ----------------------------------------------------------------------------
# Pure-JAX reference for validation
# ----------------------------------------------------------------------------
def _lstm_ref(x, wih_t, whh_t, b):
    B, T, D = x.shape
    H = whh_t.shape[0]

    def step(carry, xt):
        h, c = carry
        g = xt @ wih_t + h @ whh_t + b
        i = jax.nn.sigmoid(g[:, :H])
        f = jax.nn.sigmoid(g[:, H:2 * H])
        gg = jnp.tanh(g[:, 2 * H:3 * H])
        o = jax.nn.sigmoid(g[:, 3 * H:])
        c = f * c + i * gg
        h = o * jnp.tanh(c)
        return (h, c), h

    init = (jnp.zeros((B, H), jnp.float32), jnp.zeros((B, H), jnp.float32))
    _, hs = jax.lax.scan(step, init, jnp.swapaxes(x, 0, 1))
    return jnp.swapaxes(hs, 0, 1)


def forward_ref(params, X_text, X_audio, X_vision):
    outs = []
    for name, X in (("text", X_text), ("audio", X_audio), ("vision", X_vision)):
        h = X
        for layer in params["rnn"][name]:
            h = _lstm_ref(h, layer["wih_t"], layer["whh_t"], layer["b"])
        outs.append(h)
    out_text, out_audio, out_vision = outs
    h_text = out_text[:, -1, :]
    a = params["attn"]

    def attn_ref(hidden, enc):
        B, T, H = enc.shape
        hrep = jnp.repeat(hidden[:, None, :], T, axis=1)
        cat = jnp.concatenate([hrep, enc], axis=2)
        energy = jnp.tanh(cat @ a["w_t"] + a["b"])
        scores = jnp.einsum("bth,h->bt", energy, a["v"][0])
        w = jax.nn.softmax(scores, axis=1)
        return jnp.sum(enc * w[:, :, None], axis=1)

    cat = jnp.concatenate([h_text, attn_ref(h_text, out_audio),
                           attn_ref(h_text, out_vision)], axis=1)
    o = params["out"]
    h = jnp.maximum(cat @ o["w1_t"] + o["b1"], 0.0)
    return h @ o["w2_t"] + o["b2"]


# ----------------------------------------------------------------------------
# Deterministic parameter construction (shapes follow the nn.Module __init__).
# NOTE: b is the combined b_ih + b_hh; when importing a real PyTorch state_dict,
# the two LSTM biases must be summed explicitly.
# ----------------------------------------------------------------------------
def _uinit(key, shape, fan_in):
    k = 1.0 / jnp.sqrt(jnp.float32(fan_in))
    return jax.random.uniform(key, shape, jnp.float32, -k, k)


def make_params(key, input_sizes, hidden_sizes, num_layers, num_classes):
    H = hidden_sizes[0]
    assert all(h == H for h in hidden_sizes), \
        "Attention(hidden_sizes[0], ...) requires equal hidden sizes"
    params = {"rnn": {}, "attn": {}, "out": {}}
    names = ("text", "audio", "vision")
    for name, D in zip(names, input_sizes):
        layers = []
        for layer_idx in range(num_layers):
            d_in = D if layer_idx == 0 else H
            key, k1, k2, k3 = jax.random.split(key, 4)
            layers.append({
                "wih_t": _uinit(k1, (d_in, 4 * H), H),   # == weight_ih_l{k}.T
                "whh_t": _uinit(k2, (H, 4 * H), H),      # == weight_hh_l{k}.T
                "b": _uinit(k3, (4 * H,), H),            # b_ih + b_hh combined
            })
        params["rnn"][name] = layers
    key, k1, k2, k3 = jax.random.split(key, 4)
    params["attn"] = {
        "w_t": _uinit(k1, (2 * H, H), 2 * H),            # Linear(2H -> H), transposed
        "b": _uinit(k2, (H,), 2 * H),
        "v": _uinit(k3, (1, H), H),                      # Linear(H -> 1, bias=False)
    }
    lin_in = sum(hidden_sizes)
    mid = lin_in // 3
    key, k1, k2, k3, k4 = jax.random.split(key, 5)
    params["out"] = {
        "w1_t": _uinit(k1, (lin_in, mid), lin_in),
        "b1": _uinit(k2, (mid,), lin_in),
        "w2_t": _uinit(k3, (mid, num_classes), mid),
        "b2": _uinit(k4, (num_classes,), mid),
    }
    return params


if __name__ == "__main__":
    B, T = 4, 8
    input_sizes = [12, 10, 14]
    hidden_sizes = [32, 32, 32]
    num_classes = 5

    key = jax.random.PRNGKey(0)
    key, kt, ka, kv = jax.random.split(key, 4)
    X_text = jax.random.normal(kt, (B, T, input_sizes[0]), jnp.float32)
    X_audio = jax.random.normal(ka, (B, T, input_sizes[1]), jnp.float32)
    X_vision = jax.random.normal(kv, (B, T, input_sizes[2]), jnp.float32)

    # num_layers = 1 exercises the layer-0 path; 2 exercises the stacked,
    # VMEM-resident inter-layer path (dropout between layers is eval-mode identity).
    for num_layers in (1, 2):
        kp = jax.random.fold_in(key, num_layers)
        params = make_params(kp, input_sizes, hidden_sizes, num_layers, num_classes)
        fused = prepare_fused(params)        # weight stacking/padding hoisted out of forward

        fwd = jax.jit(functools.partial(forward_pallas, num_classes=num_classes))
        logits = jax.block_until_ready(fwd(fused, X_text, X_audio, X_vision))
        ref = jax.block_until_ready(forward_ref(params, X_text, X_audio, X_vision))

        assert logits.shape == (B, num_classes), logits.shape
        assert bool(jnp.all(jnp.isfinite(logits)))
        # Both paths now run at the backend's default matmul precision (no
        # 'highest' wrapper on the Pallas path per the perf review), so the
        # tolerance is re-baselined to cover bf16-pass MXU rounding differences.
        assert jnp.allclose(logits, ref, atol=5e-2, rtol=5e-2), (num_layers, logits, ref)

    print("KERNEL_OK")
</pallas_src>

<mosaic_0001>
module attributes {stable_mosaic.version = 11 : i64} {
  func.func @_fused_lstm_kernel(%arg0: i32, %arg1: memref<64x128xf32, #tpu.memory_space<vmem>>, %arg2: memref<1x128x512xf32, #tpu.memory_space<vmem>>, %arg3: memref<1x128x512xf32, #tpu.memory_space<vmem>>, %arg4: memref<1x1x512xf32, #tpu.memory_space<vmem>>, %arg5: memref<8x8x128xf32, #tpu.memory_space<vmem>>, %arg6: memref<64x512xf32, #tpu.memory_space<vmem>>) attributes {dimension_semantics = [#tpu.dimension_semantics<arbitrary>], iteration_bounds = array<i64: 1>, scalar_prefetch = 0 : i64, scratch_operands = 1 : i64, tpu.core_type = #tpu.core_type<tc>, window_params = [{pipeline_mode = #tpu.pipeline_mode<synchronous>, transform_indices = @transform_0, window_bounds = array<i64: 64, 128>}, {transform_indices = @transform_1, window_bounds = array<i64: 1, 128, 512>}, {transform_indices = @transform_2, window_bounds = array<i64: 1, 128, 512>}, {transform_indices = @transform_3, window_bounds = array<i64: 1, 1, 512>}, {pipeline_mode = #tpu.pipeline_mode<synchronous>, transform_indices = @transform_4, window_bounds = array<i64: 8, 8, 128>}]} {
    %c0 = arith.constant 0 : index
    %c0_0 = arith.constant 0 : index
    %c0_1 = arith.constant 0 : index
    %0 = vector.load %arg2[%c0, %c0_0, %c0_1] : memref<1x128x512xf32, #tpu.memory_space<vmem>>, vector<1x128x512xf32>
    %1 = vector.shape_cast %0 : vector<1x128x512xf32> to vector<128x512xf32>
    %c0_2 = arith.constant 0 : index
    %c0_3 = arith.constant 0 : index
    %c0_4 = arith.constant 0 : index
    %2 = vector.load %arg3[%c0_2, %c0_3, %c0_4] : memref<1x128x512xf32, #tpu.memory_space<vmem>>, vector<1x128x512xf32>
    %3 = vector.shape_cast %2 : vector<1x128x512xf32> to vector<128x512xf32>
    %c0_5 = arith.constant 0 : index
    %c0_6 = arith.constant 0 : index
    %c0_7 = arith.constant 0 : index
    %4 = vector.load %arg4[%c0_5, %c0_6, %c0_7] : memref<1x1x512xf32, #tpu.memory_space<vmem>>, vector<1x1x512xf32>
    %5 = vector.shape_cast %4 : vector<1x1x512xf32> to vector<1x512xf32>
    %c0_i32 = arith.constant 0 : i32
    %6 = arith.cmpi eq, %arg0, %c0_i32 : i32
    %7 = arith.extui %6 : i1 to i32
    %c0_i32_8 = arith.constant 0 : i32
    %8 = arith.cmpi ne, %7, %c0_i32_8 : i32
    scf.if %8 {
      %c0_77 = arith.constant 0 : index
      %c0_78 = arith.constant 0 : index
      %294 = vector.load %arg1[%c0_77, %c0_78] : memref<64x128xf32, #tpu.memory_space<vmem>>, vector<64x128xf32>
      %cst_79 = arith.constant dense<0.000000e+00> : vector<64x512xf32>
      %295 = tpu.matmul %294, %1, %cst_79 {dimension_numbers = #tpu.dot_dimension_numbers<[1], [0], [0], [1], [0, 0, 1, 1], [], []>} : vector<64x128xf32>, vector<128x512xf32>, vector<64x512xf32> -> vector<64x512xf32>
      %296 = vector.broadcast %5 : vector<1x512xf32> to vector<64x512xf32>
      %297 = arith.addf %295, %296 : vector<64x512xf32>
      %c0_80 = arith.constant 0 : index
      %c0_81 = arith.constant 0 : index
      %298 = vector.load %arg6[%c0_80, %c0_81] : memref<64x512xf32, #tpu.memory_space<vmem>>, vector<64x512xf32>
      tpu.vector_store %arg6[%c0_80, %c0_81], %297 {strides = array<i32>} : memref<64x512xf32, #tpu.memory_space<vmem>>, vector<64x512xf32>,
    } else {
    }
    %c0_i32_9 = arith.constant 0 : i32
    %9 = arith.cmpi sgt, %arg0, %c0_i32_9 : i32
    %10 = arith.extui %9 : i1 to i32
    %c0_i32_10 = arith.constant 0 : i32
    %11 = arith.cmpi ne, %10, %c0_i32_10 : i32
    scf.if %11 {
      %c0_77 = arith.constant 0 : index
      %c0_78 = arith.constant 0 : index
      %c0_79 = arith.constant 0 : index
      %294 = vector.load %arg5[%c0_77, %c0_78, %c0_79] : memref<8x8x128xf32, #tpu.memory_space<vmem>>, vector<8x8x128xf32>
      %295 = vector.shape_cast %294 : vector<8x8x128xf32> to vector<64x128xf32>
      %cst_80 = arith.constant dense<0.000000e+00> : vector<64x512xf32>
      %296 = tpu.matmul %295, %1, %cst_80 {dimension_numbers = #tpu.dot_dimension_numbers<[1], [0], [0], [1], [0, 0, 1, 1], [], []>} : vector<64x128xf32>, vector<128x512xf32>, vector<64x512xf32> -> vector<64x512xf32>
      %297 = vector.broadcast %5 : vector<1x512xf32> to vector<64x512xf32>
      %298 = arith.addf %296, %297 : vector<64x512xf32>
      %c0_81 = arith.constant 0 : index
      %c0_82 = arith.constant 0 : index
      %299 = vector.load %arg6[%c0_81, %c0_82] : memref<64x512xf32, #tpu.memory_space<vmem>>, vector<64x512xf32>
      tpu.vector_store %arg6[%c0_81, %c0_82], %298 {strides = array<i32>} : memref<64x512xf32, #tpu.memory_space<vmem>>, vector<64x512xf32>,
    } else {
    }
    %cst = arith.constant 0.000000e+00 : f32
    %12 = vector.broadcast %cst : f32 to vector<8x128xf32>
    %cst_11 = arith.constant 0.000000e+00 : f32
    %13 = vector.broadcast %cst_11 : f32 to vector<8x128xf32>
    %c0_i32_12 = arith.constant 0 : i32
    %c8_i32 = arith.constant 8 : i32
    %14 = arith.muli %c0_i32_12, %c8_i32 : i32
    %15 = tpu.assume_multiple %14, 8 : i32
    %16 = arith.index_cast %15 : i32 to index
    %c0_13 = arith.constant 0 : index
    %17 = vector.load %arg6[%16, %c0_13] : memref<64x512xf32, #tpu.memory_space<vmem>>, vector<8x512xf32>
    %cst_14 = arith.constant dense<0.000000e+00> : vector<8x512xf32>
    %18 = tpu.matmul %12, %3, %cst_14 {dimension_numbers = #tpu.dot_dimension_numbers<[1], [0], [0], [1], [0, 0, 1, 1], [], []>} : vector<8x128xf32>, vector<128x512xf32>, vector<8x512xf32> -> vector<8x512xf32>
    %19 = arith.addf %17, %18 : vector<8x512xf32>
    %20 = vector.extract_strided_slice %19 {offsets = [0, 0], sizes = [8, 128], strides = [1, 1]} : vector<8x512xf32> to vector<8x128xf32>
    %21 = arith.negf %20 : vector<8x128xf32>
    %22 = math.exp %21 : vector<8x128xf32>
    %cst_15 = arith.constant 1.000000e+00 : f32
    %23 = vector.broadcast %cst_15 : f32 to vector<8x128xf32>
    %24 = arith.addf %23, %22 : vector<8x128xf32>
    %25 = arith.divf %23, %24 : vector<8x128xf32>
    %26 = vector.extract_strided_slice %19 {offsets = [0, 128], sizes = [8, 128], strides = [1, 1]} : vector<8x512xf32> to vector<8x128xf32>
    %27 = arith.negf %26 : vector<8x128xf32>
    %28 = math.exp %27 : vector<8x128xf32>
    %cst_16 = arith.constant 1.000000e+00 : f32
    %29 = vector.broadcast %cst_16 : f32 to vector<8x128xf32>
    %30 = arith.addf %29, %28 : vector<8x128xf32>
    %31 = arith.divf %29, %30 : vector<8x128xf32>
    %32 = vector.extract_strided_slice %19 {offsets = [0, 256], sizes = [8, 128], strides = [1, 1]} : vector<8x512xf32> to vector<8x128xf32>
    %33 = math.tanh %32 : vector<8x128xf32>
    %34 = vector.extract_strided_slice %19 {offsets = [0, 384], sizes = [8, 128], strides = [1, 1]} : vector<8x512xf32> to vector<8x128xf32>
    %35 = arith.negf %34 : vector<8x128xf32>
    %36 = math.exp %35 : vector<8x128xf32>
    %cst_17 = arith.constant 1.000000e+00 : f32
    %37 = vector.broadcast %cst_17 : f32 to vector<8x128xf32>
    %38 = arith.addf %37, %36 : vector<8x128xf32>
    %39 = arith.divf %37, %38 : vector<8x128xf32>
    %40 = arith.mulf %31, %13 : vector<8x128xf32>
    %41 = arith.mulf %25, %33 : vector<8x128xf32>
    %42 = arith.addf %40, %41 : vector<8x128xf32>
    %43 = math.tanh %42 : vector<8x128xf32>
    %44 = arith.mulf %39, %43 : vector<8x128xf32>
    %45 = arith.index_cast %c0_i32_12 : i32 to index
    %c0_18 = arith.constant 0 : index
    %c0_19 = arith.constant 0 : index
    %46 = vector.load %arg5[%45, %c0_18, %c0_19] : memref<8x8x128xf32, #tpu.memory_space<vmem>>, vector<1x8x128xf32>
    %47 = vector.shape_cast %46 : vector<1x8x128xf32> to vector<8x128xf32>
    %48 = vector.shape_cast %44 : vector<8x128xf32> to vector<1x8x128xf32>
    tpu.vector_store %arg5[%45, %c0_18, %c0_19], %48 {strides = array<i32>} : memref<8x8x128xf32, #tpu.memory_space<vmem>>, vector<1x8x128xf32>,
    %c1_i32 = arith.constant 1 : i32
    %c8_i32_20 = arith.constant 8 : i32
    %49 = arith.muli %c1_i32, %c8_i32_20 : i32
    %50 = tpu.assume_multiple %49, 8 : i32
    %51 = arith.index_cast %50 : i32 to index
    %c0_21 = arith.constant 0 : index
    %52 = vector.load %arg6[%51, %c0_21] : memref<64x512xf32, #tpu.memory_space<vmem>>, vector<8x512xf32>
    %cst_22 = arith.constant dense<0.000000e+00> : vector<8x512xf32>
    %53 = tpu.matmul %44, %3, %cst_22 {dimension_numbers = #tpu.dot_dimension_numbers<[1], [0], [0], [1], [0, 0, 1, 1], [], []>} : vector<8x128xf32>, vector<128x512xf32>, vector<8x512xf32> -> vector<8x512xf32>
    %54 = arith.addf %52, %53 : vector<8x512xf32>
    %55 = vector.extract_strided_slice %54 {offsets = [0, 0], sizes = [8, 128], strides = [1, 1]} : vector<8x512xf32> to vector<8x128xf32>
    %56 = arith.negf %55 : vector<8x128xf32>
    %57 = math.exp %56 : vector<8x128xf32>
    %cst_23 = arith.constant 1.000000e+00 : f32
    %58 = vector.broadcast %cst_23 : f32 to vector<8x128xf32>
    %59 = arith.addf %58, %57 : vector<8x128xf32>
    %60 = arith.divf %58, %59 : vector<8x128xf32>
    %61 = vector.extract_strided_slice %54 {offsets = [0, 128], sizes = [8, 128], strides = [1, 1]} : vector<8x512xf32> to vector<8x128xf32>
    %62 = arith.negf %61 : vector<8x128xf32>
    %63 = math.exp %62 : vector<8x128xf32>
    %cst_24 = arith.constant 1.000000e+00 : f32
    %64 = vector.broadcast %cst_24 : f32 to vector<8x128xf32>
    %65 = arith.addf %64, %63 : vector<8x128xf32>
    %66 = arith.divf %64, %65 : vector<8x128xf32>
    %67 = vector.extract_strided_slice %54 {offsets = [0, 256], sizes = [8, 128], strides = [1, 1]} : vector<8x512xf32> to vector<8x128xf32>
    %68 = math.tanh %67 : vector<8x128xf32>
    %69 = vector.extract_strided_slice %54 {offsets = [0, 384], sizes = [8, 128], strides = [1, 1]} : vector<8x512xf32> to vector<8x128xf32>
    %70 = arith.negf %69 : vector<8x128xf32>
    %71 = math.exp %70 : vector<8x128xf32>
    %cst_25 = arith.constant 1.000000e+00 : f32
    %72 = vector.broadcast %cst_25 : f32 to vector<8x128xf32>
    %73 = arith.addf %72, %71 : vector<8x128xf32>
    %74 = arith.divf %72, %73 : vector<8x128xf32>
    %75 = arith.mulf %66, %42 : vector<8x128xf32>
    %76 = arith.mulf %60, %68 : vector<8x128xf32>
    %77 = arith.addf %75, %76 : vector<8x128xf32>
    %78 = math.tanh %77 : vector<8x128xf32>
    %79 = arith.mulf %74, %78 : vector<8x128xf32>
    %80 = arith.index_cast %c1_i32 : i32 to index
    %c0_26 = arith.constant 0 : index
    %c0_27 = arith.constant 0 : index
    %81 = vector.load %arg5[%80, %c0_26, %c0_27] : memref<8x8x128xf32, #tpu.memory_space<vmem>>, vector<1x8x128xf32>
    %82 = vector.shape_cast %81 : vector<1x8x128xf32> to vector<8x128xf32>
    %83 = vector.shape_cast %79 : vector<8x128xf32> to vector<1x8x128xf32>
    tpu.vector_store %arg5[%80, %c0_26, %c0_27], %83 {strides = array<i32>} : memref<8x8x128xf32, #tpu.memory_space<vmem>>, vector<1x8x128xf32>,
    %c2_i32 = arith.constant 2 : i32
    %c8_i32_28 = arith.constant 8 : i32
    %84 = arith.muli %c2_i32, %c8_i32_28 : i32
    %85 = tpu.assume_multiple %84, 8 : i32
    %86 = arith.index_cast %85 : i32 to index
    %c0_29 = arith.constant 0 : index
    %87 = vector.load %arg6[%86, %c0_29] : memref<64x512xf32, #tpu.memory_space<vmem>>, vector<8x512xf32>
    %cst_30 = arith.constant dense<0.000000e+00> : vector<8x512xf32>
    %88 = tpu.matmul %79, %3, %cst_30 {dimension_numbers = #tpu.dot_dimension_numbers<[1], [0], [0], [1], [0, 0, 1, 1], [], []>} : vector<8x128xf32>, vector<128x512xf32>, vector<8x512xf32> -> vector<8x512xf32>
    %89 = arith.addf %87, %88 : vector<8x512xf32>
    %90 = vector.extract_strided_slice %89 {offsets = [0, 0], sizes = [8, 128], strides = [1, 1]} : vector<8x512xf32> to vector<8x128xf32>
    %91 = arith.negf %90 : vector<8x128xf32>
    %92 = math.exp %91 : vector<8x128xf32>
    %cst_31 = arith.constant 1.000000e+00 : f32
    %93 = vector.broadcast %cst_31 : f32 to vector<8x128xf32>
    %94 = arith.addf %93, %92 : vector<8x128xf32>
    %95 = arith.divf %93, %94 : vector<8x128xf32>
    %96 = vector.extract_strided_slice %89 {offsets = [0, 128], sizes = [8, 128], strides = [1, 1]} : vector<8x512xf32> to vector<8x128xf32>
    %97 = arith.negf %96 : vector<8x128xf32>
    %98 = math.exp %97 : vector<8x128xf32>
    %cst_32 = arith.constant 1.000000e+00 : f32
    %99 = vector.broadcast %cst_32 : f32 to vector<8x128xf32>
    %100 = arith.addf %99, %98 : vector<8x128xf32>
    %101 = arith.divf %99, %100 : vector<8x128xf32>
    %102 = vector.extract_strided_slice %89 {offsets = [0, 256], sizes = [8, 128], strides = [1, 1]} : vector<8x512xf32> to vector<8x128xf32>
    %103 = math.tanh %102 : vector<8x128xf32>
    %104 = vector.extract_strided_slice %89 {offsets = [0, 384], sizes = [8, 128], strides = [1, 1]} : vector<8x512xf32> to vector<8x128xf32>
    %105 = arith.negf %104 : vector<8x128xf32>
    %106 = math.exp %105 : vector<8x128xf32>
    %cst_33 = arith.constant 1.000000e+00 : f32
    %107 = vector.broadcast %cst_33 : f32 to vector<8x128xf32>
    %108 = arith.addf %107, %106 : vector<8x128xf32>
    %109 = arith.divf %107, %108 : vector<8x128xf32>
    %110 = arith.mulf %101, %77 : vector<8x128xf32>
    %111 = arith.mulf %95, %103 : vector<8x128xf32>
    %112 = arith.addf %110, %111 : vector<8x128xf32>
    %113 = math.tanh %112 : vector<8x128xf32>
    %114 = arith.mulf %109, %113 : vector<8x128xf32>
    %115 = arith.index_cast %c2_i32 : i32 to index
    %c0_34 = arith.constant 0 : index
    %c0_35 = arith.constant 0 : index
    %116 = vector.load %arg5[%115, %c0_34, %c0_35] : memref<8x8x128xf32, #tpu.memory_space<vmem>>, vector<1x8x128xf32>
    %117 = vector.shape_cast %116 : vector<1x8x128xf32> to vector<8x128xf32>
    %118 = vector.shape_cast %114 : vector<8x128xf32> to vector<1x8x128xf32>
    tpu.vector_store %arg5[%115, %c0_34, %c0_35], %118 {strides = array<i32>} : memref<8x8x128xf32, #tpu.memory_space<vmem>>, vector<1x8x128xf32>,
    %c3_i32 = arith.constant 3 : i32
    %c8_i32_36 = arith.constant 8 : i32
    %119 = arith.muli %c3_i32, %c8_i32_36 : i32
    %120 = tpu.assume_multiple %119, 8 : i32
    %121 = arith.index_cast %120 : i32 to index
    %c0_37 = arith.constant 0 : index
    %122 = vector.load %arg6[%121, %c0_37] : memref<64x512xf32, #tpu.memory_space<vmem>>, vector<8x512xf32>
    %cst_38 = arith.constant dense<0.000000e+00> : vector<8x512xf32>
    %123 = tpu.matmul %114, %3, %cst_38 {dimension_numbers = #tpu.dot_dimension_numbers<[1], [0], [0], [1], [0, 0, 1, 1], [], []>} : vector<8x128xf32>, vector<128x512xf32>, vector<8x512xf32> -> vector<8x512xf32>
    %124 = arith.addf %122, %123 : vector<8x512xf32>
    %125 = vector.extract_strided_slice %124 {offsets = [0, 0], sizes = [8, 128], strides = [1, 1]} : vector<8x512xf32> to vector<8x128xf32>
    %126 = arith.negf %125 : vector<8x128xf32>
    %127 = math.exp %126 : vector<8x128xf32>
    %cst_39 = arith.constant 1.000000e+00 : f32
    %128 = vector.broadcast %cst_39 : f32 to vector<8x128xf32>
    %129 = arith.addf %128, %127 : vector<8x128xf32>
    %130 = arith.divf %128, %129 : vector<8x128xf32>
    %131 = vector.extract_strided_slice %124 {offsets = [0, 128], sizes = [8, 128], strides = [1, 1]} : vector<8x512xf32> to vector<8x128xf32>
    %132 = arith.negf %131 : vector<8x128xf32>
    %133 = math.exp %132 : vector<8x128xf32>
    %cst_40 = arith.constant 1.000000e+00 : f32
    %134 = vector.broadcast %cst_40 : f32 to vector<8x128xf32>
    %135 = arith.addf %134, %133 : vector<8x128xf32>
    %136 = arith.divf %134, %135 : vector<8x128xf32>
    %137 = vector.extract_strided_slice %124 {offsets = [0, 256], sizes = [8, 128], strides = [1, 1]} : vector<8x512xf32> to vector<8x128xf32>
    %138 = math.tanh %137 : vector<8x128xf32>
    %139 = vector.extract_strided_slice %124 {offsets = [0, 384], sizes = [8, 128], strides = [1, 1]} : vector<8x512xf32> to vector<8x128xf32>
    %140 = arith.negf %139 : vector<8x128xf32>
    %141 = math.exp %140 : vector<8x128xf32>
    %cst_41 = arith.constant 1.000000e+00 : f32
    %142 = vector.broadcast %cst_41 : f32 to vector<8x128xf32>
    %143 = arith.addf %142, %141 : vector<8x128xf32>
    %144 = arith.divf %142, %143 : vector<8x128xf32>
    %145 = arith.mulf %136, %112 : vector<8x128xf32>
    %146 = arith.mulf %130, %138 : vector<8x128xf32>
    %147 = arith.addf %145, %146 : vector<8x128xf32>
    %148 = math.tanh %147 : vector<8x128xf32>
    %149 = arith.mulf %144, %148 : vector<8x128xf32>
    %150 = arith.index_cast %c3_i32 : i32 to index
    %c0_42 = arith.constant 0 : index
    %c0_43 = arith.constant 0 : index
    %151 = vector.load %arg5[%150, %c0_42, %c0_43] : memref<8x8x128xf32, #tpu.memory_space<vmem>>, vector<1x8x128xf32>
    %152 = vector.shape_cast %151 : vector<1x8x128xf32> to vector<8x128xf32>
    %153 = vector.shape_cast %149 : vector<8x128xf32> to vector<1x8x128xf32>
    tpu.vector_store %arg5[%150, %c0_42, %c0_43], %153 {strides = array<i32>} : memref<8x8x128xf32, #tpu.memory_space<vmem>>, vector<1x8x128xf32>,
    %c4_i32 = arith.constant 4 : i32
    %c8_i32_44 = arith.constant 8 : i32
    %154 = arith.muli %c4_i32, %c8_i32_44 : i32
    %155 = tpu.assume_multiple %154, 8 : i32
    %156 = arith.index_cast %155 : i32 to index
    %c0_45 = arith.constant 0 : index
    %157 = vector.load %arg6[%156, %c0_45] : memref<64x512xf32, #tpu.memory_space<vmem>>, vector<8x512xf32>
    %cst_46 = arith.constant dense<0.000000e+00> : vector<8x512xf32>
    %158 = tpu.matmul %149, %3, %cst_46 {dimension_numbers = #tpu.dot_dimension_numbers<[1], [0], [0], [1], [0, 0, 1, 1], [], []>} : vector<8x128xf32>, vector<128x512xf32>, vector<8x512xf32> -> vector<8x512xf32>
    %159 = arith.addf %157, %158 : vector<8x512xf32>
    %160 = vector.extract_strided_slice %159 {offsets = [0, 0], sizes = [8, 128], strides = [1, 1]} : vector<8x512xf32> to vector<8x128xf32>
    %161 = arith.negf %160 : vector<8x128xf32>
    %162 = math.exp %161 : vector<8x128xf32>
    %cst_47 = arith.constant 1.000000e+00 : f32
    %163 = vector.broadcast %cst_47 : f32 to vector<8x128xf32>
    %164 = arith.addf %163, %162 : vector<8x128xf32>
    %165 = arith.divf %163, %164 : vector<8x128xf32>
    %166 = vector.extract_strided_slice %159 {offsets = [0, 128], sizes = [8, 128], strides = [1, 1]} : vector<8x512xf32> to vector<8x128xf32>
    %167 = arith.negf %166 : vector<8x128xf32>
    %168 = math.exp %167 : vector<8x128xf32>
    %cst_48 = arith.constant 1.000000e+00 : f32
    %169 = vector.broadcast %cst_48 : f32 to vector<8x128xf32>
    %170 = arith.addf %169, %168 : vector<8x128xf32>
    %171 = arith.divf %169, %170 : vector<8x128xf32>
    %172 = vector.extract_strided_slice %159 {offsets = [0, 256], sizes = [8, 128], strides = [1, 1]} : vector<8x512xf32> to vector<8x128xf32>
    %173 = math.tanh %172 : vector<8x128xf32>
    %174 = vector.extract_strided_slice %159 {offsets = [0, 384], sizes = [8, 128], strides = [1, 1]} : vector<8x512xf32> to vector<8x128xf32>
    %175 = arith.negf %174 : vector<8x128xf32>
    %176 = math.exp %175 : vector<8x128xf32>
    %cst_49 = arith.constant 1.000000e+00 : f32
    %177 = vector.broadcast %cst_49 : f32 to vector<8x128xf32>
    %178 = arith.addf %177, %176 : vector<8x128xf32>
    %179 = arith.divf %177, %178 : vector<8x128xf32>
    %180 = arith.mulf %171, %147 : vector<8x128xf32>
    %181 = arith.mulf %165, %173 : vector<8x128xf32>
    %182 = arith.addf %180, %181 : vector<8x128xf32>
    %183 = math.tanh %182 : vector<8x128xf32>
    %184 = arith.mulf %179, %183 : vector<8x128xf32>
    %185 = arith.index_cast %c4_i32 : i32 to index
    %c0_50 = arith.constant 0 : index
    %c0_51 = arith.constant 0 : index
    %186 = vector.load %arg5[%185, %c0_50, %c0_51] : memref<8x8x128xf32, #tpu.memory_space<vmem>>, vector<1x8x128xf32>
    %187 = vector.shape_cast %186 : vector<1x8x128xf32> to vector<8x128xf32>
    %188 = vector.shape_cast %184 : vector<8x128xf32> to vector<1x8x128xf32>
    tpu.vector_store %arg5[%185, %c0_50, %c0_51], %188 {strides = array<i32>} : memref<8x8x128xf32, #tpu.memory_space<vmem>>, vector<1x8x128xf32>,
    %c5_i32 = arith.constant 5 : i32
    %c8_i32_52 = arith.constant 8 : i32
    %189 = arith.muli %c5_i32, %c8_i32_52 : i32
    %190 = tpu.assume_multiple %189, 8 : i32
    %191 = arith.index_cast %190 : i32 to index
    %c0_53 = arith.constant 0 : index
    %192 = vector.load %arg6[%191, %c0_53] : memref<64x512xf32, #tpu.memory_space<vmem>>, vector<8x512xf32>
    %cst_54 = arith.constant dense<0.000000e+00> : vector<8x512xf32>
    %193 = tpu.matmul %184, %3, %cst_54 {dimension_numbers = #tpu.dot_dimension_numbers<[1], [0], [0], [1], [0, 0, 1, 1], [], []>} : vector<8x128xf32>, vector<128x512xf32>, vector<8x512xf32> -> vector<8x512xf32>
    %194 = arith.addf %192, %193 : vector<8x512xf32>
    %195 = vector.extract_strided_slice %194 {offsets = [0, 0], sizes = [8, 128], strides = [1, 1]} : vector<8x512xf32> to vector<8x128xf32>
    %196 = arith.negf %195 : vector<8x128xf32>
    %197 = math.exp %196 : vector<8x128xf32>
    %cst_55 = arith.constant 1.000000e+00 : f32
    %198 = vector.broadcast %cst_55 : f32 to vector<8x128xf32>
    %199 = arith.addf %198, %197 : vector<8x128xf32>
    %200 = arith.divf %198, %199 : vector<8x128xf32>
    %201 = vector.extract_strided_slice %194 {offsets = [0, 128], sizes = [8, 128], strides = [1, 1]} : vector<8x512xf32> to vector<8x128xf32>
    %202 = arith.negf %201 : vector<8x128xf32>
    %203 = math.exp %202 : vector<8x128xf32>
    %cst_56 = arith.constant 1.000000e+00 : f32
    %204 = vector.broadcast %cst_56 : f32 to vector<8x128xf32>
    %205 = arith.addf %204, %203 : vector<8x128xf32>
    %206 = arith.divf %204, %205 : vector<8x128xf32>
    %207 = vector.extract_strided_slice %194 {offsets = [0, 256], sizes = [8, 128], strides = [1, 1]} : vector<8x512xf32> to vector<8x128xf32>
    %208 = math.tanh %207 : vector<8x128xf32>
    %209 = vector.extract_strided_slice %194 {offsets = [0, 384], sizes = [8, 128], strides = [1, 1]} : vector<8x512xf32> to vector<8x128xf32>
    %210 = arith.negf %209 : vector<8x128xf32>
    %211 = math.exp %210 : vector<8x128xf32>
    %cst_57 = arith.constant 1.000000e+00 : f32
    %212 = vector.broadcast %cst_57 : f32 to vector<8x128xf32>
    %213 = arith.addf %212, %211 : vector<8x128xf32>
    %214 = arith.divf %212, %213 : vector<8x128xf32>
    %215 = arith.mulf %206, %182 : vector<8x128xf32>
    %216 = arith.mulf %200, %208 : vector<8x128xf32>
    %217 = arith.addf %215, %216 : vector<8x128xf32>
    %218 = math.tanh %217 : vector<8x128xf32>
    %219 = arith.mulf %214, %218 : vector<8x128xf32>
    %220 = arith.index_cast %c5_i32 : i32 to index
    %c0_58 = arith.constant 0 : index
    %c0_59 = arith.constant 0 : index
    %221 = vector.load %arg5[%220, %c0_58, %c0_59] : memref<8x8x128xf32, #tpu.memory_space<vmem>>, vector<1x8x128xf32>
    %222 = vector.shape_cast %221 : vector<1x8x128xf32> to vector<8x128xf32>
    %223 = vector.shape_cast %219 : vector<8x128xf32> to vector<1x8x128xf32>
    tpu.vector_store %arg5[%220, %c0_58, %c0_59], %223 {strides = array<i32>} : memref<8x8x128xf32, #tpu.memory_space<vmem>>, vector<1x8x128xf32>,
    %c6_i32 = arith.constant 6 : i32
    %c8_i32_60 = arith.constant 8 : i32
    %224 = arith.muli %c6_i32, %c8_i32_60 : i32
    %225 = tpu.assume_multiple %224, 8 : i32
    %226 = arith.index_cast %225 : i32 to index
    %c0_61 = arith.constant 0 : index
    %227 = vector.load %arg6[%226, %c0_61] : memref<64x512xf32, #tpu.memory_space<vmem>>, vector<8x512xf32>
    %cst_62 = arith.constant dense<0.000000e+00> : vector<8x512xf32>
    %228 = tpu.matmul %219, %3, %cst_62 {dimension_numbers = #tpu.dot_dimension_numbers<[1], [0], [0], [1], [0, 0, 1, 1], [], []>} : vector<8x128xf32>, vector<128x512xf32>, vector<8x512xf32> -> vector<8x512xf32>
    %229 = arith.addf %227, %228 : vector<8x512xf32>
    %230 = vector.extract_strided_slice %229 {offsets = [0, 0], sizes = [8, 128], strides = [1, 1]} : vector<8x512xf32> to vector<8x128xf32>
    %231 = arith.negf %230 : vector<8x128xf32>
    %232 = math.exp %231 : vector<8x128xf32>
    %cst_63 = arith.constant 1.000000e+00 : f32
    %233 = vector.broadcast %cst_63 : f32 to vector<8x128xf32>
    %234 = arith.addf %233, %232 : vector<8x128xf32>
    %235 = arith.divf %233, %234 : vector<8x128xf32>
    %236 = vector.extract_strided_slice %229 {offsets = [0, 128], sizes = [8, 128], strides = [1, 1]} : vector<8x512xf32> to vector<8x128xf32>
    %237 = arith.negf %236 : vector<8x128xf32>
    %238 = math.exp %237 : vector<8x128xf32>
    %cst_64 = arith.constant 1.000000e+00 : f32
    %239 = vector.broadcast %cst_64 : f32 to vector<8x128xf32>
    %240 = arith.addf %239, %238 : vector<8x128xf32>
    %241 = arith.divf %239, %240 : vector<8x128xf32>
    %242 = vector.extract_strided_slice %229 {offsets = [0, 256], sizes = [8, 128], strides = [1, 1]} : vector<8x512xf32> to vector<8x128xf32>
    %243 = math.tanh %242 : vector<8x128xf32>
    %244 = vector.extract_strided_slice %229 {offsets = [0, 384], sizes = [8, 128], strides = [1, 1]} : vector<8x512xf32> to vector<8x128xf32>
    %245 = arith.negf %244 : vector<8x128xf32>
    %246 = math.exp %245 : vector<8x128xf32>
    %cst_65 = arith.constant 1.000000e+00 : f32
    %247 = vector.broadcast %cst_65 : f32 to vector<8x128xf32>
    %248 = arith.addf %247, %246 : vector<8x128xf32>
    %249 = arith.divf %247, %248 : vector<8x128xf32>
    %250 = arith.mulf %241, %217 : vector<8x128xf32>
    %251 = arith.mulf %235, %243 : vector<8x128xf32>
    %252 = arith.addf %250, %251 : vector<8x128xf32>
    %253 = math.tanh %252 : vector<8x128xf32>
    %254 = arith.mulf %249, %253 : vector<8x128xf32>
    %255 = arith.index_cast %c6_i32 : i32 to index
    %c0_66 = arith.constant 0 : index
    %c0_67 = arith.constant 0 : index
    %256 = vector.load %arg5[%255, %c0_66, %c0_67] : memref<8x8x128xf32, #tpu.memory_space<vmem>>, vector<1x8x128xf32>
    %257 = vector.shape_cast %256 : vector<1x8x128xf32> to vector<8x128xf32>
    %258 = vector.shape_cast %254 : vector<8x128xf32> to vector<1x8x128xf32>
    tpu.vector_store %arg5[%255, %c0_66, %c0_67], %258 {strides = array<i32>} : memref<8x8x128xf32, #tpu.memory_space<vmem>>, vector<1x8x128xf32>,
    %c7_i32 = arith.constant 7 : i32
    %c8_i32_68 = arith.constant 8 : i32
    %259 = arith.muli %c7_i32, %c8_i32_68 : i32
    %260 = tpu.assume_multiple %259, 8 : i32
    %261 = arith.index_cast %260 : i32 to index
    %c0_69 = arith.constant 0 : index
    %262 = vector.load %arg6[%261, %c0_69] : memref<64x512xf32, #tpu.memory_space<vmem>>, vector<8x512xf32>
    %cst_70 = arith.constant dense<0.000000e+00> : vector<8x512xf32>
    %263 = tpu.matmul %254, %3, %cst_70 {dimension_numbers = #tpu.dot_dimension_numbers<[1], [0], [0], [1], [0, 0, 1, 1], [], []>} : vector<8x128xf32>, vector<128x512xf32>, vector<8x512xf32> -> vector<8x512xf32>
    %264 = arith.addf %262, %263 : vector<8x512xf32>
    %265 = vector.extract_strided_slice %264 {offsets = [0, 0], sizes = [8, 128], strides = [1, 1]} : vector<8x512xf32> to vector<8x128xf32>
    %266 = arith.negf %265 : vector<8x128xf32>
    %267 = math.exp %266 : vector<8x128xf32>
    %cst_71 = arith.constant 1.000000e+00 : f32
    %268 = vector.broadcast %cst_71 : f32 to vector<8x128xf32>
    %269 = arith.addf %268, %267 : vector<8x128xf32>
    %270 = arith.divf %268, %269 : vector<8x128xf32>
    %271 = vector.extract_strided_slice %264 {offsets = [0, 128], sizes = [8, 128], strides = [1, 1]} : vector<8x512xf32> to vector<8x128xf32>
    %272 = arith.negf %271 : vector<8x128xf32>
    %273 = math.exp %272 : vector<8x128xf32>
    %cst_72 = arith.constant 1.000000e+00 : f32
    %274 = vector.broadcast %cst_72 : f32 to vector<8x128xf32>
    %275 = arith.addf %274, %273 : vector<8x128xf32>
    %276 = arith.divf %274, %275 : vector<8x128xf32>
    %277 = vector.extract_strided_slice %264 {offsets = [0, 256], sizes = [8, 128], strides = [1, 1]} : vector<8x512xf32> to vector<8x128xf32>
    %278 = math.tanh %277 : vector<8x128xf32>
    %279 = vector.extract_strided_slice %264 {offsets = [0, 384], sizes = [8, 128], strides = [1, 1]} : vector<8x512xf32> to vector<8x128xf32>
    %280 = arith.negf %279 : vector<8x128xf32>
    %281 = math.exp %280 : vector<8x128xf32>
    %cst_73 = arith.constant 1.000000e+00 : f32
    %282 = vector.broadcast %cst_73 : f32 to vector<8x128xf32>
    %283 = arith.addf %282, %281 : vector<8x128xf32>
    %284 = arith.divf %282, %283 : vector<8x128xf32>
    %285 = arith.mulf %276, %252 : vector<8x128xf32>
    %286 = arith.mulf %270, %278 : vector<8x128xf32>
    %287 = arith.addf %285, %286 : vector<8x128xf32>
    %288 = math.tanh %287 : vector<8x128xf32>
    %289 = arith.mulf %284, %288 : vector<8x128xf32>
    %290 = arith.index_cast %c7_i32 : i32 to index
    %c0_74 = arith.constant 0 : index
    %c0_75 = arith.constant 0 : index
    %291 = vector.load %arg5[%290, %c0_74, %c0_75] : memref<8x8x128xf32, #tpu.memory_space<vmem>>, vector<1x8x128xf32>
    %292 = vector.shape_cast %291 : vector<1x8x128xf32> to vector<8x128xf32>
    %293 = vector.shape_cast %289 : vector<8x128xf32> to vector<1x8x128xf32>
    tpu.vector_store %arg5[%290, %c0_74, %c0_75], %293 {strides = array<i32>} : memref<8x8x128xf32, #tpu.memory_space<vmem>>, vector<1x8x128xf32>,
    %c8_i32_76 = arith.constant 8 : i32
    return
  }
  func.func @transform_0(%arg0: i32) -> (i32, i32) {
    %c0_i32 = arith.constant 0 : i32
    %c0_i32_0 = arith.constant 0 : i32
    %c0_i32_1 = arith.constant 0 : i32
    return %c0_i32, %c0_i32_0 : i32, i32
  }
  func.func @transform_1(%arg0: i32) -> (i32, i32, i32) {
    %c0_i32 = arith.constant 0 : i32
    %c0_i32_0 = arith.constant 0 : i32
    %c0_i32_1 = arith.constant 0 : i32
    return %arg0, %c0_i32, %c0_i32_0 : i32, i32, i32
  }
  func.func @transform_2(%arg0: i32) -> (i32, i32, i32) {
    %c0_i32 = arith.constant 0 : i32
    %c0_i32_0 = arith.constant 0 : i32
    %c0_i32_1 = arith.constant 0 : i32
    return %arg0, %c0_i32, %c0_i32_0 : i32, i32, i32
  }
  func.func @transform_3(%arg0: i32) -> (i32, i32, i32) {
    %c0_i32 = arith.constant 0 : i32
    %c0_i32_0 = arith.constant 0 : i32
    %c0_i32_1 = arith.constant 0 : i32
    return %arg0, %c0_i32, %c0_i32_0 : i32, i32, i32
  }
  func.func @transform_4(%arg0: i32) -> (i32, i32, i32) {
    %c0_i32 = arith.constant 0 : i32
    %c0_i32_0 = arith.constant 0 : i32
    %c0_i32_1 = arith.constant 0 : i32
    %c0_i32_2 = arith.constant 0 : i32
    return %c0_i32, %c0_i32_0, %c0_i32_1 : i32, i32, i32
  }
}

module attributes {stable_mosaic.version = 11 : i64} {
  func.func @_attn_head_kernel(%arg0: memref<8x32xf32, #tpu.memory_space<vmem>>, %arg1: memref<128x32xf32, #tpu.memory_space<vmem>>, %arg2: memref<32x32xf32, #tpu.memory_space<vmem>>, %arg3: memref<32x32xf32, #tpu.memory_space<vmem>>, %arg4: memref<1x32xf32, #tpu.memory_space<vmem>>, %arg5: memref<1x32xf32, #tpu.memory_space<vmem>>, %arg6: memref<32x32xf32, #tpu.memory_space<vmem>>, %arg7: memref<32x32xf32, #tpu.memory_space<vmem>>, %arg8: memref<32x32xf32, #tpu.memory_space<vmem>>, %arg9: memref<1x32xf32, #tpu.memory_space<vmem>>, %arg10: memref<32x128xf32, #tpu.memory_space<vmem>>, %arg11: memref<1x128xf32, #tpu.memory_space<vmem>>, %arg12: memref<8x128xf32, #tpu.memory_space<vmem>>) attributes {dimension_semantics = [], scalar_prefetch = 0 : i64, scratch_operands = 0 : i64, tpu.core_type = #tpu.core_type<tc>} {
    %c0 = arith.constant 0 : index
    %c0_0 = arith.constant 0 : index
    %0 = vector.load %arg0[%c0, %c0_0] : memref<8x32xf32, #tpu.memory_space<vmem>>, vector<8x32xf32>
    %c0_1 = arith.constant 0 : index
    %c0_2 = arith.constant 0 : index
    %1 = vector.load %arg1[%c0_1, %c0_2] : memref<128x32xf32, #tpu.memory_space<vmem>>, vector<128x32xf32>
    %c0_3 = arith.constant 0 : index
    %c0_4 = arith.constant 0 : index
    %2 = vector.load %arg3[%c0_3, %c0_4] : memref<32x32xf32, #tpu.memory_space<vmem>>, vector<32x32xf32>
    %cst = arith.constant dense<0.000000e+00> : vector<128x32xf32>
    %3 = tpu.matmul %1, %2, %cst {dimension_numbers = #tpu.dot_dimension_numbers<[1], [0], [0], [1], [0, 0, 1, 1], [], []>} : vector<128x32xf32>, vector<32x32xf32>, vector<128x32xf32> -> vector<128x32xf32>
    %c0_5 = arith.constant 0 : index
    %c0_6 = arith.constant 0 : index
    %4 = vector.load %arg2[%c0_5, %c0_6] : memref<32x32xf32, #tpu.memory_space<vmem>>, vector<32x32xf32>
    %cst_7 = arith.constant dense<0.000000e+00> : vector<8x32xf32>
    %5 = tpu.matmul %0, %4, %cst_7 {dimension_numbers = #tpu.dot_dimension_numbers<[1], [0], [0], [1], [0, 0, 1, 1], [], []>} : vector<8x32xf32>, vector<32x32xf32>, vector<8x32xf32> -> vector<8x32xf32>
    %c0_8 = arith.constant 0 : index
    %c0_9 = arith.constant 0 : index
    %6 = vector.load %arg4[%c0_8, %c0_9] : memref<1x32xf32, #tpu.memory_space<vmem>>, vector<1x32xf32>
    %7 = vector.broadcast %6 : vector<1x32xf32> to vector<8x32xf32>
    %8 = arith.addf %5, %7 : vector<8x32xf32>
    %9 = vector.shape_cast %3 : vector<128x32xf32> to vector<16x8x32xf32>
    %10 = tpu.concatenate %8, %8 in 0 : vector<8x32xf32>, vector<8x32xf32> -> vector<16x32xf32>
    %11 = vector.shape_cast %10 : vector<16x32xf32> to vector<16x1x32xf32>
    %12 = vector.broadcast %11 : vector<16x1x32xf32> to vector<16x8x32xf32>
    %13 = arith.addf %9, %12 : vector<16x8x32xf32>
    %14 = math.tanh %13 : vector<16x8x32xf32>
    %c0_10 = arith.constant 0 : index
    %c0_11 = arith.constant 0 : index
    %15 = vector.load %arg5[%c0_10, %c0_11] : memref<1x32xf32, #tpu.memory_space<vmem>>, vector<1x32xf32>
    %16 = vector.shape_cast %15 : vector<1x32xf32> to vector<1x1x32xf32>
    %17 = vector.broadcast %16 : vector<1x1x32xf32> to vector<16x8x32xf32>
    %18 = arith.mulf %14, %17 : vector<16x8x32xf32>
    %cst_12 = arith.constant dense<0.000000e+00> : vector<16x8xf32>
    %19 = vector.multi_reduction <add>, %18, %cst_12 [2] : vector<16x8x32xf32> to vector<16x8xf32>
    %cst_13 = arith.constant dense<0xFF800000> : vector<16xf32>
    %20 = vector.multi_reduction <maximumf>, %19, %cst_13 [1] : vector<16x8xf32> to vector<16xf32>
    %21 = vector.shape_cast %20 : vector<16xf32> to vector<16x1xf32>
    %22 = vector.broadcast %21 : vector<16x1xf32> to vector<16x8xf32>
    %23 = arith.subf %19, %22 : vector<16x8xf32>
    %24 = math.exp %23 : vector<16x8xf32>
    %cst_14 = arith.constant dense<0.000000e+00> : vector<16xf32>
    %25 = vector.multi_reduction <add>, %24, %cst_14 [1] : vector<16x8xf32> to vector<16xf32>
    %26 = vector.shape_cast %25 : vector<16xf32> to vector<16x1xf32>
    %27 = vector.broadcast %26 : vector<16x1xf32> to vector<16x8xf32>
    %28 = arith.divf %24, %27 : vector<16x8xf32>
    %29 = vector.shape_cast %1 : vector<128x32xf32> to vector<16x8x32xf32>
    %30 = vector.shape_cast %28 : vector<16x8xf32> to vector<16x8x1xf32>
    %31 = vector.broadcast %30 : vector<16x8x1xf32> to vector<16x8x32xf32>
    %32 = arith.mulf %29, %31 : vector<16x8x32xf32>
    %cst_15 = arith.constant dense<0.000000e+00> : vector<16x32xf32>
    %33 = vector.multi_reduction <add>, %32, %cst_15 [1] : vector<16x8x32xf32> to vector<16x32xf32>
    %34 = vector.extract_strided_slice %33 {offsets = [0, 0], sizes = [8, 32], strides = [1, 1]} : vector<16x32xf32> to vector<8x32xf32>
    %35 = vector.extract_strided_slice %33 {offsets = [8, 0], sizes = [8, 32], strides = [1, 1]} : vector<16x32xf32> to vector<8x32xf32>
    %c0_16 = arith.constant 0 : index
    %c0_17 = arith.constant 0 : index
    %36 = vector.load %arg6[%c0_16, %c0_17] : memref<32x32xf32, #tpu.memory_space<vmem>>, vector<32x32xf32>
    %cst_18 = arith.constant dense<0.000000e+00> : vector<8x32xf32>
    %37 = tpu.matmul %0, %36, %cst_18 {dimension_numbers = #tpu.dot_dimension_numbers<[1], [0], [0], [1], [0, 0, 1, 1], [], []>} : vector<8x32xf32>, vector<32x32xf32>, vector<8x32xf32> -> vector<8x32xf32>
    %c0_19 = arith.constant 0 : index
    %c0_20 = arith.constant 0 : index
    %38 = vector.load %arg7[%c0_19, %c0_20] : memref<32x32xf32, #tpu.memory_space<vmem>>, vector<32x32xf32>
    %cst_21 = arith.constant dense<0.000000e+00> : vector<8x32xf32>
    %39 = tpu.matmul %34, %38, %cst_21 {dimension_numbers = #tpu.dot_dimension_numbers<[1], [0], [0], [1], [0, 0, 1, 1], [], []>} : vector<8x32xf32>, vector<32x32xf32>, vector<8x32xf32> -> vector<8x32xf32>
    %40 = arith.addf %37, %39 : vector<8x32xf32>
    %c0_22 = arith.constant 0 : index
    %c0_23 = arith.constant 0 : index
    %41 = vector.load %arg8[%c0_22, %c0_23] : memref<32x32xf32, #tpu.memory_space<vmem>>, vector<32x32xf32>
    %cst_24 = arith.constant dense<0.000000e+00> : vector<8x32xf32>
    %42 = tpu.matmul %35, %41, %cst_24 {dimension_numbers = #tpu.dot_dimension_numbers<[1], [0], [0], [1], [0, 0, 1, 1], [], []>} : vector<8x32xf32>, vector<32x32xf32>, vector<8x32xf32> -> vector<8x32xf32>
    %43 = arith.addf %40, %42 : vector<8x32xf32>
    %c0_25 = arith.constant 0 : index
    %c0_26 = arith.constant 0 : index
    %44 = vector.load %arg9[%c0_25, %c0_26] : memref<1x32xf32, #tpu.memory_space<vmem>>, vector<1x32xf32>
    %45 = vector.broadcast %44 : vector<1x32xf32> to vector<8x32xf32>
    %46 = arith.addf %43, %45 : vector<8x32xf32>
    %cst_27 = arith.constant 0.000000e+00 : f32
    %47 = vector.broadcast %cst_27 : f32 to vector<8x32xf32>
    %48 = arith.maximumf %46, %47 : vector<8x32xf32>
    %c0_28 = arith.constant 0 : index
    %c0_29 = arith.constant 0 : index
    %49 = vector.load %arg10[%c0_28, %c0_29] : memref<32x128xf32, #tpu.memory_space<vmem>>, vector<32x128xf32>
    %cst_30 = arith.constant dense<0.000000e+00> : vector<8x128xf32>
    %50 = tpu.matmul %48, %49, %cst_30 {dimension_numbers = #tpu.dot_dimension_numbers<[1], [0], [0], [1], [0, 0, 1, 1], [], []>} : vector<8x32xf32>, vector<32x128xf32>, vector<8x128xf32> -> vector<8x128xf32>
    %c0_31 = arith.constant 0 : index
    %c0_32 = arith.constant 0 : index
    %51 = vector.load %arg11[%c0_31, %c0_32] : memref<1x128xf32, #tpu.memory_space<vmem>>, vector<1x128xf32>
    %52 = vector.broadcast %51 : vector<1x128xf32> to vector<8x128xf32>
    %53 = arith.addf %50, %52 : vector<8x128xf32>
    %c0_33 = arith.constant 0 : index
    %c0_34 = arith.constant 0 : index
    %54 = vector.load %arg12[%c0_33, %c0_34] : memref<8x128xf32, #tpu.memory_space<vmem>>, vector<8x128xf32>
    tpu.vector_store %arg12[%c0_33, %c0_34], %53 {strides = array<i32>} : memref<8x128xf32, #tpu.memory_space<vmem>>, vector<8x128xf32>,
    return
  }
}

</mosaic_0001>

<bundles_post_ra>
// kernel: forward_pallas.3
= control target key start
LH: loop header
LB: loop body
LE: loop exit
PB: predicated region body
PF: predicated region fallthrough
CT: control target
= control target key end

     0   :  { %vm62_vm0 = vcmask 261120   ;;  %vm2213_vm1 = vcmask 1041409   ;;  %vm2212_vm2 = vcmask 1042434   ;;  %vm2211_vm3 = vcmask 1043459   ;;  %s2194_s3 = inlined_call_operand.vmem [shape: f32[32,32], index: 3, kind: input, shape index: {}]   ;;  %s2195_s1 = inlined_call_operand.vmem [shape: f32[128,32], index: 1, kind: input, shape index: {}]   ;;  %s2196_s2 = inlined_call_operand.vmem [shape: f32[32,32], index: 2, kind: input, shape index: {}]   ;;  %s2197_s0 = inlined_call_operand.vmem [shape: f32[8,32], index: 0, kind: input, shape index: {}]   ;;  %s2198_s4 = inlined_call_operand.vmem [shape: f32[1,32], index: 4, kind: input, shape index: {}]   ;;  %s2199_s5 = inlined_call_operand.vmem [shape: f32[1,32], index: 5, kind: input, shape index: {}]   ;;  %s2200_s6 = inlined_call_operand.vmem [shape: f32[32,32], index: 6, kind: input, shape index: {}]   ;;  %s2201_s7 = inlined_call_operand.vmem [shape: f32[32,32], index: 7, kind: input, shape index: {}]   ;;  %s2202_s8 = inlined_call_operand.vmem [shape: f32[32,32], index: 8, kind: input, shape index: {}]   ;;  %s2203_s9 = inlined_call_operand.vmem [shape: f32[1,32], index: 9, kind: input, shape index: {}]   ;;  %s2204_s11 = inlined_call_operand.vmem [shape: f32[1,128], index: 11, kind: input, shape index: {}]   ;;  %s2205_s10 = inlined_call_operand.vmem [shape: f32[32,128], index: 10, kind: input, shape index: {}]   ;;  %s2206_s12 = inlined_call_operand.vmem [shape: f32[8,128], index: 12, kind: output, shape index: {}]  }
   0x1   :  { %v61_v0 = vld [vmem:[%s2194_s3 + $0x18] sm:$0xff]  ;;  %v60_v1 = vld [vmem:[%s2194_s3 + $0x10] sm:$0xff]  ;;  %v59_v2 = vld [vmem:[%s2194_s3 + $0x8] sm:$0xff]  ;;  %vm2210_vm4 = vcmask 1044484   ;;  %vm2209_vm5 = vcmask 1045509   ;;  %vm2208_vm6 = vcmask 1046534  }
   0x2   :  { %123 = vmatpush.msra.mxu0 %v61_v0  ;;  %1231 = vmatpush.msra.mxu1 %v61_v0  ;;  %v58_v3 = vld [vmem:[%s2194_s3] sm:$0xff]  ;;  %v48_v5 = vld [vmem:[%s2195_s1 + $0x30] sm:$0xff]  ;;  %v49_v6 = vld [vmem:[%s2195_s1 + $0x38] sm:$0xff]  ;;  %vm2207_vm7 = vcmask 1047559   ;;  %vm388_vm8 = vcmask 64512  }
   0x3   :  { %1232 = vmatpush.msra.mxu2 %v61_v0  ;;  %1233 = vmatpush.msra.mxu3 %v61_v0  ;;  %v42_v4 = vld [vmem:[%s2195_s1] sm:$0xff]  ;;  %v53_v7 = vld [vmem:[%s2195_s1 + $0x58] sm:$0xff]  ;;  %v178_v9 = vld [vmem:[%s2196_s2 + $0x10] sm:$0xff] }
   0x4   :  { %124 = vmatpush.msra.mxu0 %v60_v1  ;;  %1234 = vmatpush.msra.mxu1 %v60_v1  ;;  %v179_v8 = vld [vmem:[%s2196_s2 + $0x18] sm:$0xff]  ;;  %v177_v10 = vld [vmem:[%s2196_s2 + $0x8] sm:$0xff]  ;;  %v176_v11 = vld [vmem:[%s2196_s2] sm:$0xff] }
   0x5   :  { %1235 = vmatpush.msra.mxu2 %v60_v1  ;;  %1236 = vmatpush.msra.mxu3 %v60_v1  ;;  %v43_v12 = vld [vmem:[%s2195_s1 + $0x8] sm:$0xff]  ;;  %v50_v13 = vld [vmem:[%s2195_s1 + $0x40] sm:$0xff]  ;;  %v44_v16 = vld [vmem:[%s2195_s1 + $0x10] sm:$0xff] }
   0x6   :  { %125 = vmatpush.msra.mxu0 %v59_v2  ;;  %1237 = vmatpush.msra.mxu1 %v59_v2  ;;  %v54_v14 = vld [vmem:[%s2195_s1 + $0x60] sm:$0xff]  ;;  %v51_v17 = vld [vmem:[%s2195_s1 + $0x48] sm:$0xff]  ;;  %v45_v19 = vld [vmem:[%s2195_s1 + $0x18] sm:$0xff] }
   0x7   :  { %1238 = vmatpush.msra.mxu2 %v59_v2  ;;  %1239 = vmatpush.msra.mxu3 %v59_v2  ;;  %v41_v15 = vld [vmem:[%s2197_s0] sm:$0xff]  ;;  %v55_v18 = vld [vmem:[%s2195_s1 + $0x68] sm:$0xff]  ;;  %v52_v20 = vld [vmem:[%s2195_s1 + $0x50] sm:$0xff] }
   0x8   :  { %126 = vmatpush.msra.mxu0 %v58_v3  ;;  %1240 = vmatpush.msra.mxu1 %v58_v3  ;;  %v56_v21 = vld [vmem:[%s2195_s1 + $0x70] sm:$0xff]  ;;  %v46_v22 = vld [vmem:[%s2195_s1 + $0x20] sm:$0xff]  ;;  %v57_v23 = vld [vmem:[%s2195_s1 + $0x78] sm:$0xff] }
   0x9   :  { %1241 = vmatpush.msra.mxu2 %v58_v3  ;;  %1242 = vmatpush.msra.mxu3 %v58_v3  ;;  %v47_v24 = vld [vmem:[%s2195_s1 + $0x28] sm:$0xff]  ;;  %v1247_v29 = vld [vmem:[%s2198_s4] ss:$0 sm:$0xff] }
   0xa   :  { %1210 = vmatmul.msk.f32.vlgmr.msra.gmra.mxu0 %vm62_vm0, %v42_v4  ;;  %1216 = vmatmul.msk.f32.vlgmr.msra.gmra.mxu1 %vm62_vm0, %v48_v5  ;;  %v1540_v48 = vld [vmem:[%s2199_s5] ss:$0 sm:$0xff] }
   0xb   :  { %1217 = vmatmul.msk.f32.vlgmr.msra.gmra.mxu2 %vm62_vm0, %v49_v6  ;;  %1221 = vmatmul.msk.f32.vlgmr.msra.gmra.mxu3 %vm62_vm0, %v53_v7 }
   0xc   :  { %199 = vmatpush.msrb.mxu1 %v179_v8 }
   0xe   :  { %200 = vmatpush.msrb.mxu1 %v178_v9 }
  0x10   :  { %201 = vmatpush.msrb.mxu1 %v177_v10 }
  0x12   :  { %202 = vmatpush.msrb.mxu1 %v176_v11  ;;  %1211 = vmatmul.msk.f32.gmra.mxu0 %vm62_vm0, %v43_v12 }
  0x13   :  { %1218 = vmatmul.msk.f32.gmra.mxu2 %vm62_vm0, %v50_v13  ;;  %1222 = vmatmul.msk.f32.gmra.mxu3 %vm62_vm0, %v54_v14 }
  0x14   :  { %1226 = vmatmul.msk.f32.vlgmr.msrb.gmra.mxu1 %vm62_vm0, %v41_v15 }
  0x1a   :  { %1212 = vmatmul.msk.f32.gmra.mxu0 %vm62_vm0, %v44_v16 }
  0x1b   :  { %1219 = vmatmul.msk.f32.gmra.mxu2 %vm62_vm0, %v51_v17  ;;  %1223 = vmatmul.msk.f32.gmra.mxu3 %vm62_vm0, %v55_v18 }
  0x22   :  { %1213 = vmatmul.msk.f32.gmra.mxu0 %vm62_vm0, %v45_v19 }
  0x23   :  { %1220 = vmatmul.msk.f32.gmra.mxu2 %vm62_vm0, %v52_v20  ;;  %1224 = vmatmul.msk.f32.gmra.mxu3 %vm62_vm0, %v56_v21 }
  0x2a   :  { %1214 = vmatmul.msk.f32.gmra.mxu0 %vm62_vm0, %v46_v22 }
  0x2b   :  { %1225 = vmatmul.msk.f32.gmra.mxu3 %vm62_vm0, %v57_v23 }
  0x32   :  { %1215 = vmatmul.msk.f32.gmra.mxu0 %vm62_vm0, %v47_v24 }
  0x87   :  { %v128_v25 = vpop.f32.mrf.mxu0  ;;  %v146_v26 = vpop.f32.mrf.mxu1 }
  0x8e   :  { %v149_v27 = vpop.f32.mrf.mxu2  ;;  %v1522_v28 = vpop.f32.mrf.mxu3 }
  0x8f   :  { %v131_v30 = vpop.f32.mrf.mxu0 }
  0x91   :  { %v204_v31 = vpop.f32.mrf.mxu1 }
  0x92   :  { %v1527_v32 = vadd.f32 %v1247_v29, %v204_v31 }
  0x94   :  { %v215_v33 = vperm.slane %v1527_v32, 0  ;;  %v208_v34 = vrot.slane %v1527_v32, 1  ;;  %v214_v35 = vrot.slane %v1527_v32, 7  ;;  %v209_v38 = vrot.slane %v1527_v32, 2 }
  0x95   :  { %v213_v45 = vrot.slane %v1527_v32, 6  ;;  %v210_v56 = vrot.slane %v1527_v32, 3  ;;  %v211_v62 = vrot.slane %v1527_v32, 4  ;;  %v212_v13 = vrot.slane %v1527_v32, 5 }
  0x96   :  { %v152_v36 = vpop.f32.mrf.mxu2  ;;  %v231_v37 = vadd.f32 %v215_v33, %v128_v25  ;;  %v216_v39 = vperm.slane %v208_v34, 0  ;;  %v164_v41 = vpop.f32.mrf.mxu3  ;;  %v1533_v43 = vperm.slane %v214_v35, 0  ;;  %v217_v46 = vperm.slane %v209_v38, 0 }
  0x97   :  { %v239_v40 = vadd.f32 %v215_v33, %v152_v36  ;;  %v134_v42 = vpop.f32.mrf.mxu0  ;;  %v1542_v49 = vperm.slane %v213_v45, 0  ;;  %v218_v1 = vperm.slane %v210_v56, 0  ;;  %v219_v4 = vperm.slane %v211_v62, 0 }
  0x98   :  { %1251 = vtanh.f32 %v231_v37  ;;  %v232_v44 = vadd.f32 %v216_v39, %v131_v30  ;;  %v238_v47 = vadd.f32 %v1533_v43, %v149_v27  ;;  %v233_v51 = vadd.f32 %v217_v46, %v134_v42 }
  0x99   :  { %1253 = vtanh.f32 %v239_v40  ;;  %v237_v57 = vadd.f32 %v1542_v49, %v146_v26  ;;  %v220_v19 = vperm.slane %v212_v13, 0  ;;  %v243_v23 = vadd.f32 %v219_v4, %v164_v41 }
  0x9a   :  { %1255 = vtanh.f32 %v232_v44  ;;  %v242_v30 = vadd.f32 %v218_v1, %v1522_v28 }
  0x9b   :  { %1257 = vtanh.f32 %v238_v47 }
  0x9c   :  { %1259 = vtanh.f32 %v233_v51 }
  0x9d   :  { %1261 = vtanh.f32 %v237_v57 }
  0x9e   :  { %v1252_v50 = vpop.eup %1251  ;;  %v155_v55 = vpop.f32.mrf.mxu2 }
  0x9f   :  { %v1254_v52 = vpop.eup %1253  ;;  %v137_v53 = vpop.f32.mrf.mxu0  ;;  %v267_v54 = vmul.f32 %v1252_v50, %v1540_v48  ;;  %v240_v9 = vadd.f32 %v216_v39, %v155_v55 }
  0xa0   :  { %v275_v58 = vmul.f32 %v1254_v52, %v1540_v48  ;;  %v167_v59 = vpop.f32.mrf.mxu3  ;;  %v1256_v61 = vpop.eup %1255  ;;  %v234_v5 = vadd.f32 %v218_v1, %v137_v53  ;;  %v347_v1 = vlaneseq }
  0xa1   :  { %v283_v60 = vsel %vm62_vm0, %v267_v54, 0.0  ;;  %v1258_v0 = vpop.eup %1257  ;;  %v268_v3 = vmul.f32 %v1256_v61, %v1540_v48  ;;  %v244_v35 = vadd.f32 %v220_v19, %v167_v59 }
  0xa2   :  { %284 = vadd.xlane.f32.xlu0 %v283_v60  ;;  %v307_v63 = vsel %vm62_vm0, %v275_v58, 0.0  ;;  %v274_v2 = vmul.f32 %v1258_v0, %v1540_v48  ;;  %v1260_v8 = vpop.eup %1259  ;;  %1263 = vtanh.f32 %v234_v5 }
  0xa3   :  { %308 = vadd.xlane.f32.xlu2 %v307_v63  ;;  %v286_v11 = vsel %vm62_vm0, %v268_v3, 0.0  ;;  %v1262_v12 = vpop.eup %1261  ;;  %v269_v16 = vmul.f32 %v1260_v8, %v1540_v48  ;;  %v1593_v3 = vand.u32 127, %v347_v1 }
  0xa4   :  { %v304_v6 = vsel %vm62_vm0, %v274_v2, 0.0  ;;  %v273_v18 = vmul.f32 %v1262_v12, %v1540_v48 }
  0xa5   :  { %305 = vadd.xlane.f32.xlu1 %v304_v6  ;;  %v289_v20 = vsel %vm62_vm0, %v269_v16, 0.0 }
  0xa6   :  { %v158_v14 = vpop.f32.mrf.mxu2  ;;  %v301_v26 = vsel %vm62_vm0, %v273_v18, 0.0 }
  0xa7   :  { %v140_v7 = vpop.f32.mrf.mxu0  ;;  %v241_v17 = vadd.f32 %v217_v46, %v158_v14 }
  0xa8   :  { %v235_v10 = vadd.f32 %v219_v4, %v140_v7  ;;  %v170_v15 = vpop.f32.mrf.mxu3  ;;  %v1264_v22 = vpop.eup %1263 }
  0xa9   :  { %v270_v31 = vmul.f32 %v1264_v22, %v1540_v48  ;;  %v245_v42 = vadd.f32 %v1542_v49, %v170_v15 }
  0xaa   :  { %287 = vadd.xlane.f32.xlu0 %v286_v11  ;;  %1265 = vtanh.f32 %v235_v10 }
  0xab   :  { %1267 = vtanh.f32 %v240_v9  ;;  %v292_v37 = vsel %vm62_vm0, %v270_v31, 0.0 }
  0xac   :  { %1269 = vtanh.f32 %v241_v17 }
  0xad   :  { %290 = vadd.xlane.f32.xlu1 %v289_v20 }
  0xaf   :  { %v143_v21 = vpop.f32.mrf.mxu0 }
  0xb0   :  { %v236_v24 = vadd.f32 %v220_v19, %v143_v21  ;;  %v1266_v25 = vpop.eup %1265  ;;  %v173_v33 = vpop.f32.mrf.mxu3 }
  0xb1   :  { %v1268_v27 = vpop.eup %1267  ;;  %v271_v29 = vmul.f32 %v1266_v25, %v1540_v48  ;;  %v246_v39 = vadd.f32 %v1533_v43, %v173_v33 }
  0xb2   :  { %1271 = vtanh.f32 %v236_v24  ;;  %302 = vadd.xlane.f32.xlu0 %v301_v26  ;;  %v276_v34 = vmul.f32 %v1268_v27, %v1540_v48  ;;  %v1270_v36 = vpop.eup %1269 }
  0xb3   :  { %1273 = vtanh.f32 %v243_v23  ;;  %v295_v32 = vsel %vm62_vm0, %v271_v29, 0.0  ;;  %v277_v44 = vmul.f32 %v1270_v36, %v1540_v48 }
  0xb4   :  { %296 = vadd.xlane.f32.xlu2 %v295_v32  ;;  %1275 = vtanh.f32 %v242_v30  ;;  %v310_v28 = vsel %vm62_vm0, %v276_v34, 0.0 }
  0xb5   :  { %293 = vadd.xlane.f32.xlu1 %v292_v37  ;;  %1277 = vtanh.f32 %v244_v35  ;;  %v313_v43 = vsel %vm62_vm0, %v277_v44, 0.0 }
  0xb6   :  { %1279 = vtanh.f32 %v246_v39 }
  0xb7   :  { %1281 = vtanh.f32 %v245_v42 }
  0xb8   :  { %v1272_v38 = vpop.eup %1271 }
  0xb9   :  { %v272_v40 = vmul.f32 %v1272_v38, %v1540_v48  ;;  %v1274_v41 = vpop.eup %1273 }
  0xba   :  { %311 = vadd.xlane.f32.xlu0 %v310_v28  ;;  %v1276_v46 = vpop.eup %1275  ;;  %v279_v47 = vmul.f32 %v1274_v41, %v1540_v48 }
  0xbb   :  { %v298_v45 = vsel %vm62_vm0, %v272_v40, 0.0  ;;  %v1278_v50 = vpop.eup %1277  ;;  %v278_v51 = vmul.f32 %v1276_v46, %v1540_v48 }
  0xbc   :  { %299 = vadd.xlane.f32.xlu2 %v298_v45  ;;  %v319_v52 = vsel %vm62_vm0, %v279_v47, 0.0  ;;  %v1280_v53 = vpop.eup %1279  ;;  %v280_v49 = vmul.f32 %v1278_v50, %v1540_v48  ;;  %v1364_v47 = vmov 0  }
  0xbd   :  { %314 = vadd.xlane.f32.xlu1 %v313_v43  ;;  %v316_v54 = vsel %vm62_vm0, %v278_v51, 0.0  ;;  %v1282_v55 = vpop.eup %1281  ;;  %v282_v56 = vmul.f32 %v1280_v53, %v1540_v48  ;;  %1246 = vset.pattern.permute.xlu0 %v1364_v47 }
  0xbe   :  { %v322_v57 = vsel %vm62_vm0, %v280_v49, 0.0  ;;  %v281_v58 = vmul.f32 %v1282_v55, %v1540_v48  ;;  %1245 = vset.pattern.permute.xlu1 %v1364_v47  ;;  %1244 = vset.pattern.permute.xlu2 %v1364_v47 }
  0xbf   :  { %v328_v59 = vsel %vm62_vm0, %v282_v56, 0.0 }
  0xc0   :  { %v325_v60 = vsel %vm62_vm0, %v281_v58, 0.0 }
  0xc2   :  { %320 = vadd.xlane.f32.xlu0 %v319_v52 }
  0xc4   :  { %317 = vadd.xlane.f32.xlu2 %v316_v54 }
  0xc5   :  { %323 = vadd.xlane.f32.xlu1 %v322_v57 }
  0xca   :  { %329 = vadd.xlane.f32.xlu0 %v328_v59 }
  0xcc   :  { %326 = vadd.xlane.f32.xlu2 %v325_v60 }
 0x115   :  { %v1583_v61 = vpop.xlane.xlu0 %284 }
 0x116   :  { %v1589_v0 = vpop.xlane.xlu2 %308  ;;  %v349_v6 = vperm.slane %v1583_v61, %v1593_v3 }
 0x117   :  { %v357_v26 = vperm.slane %v1589_v0, %v1593_v3 }
 0x118   :  { %v1585_v62 = vpop.xlane.xlu1 %305 }
 0x119   :  { %v356_v19 = vperm.slane %v1585_v62, %v1593_v3 }
 0x11d   :  { %v1587_v63 = vpop.xlane.xlu0 %287 }
 0x11e   :  { %v350_v4 = vperm.slane %v1587_v63, %v1593_v3 }
 0x120   :  { %v1591_v2 = vpop.xlane.xlu1 %290  ;;  %v366_v8 = vsel %vm2213_vm1, %v350_v4, %v349_v6 }
 0x121   :  { %v351_v7 = vperm.slane %v1591_v2, %v1593_v3 }
 0x123   :  { %v368_v12 = vsel %vm2212_vm2, %v351_v7, %v366_v8 }
 0x125   :  { %v1595_v48 = vpop.xlane.xlu0 %302 }
 0x126   :  { %v355_v17 = vperm.slane %v1595_v48, %v1593_v3 }
 0x127   :  { %v1599_v5 = vpop.xlane.xlu2 %296 }
 0x128   :  { %v1606_v9 = vpop.xlane.xlu1 %293  ;;  %v353_v13 = vperm.slane %v1599_v5, %v1593_v3 }
 0x129   :  { %v352_v10 = vperm.slane %v1606_v9, %v1593_v3 }
 0x12b   :  { %v370_v14 = vsel %vm2211_vm3, %v352_v10, %v368_v12 }
 0x12c   :  { %v372_v18 = vsel %vm2210_vm4, %v353_v13, %v370_v14 }
 0x12d   :  { %v312_v11 = vpop.xlane.xlu0 %311 }
 0x12e   :  { %v358_v22 = vperm.slane %v312_v11, %v1593_v3 }
 0x12f   :  { %v1614_v15 = vpop.xlane.xlu2 %299 }
 0x130   :  { %v354_v16 = vperm.slane %v1614_v15, %v1593_v3  ;;  %v315_v20 = vpop.xlane.xlu1 %314  ;;  %v379_v30 = vsel %vm2213_vm1, %v358_v22, %v357_v26 }
 0x131   :  { %v359_v29 = vperm.slane %v315_v20, %v1593_v3 }
 0x132   :  { %v374_v21 = vsel %vm2209_vm5, %v354_v16, %v372_v18 }
 0x133   :  { %v376_v23 = vsel %vm2208_vm6, %v355_v17, %v374_v21  ;;  %v380_v33 = vsel %vm2212_vm2, %v359_v29, %v379_v30 }
 0x134   :  { %v378_v25 = vsel %vm2207_vm7, %v356_v19, %v376_v23 }
 0x135   :  { %v1626_v24 = vpop.xlane.xlu0 %320  ;;  %v389_v27 = vsel %vm388_vm8, %v378_v25, -inf }
 0x136   :  { %390 = vmax.xlane.f32.xlu1 %v389_v27  ;;  %v361_v35 = vperm.slane %v1626_v24, %v1593_v3 }
 0x137   :  { %v1634_v31 = vpop.xlane.xlu2 %317 }
 0x138   :  { %v360_v32 = vperm.slane %v1634_v31, %v1593_v3  ;;  %v1642_v36 = vpop.xlane.xlu1 %323 }
 0x139   :  { %v362_v39 = vperm.slane %v1642_v36, %v1593_v3 }
 0x13a   :  { %v381_v34 = vsel %vm2211_vm3, %v360_v32, %v380_v33 }
 0x13b   :  { %v382_v38 = vsel %vm2210_vm4, %v361_v35, %v381_v34 }
 0x13c   :  { %v383_v42 = vsel %vm2209_vm5, %v362_v39, %v382_v38 }
 0x13d   :  { %v1644_v37 = vpop.xlane.xlu0 %329 }
 0x13e   :  { %v364_v41 = vperm.slane %v1644_v37, %v1593_v3 }
 0x13f   :  { %v1649_v28 = vpop.xlane.xlu2 %326 }
 0x140   :  { %v363_v40 = vperm.slane %v1649_v28, %v1593_v3 }
 0x142   :  { %v384_v44 = vsel %vm2208_vm6, %v363_v40, %v383_v42 }
 0x143   :  { %v385_v45 = vsel %vm2207_vm7, %v364_v41, %v384_v44 }
 0x144   :  { %v392_v46 = vsel %vm388_vm8, %v385_v45, -inf }
 0x145   :  { %393 = vmax.xlane.f32.xlu2 %v392_v46 }
 0x1a9   :  { %v391_v43 = vpop.xlane.xlu1 %390 }
 0x1aa   :  { %v397_v56 = vperm.slane %v391_v43, 0  ;;  %v398_v57 = vperm.slane %v391_v43, 1  ;;  %v399_v58 = vperm.slane %v391_v43, 2  ;;  %v404_v10 = vperm.slane %v391_v43, 7 }
 0x1ab   :  { %v401_v12 = vperm.slane %v391_v43, 4  ;;  %v400_v14 = vperm.slane %v391_v43, 3  ;;  %v403_v21 = vperm.slane %v391_v43, 6  ;;  %v402_v25 = vperm.slane %v391_v43, 5 }
 0x1ac   :  { %v429_v4 = vsub.f32 %v1583_v61, %v397_v56  ;;  %v430_v6 = vsub.f32 %v1587_v63, %v398_v57  ;;  %v431_v7 = vsub.f32 %v1591_v2, %v399_v58  ;;  %v436_v61 = vsub.f32 %v1585_v62, %v404_v10 }
 0x1ad   :  { %v433_v63 = vsub.f32 %v1599_v5, %v401_v12  ;;  %v432_v2 = vsub.f32 %v1606_v9, %v400_v14  ;;  %v435_v9 = vsub.f32 %v1595_v48, %v403_v21  ;;  %v434_v27 = vsub.f32 %v1614_v15, %v402_v25 }
 0x1ae   :  { %v445_v8 = vmul.f32 1.442695, %v429_v4  ;;  %v449_v13 = vmul.f32 1.442695, %v431_v7  ;;  %v459_v18 = vmul.f32 1.442695, %v436_v61 }
 0x1af   :  { %v451_v23 = vmul.f32 1.442695, %v432_v2  ;;  %v457_v30 = vmul.f32 1.442695, %v435_v9  ;;  %v455_v34 = vmul.f32 1.442695, %v434_v27 }
 0x1b8   :  { %v1659_v50 = vpop.xlane.xlu2 %393 }
 0x1b9   :  { %v407_v51 = vperm.slane %v1659_v50, 2  ;;  %v406_v52 = vperm.slane %v1659_v50, 1  ;;  %v405_v53 = vperm.slane %v1659_v50, 0  ;;  %v410_v19 = vperm.slane %v1659_v50, 5 }
 0x1ba   :  { %v409_v32 = vperm.slane %v1659_v50, 4  ;;  %v408_v35 = vperm.slane %v1659_v50, 3  ;;  %v412_v40 = vperm.slane %v1659_v50, 7  ;;  %v411_v44 = vperm.slane %v1659_v50, 6 }
 0x1bb   :  { %v439_v49 = vsub.f32 %v315_v20, %v407_v51  ;;  %v438_v54 = vsub.f32 %v312_v11, %v406_v52  ;;  %v437_v55 = vsub.f32 %v1589_v0, %v405_v53  ;;  %v447_v11 = vmul.f32 1.442695, %v430_v6 }
 0x1bc   :  { %v453_v20 = vmul.f32 1.442695, %v433_v63  ;;  %v442_v5 = vsub.f32 %v1642_v36, %v410_v19  ;;  %v441_v48 = vsub.f32 %v1626_v24, %v409_v32  ;;  %v440_v15 = vsub.f32 %v1634_v31, %v408_v35 }
 0x1bd   :  { %v465_v59 = vmul.f32 1.442695, %v439_v49  ;;  %v463_v60 = vmul.f32 1.442695, %v438_v54  ;;  %v461_v1 = vmul.f32 1.442695, %v437_v55  ;;  %v444_v24 = vsub.f32 %v1644_v37, %v412_v40 }
 0x1be   :  { %v471_v29 = vmul.f32 1.442695, %v442_v5  ;;  %v469_v39 = vmul.f32 1.442695, %v441_v48  ;;  %v467_v42 = vmul.f32 1.442695, %v440_v15  ;;  %v443_v31 = vsub.f32 %v1649_v28, %v411_v44 }
 0x1bf   :  { %1283 = vpow2.f32 %v465_v59  ;;  %v475_v47 = vmul.f32 1.442695, %v444_v24 }
 0x1c0   :  { %1285 = vpow2.f32 %v463_v60  ;;  %v473_v43 = vmul.f32 1.442695, %v443_v31 }
 0x1c1   :  { %1287 = vpow2.f32 %v461_v1 }
 0x1c2   :  { %1289 = vpow2.f32 %v445_v8 }
 0x1c3   :  { %1291 = vpow2.f32 %v447_v11 }
 0x1c4   :  { %1293 = vpow2.f32 %v449_v13 }
 0x1c5   :  { %v1668_v0 = vpop.eup %1283  ;;  %1295 = vpow2.f32 %v459_v18 }
 0x1c6   :  { %v1670_v16 = vpop.eup %1285  ;;  %524 = vperm.xlu0 %1246, %v1668_v0   ;;  %1297 = vpow2.f32 %v453_v20 }
 0x1c7   :  { %v1673_v17 = vpop.eup %1287  ;;  %521 = vperm.xlu1 %1245, %v1670_v16   ;;  %1299 = vpow2.f32 %v451_v23 }
 0x1c8   :  { %518 = vperm.xlu2 %1244, %v1673_v17   ;;  %v1681_v22 = vpop.eup %1289  ;;  %1301 = vpow2.f32 %v471_v29 }
 0x1c9   :  { %v1683_v26 = vpop.eup %1291  ;;  %1303 = vpow2.f32 %v457_v30 }
 0x1ca   :  { %v1686_v62 = vpop.eup %1293  ;;  %1305 = vpow2.f32 %v455_v34 }
 0x1cb   :  { %v1694_v33 = vpop.eup %1295  ;;  %1307 = vpow2.f32 %v469_v39 }
 0x1cc   :  { %v1697_v38 = vpop.eup %1297  ;;  %1309 = vpow2.f32 %v467_v42 }
 0x1cd   :  { %v1700_v36 = vpop.eup %1299  ;;  %1311 = vpow2.f32 %v475_v47 }
 0x1ce   :  { %494 = vperm.xlu0 %1246, %v1681_v22   ;;  %v1707_v41 = vpop.eup %1301  ;;  %1313 = vpow2.f32 %v473_v43 }
 0x1cf   :  { %497 = vperm.xlu1 %1245, %v1683_v26   ;;  %v1710_v45 = vpop.eup %1303 }
 0x1d0   :  { %500 = vperm.xlu2 %1244, %v1686_v62   ;;  %v1713_v46 = vpop.eup %1305 }
 0x1d1   :  { %v1719_v51 = vpop.eup %1307 }
 0x1d2   :  { %v1721_v50 = vpop.eup %1309 }
 0x1d3   :  { %v1725_v52 = vpop.eup %1311 }
 0x1d4   :  { %v1727_v53 = vpop.eup %1313 }
 0x1d6   :  { %515 = vperm.xlu0 %1246, %v1694_v33  }
 0x1d7   :  { %506 = vperm.xlu1 %1245, %v1697_v38  }
 0x1d8   :  { %503 = vperm.xlu2 %1244, %v1700_v36  }
 0x1de   :  { %533 = vperm.xlu0 %1246, %v1707_v41  }
 0x1df   :  { %512 = vperm.xlu1 %1245, %v1710_v45  }
 0x1e0   :  { %509 = vperm.xlu2 %1244, %v1713_v46  }
 0x1e7   :  { %530 = vperm.xlu1 %1245, %v1719_v51  }
 0x1e8   :  { %527 = vperm.xlu2 %1244, %v1721_v50  }
 0x1ef   :  { %539 = vperm.xlu1 %1245, %v1725_v52  }
 0x1f0   :  { %536 = vperm.xlu2 %1244, %v1727_v53  }
 0x222   :  { %v519_v37 = vpop.permute.xlu2 %518 }
 0x223   :  { %v549_v25 = vperm.slane %v519_v37, %v1593_v3 }
 0x22a   :  { %v501_v28 = vpop.permute.xlu2 %500 }
 0x22b   :  { %v543_v4 = vperm.slane %v501_v28, %v1593_v3 }
 0x232   :  { %v504_v55 = vpop.permute.xlu2 %503 }
 0x233   :  { %v544_v10 = vperm.slane %v504_v55, %v1593_v3 }
 0x238   :  { %v525_v49 = vpop.permute.xlu0 %524 }
 0x239   :  { %v522_v54 = vpop.permute.xlu1 %521  ;;  %v551_v9 = vperm.slane %v525_v49, %v1593_v3 }
 0x23a   :  { %v510_v6 = vpop.permute.xlu2 %509  ;;  %v550_v19 = vperm.slane %v522_v54, %v1593_v3 }
 0x23b   :  { %v546_v14 = vperm.slane %v510_v6, %v1593_v3 }
 0x23c   :  { %v564_v27 = vsel %vm2213_vm1, %v550_v19, %v549_v25 }
 0x23d   :  { %v565_v34 = vsel %vm2212_vm2, %v551_v9, %v564_v27 }
 0x240   :  { %v495_v57 = vpop.permute.xlu0 %494 }
 0x241   :  { %v498_v56 = vpop.permute.xlu1 %497  ;;  %v541_v58 = vperm.slane %v495_v57, %v1593_v3 }
 0x242   :  { %v542_v59 = vperm.slane %v498_v56, %v1593_v3  ;;  %v528_v20 = vpop.permute.xlu2 %527 }
 0x243   :  { %v552_v29 = vperm.slane %v528_v20, %v1593_v3 }
 0x244   :  { %v557_v60 = vsel %vm2213_vm1, %v542_v59, %v541_v58 }
 0x245   :  { %v558_v7 = vsel %vm2212_vm2, %v543_v4, %v557_v60  ;;  %v566_v48 = vsel %vm2211_vm3, %v552_v29, %v565_v34 }
 0x246   :  { %v559_v11 = vsel %vm2211_vm3, %v544_v10, %v558_v7 }
 0x248   :  { %v516_v12 = vpop.permute.xlu0 %515 }
 0x249   :  { %v507_v1 = vpop.permute.xlu1 %506  ;;  %v548_v2 = vperm.slane %v516_v12, %v1593_v3 }
 0x24a   :  { %v545_v8 = vperm.slane %v507_v1, %v1593_v3  ;;  %v537_v39 = vpop.permute.xlu2 %536 }
 0x24b   :  { %v555_v44 = vperm.slane %v537_v39, %v1593_v3 }
 0x24c   :  { %v560_v13 = vsel %vm2210_vm4, %v545_v8, %v559_v11 }
 0x24d   :  { %v561_v18 = vsel %vm2209_vm5, %v546_v14, %v560_v13 }
 0x250   :  { %v534_v35 = vpop.permute.xlu0 %533 }
 0x251   :  { %v513_v61 = vpop.permute.xlu1 %512  ;;  %v554_v40 = vperm.slane %v534_v35, %v1593_v3 }
 0x252   :  { %v547_v63 = vperm.slane %v513_v61, %v1593_v3 }
 0x254   :  { %v562_v21 = vsel %vm2208_vm6, %v547_v63, %v561_v18 }
 0x255   :  { %v563_v23 = vsel %vm2207_vm7, %v548_v2, %v562_v21 }
 0x256   :  { %v573_v5 = vsel %vm388_vm8, %v563_v23, 0.0 }
 0x257   :  { %574 = vadd.xlane.f32.xlu0 %v573_v5 }
 0x259   :  { %v531_v30 = vpop.permute.xlu1 %530 }
 0x25a   :  { %v553_v32 = vperm.slane %v531_v30, %v1593_v3 }
 0x25c   :  { %v567_v15 = vsel %vm2210_vm4, %v553_v32, %v566_v48 }
 0x25d   :  { %v568_v42 = vsel %vm2209_vm5, %v554_v40, %v567_v15 }
 0x25e   :  { %v569_v47 = vsel %vm2208_vm6, %v555_v44, %v568_v42 }
 0x261   :  { %v540_v24 = vpop.permute.xlu1 %539 }
 0x262   :  { %v556_v31 = vperm.slane %v540_v24, %v1593_v3 }
 0x264   :  { %v570_v43 = vsel %vm2207_vm7, %v556_v31, %v569_v47 }
 0x265   :  { %v576_v37 = vsel %vm388_vm8, %v570_v43, 0.0 }
 0x266   :  { %577 = vadd.xlane.f32.xlu2 %v576_v37 }
 0x2ca   :  { %v1763_v28 = vpop.xlane.xlu0 %574 }
 0x2cb   :  { %v1766_v49 = vperm.slane %v1763_v28, 0  ;;  %v587_v54 = vperm.slane %v1763_v28, 6  ;;  %v1771_v55 = vperm.slane %v1763_v28, 1  ;;  %v1774_v3 = vperm.slane %v1763_v28, 2 }
 0x2cc   :  { %v1779_v57 = vperm.slane %v1763_v28, 7  ;;  %v1797_v7 = vperm.slane %v1763_v28, 3 }
 0x2cd   :  { %1315 = vrcp.f32 %v1766_v49  ;;  %v712_v10 = vand.u32 2147483647, %v587_v54  ;;  %v622_v12 = vand.u32 2147483647, %v1766_v49  ;;  %v624_v13 = vand.u32 2147483648, %v1766_v49 }
 0x2ce   :  { %1317 = vrcp.f32 %v587_v54  ;;  %vm708_vm9 = vweird.f32 %v587_v54  ;;  %v714_v14 = vand.u32 2147483648, %v587_v54  ;;  %v727_v61 = vand.u32 2147483647, %v1779_v57 }
 0x2cf   :  { %1319 = vrcp.f32 %v1771_v55  ;;  %v729_v18 = vand.u32 2147483648, %v1779_v57  ;;  %vm1820_vm10 = vcmp.eq.f32.partialorder %v712_v10, 8.507059e+37  ;;  %vm723_vm7 = vweird.f32 %v1779_v57 }
 0x2d0   :  { %1321 = vrcp.f32 %v1774_v3  ;;  %v715_v30 = vor.u32 1.1754944e-38, %v714_v14 }
 0x2d1   :  { %1323 = vrcp.f32 %v1779_v57 }
 0x2d3   :  { %v1776_v56 = vpop.eup %1315 }
 0x2d4   :  { %v1318_v58 = vpop.eup %1317  ;;  %v614_v6 = vmul.f32 %v1776_v56, %v1766_v49 }
 0x2d5   :  { %v704_v11 = vmul.f32 %v1318_v58, %v587_v54  ;;  %v1808_v63 = vpop.eup %1319  ;;  %vm709_vm11 = vweird.f32 %v1318_v58 }
 0x2d6   :  { %v615_v19 = vsub.f32 1.0, %v614_v6  ;;  %v1812_v20 = vpop.eup %1321  ;;  %v1833_v35 = vmul.f32 %v1808_v63, %v1771_v55  ;;  %vm710_vm12 = vmor %vm708_vm9, %vm709_vm11 }
 0x2d7   :  { %v705_v2 = vsub.f32 1.0, %v704_v11  ;;  %v1827_v29 = vpop.eup %1323 }
 0x2d8   :  { %v1838_v42 = vmul.f32 %v1776_v56, %v615_v19  ;;  %vm724_vm5 = vweird.f32 %v1827_v29 }
 0x2d9   :  { %v1783_v59 = vpop.xlane.xlu2 %577  ;;  %v706_v9 = vmul.f32 %v1318_v58, %v705_v2 }
 0x2da   :  { %v1786_v60 = vperm.slane %v1783_v59, 0  ;;  %v1789_v1 = vperm.slane %v1783_v59, 1  ;;  %v1792_v4 = vperm.slane %v1783_v59, 2  ;;  %v1801_v8 = vperm.slane %v1783_v59, 4 }
 0x2db   :  { %v1815_v21 = vperm.slane %v1783_v59, 5  ;;  %v1818_v23 = vperm.slane %v1783_v59, 7  ;;  %v707_v15 = vadd.f32 %v1318_v58, %v706_v9 }
 0x2dc   :  { %1325 = vrcp.f32 %v1786_v60  ;;  %v804_v5 = vand.u32 2147483648, %v1801_v8  ;;  %v774_v27 = vand.u32 2147483648, %v1792_v4  ;;  %v772_v32 = vand.u32 2147483647, %v1792_v4 }
 0x2dd   :  { %1327 = vrcp.f32 %v1789_v1  ;;  %v742_v34 = vand.u32 2147483647, %v1786_v60  ;;  %v802_v39 = vand.u32 2147483647, %v1801_v8  ;;  %v744_v40 = vand.u32 2147483648, %v1786_v60 }
 0x2de   :  { %1329 = vrcp.f32 %v1792_v4  ;;  %v1844_v24 = vor.u32 1.1754944e-38, %v804_v5  ;;  %vm768_vm13 = vweird.f32 %v1792_v4  ;;  %vm738_vm14 = vweird.f32 %v1786_v60 }
 0x2df   :  { %1331 = vrcp.f32 %v1801_v8  ;;  %v711_v43 = vsel %vm710_vm12, %v1318_v58, %v707_v15  ;;  %vm798_vm15 = vweird.f32 %v1801_v8  ;;  %v775_v37 = vor.u32 1.1754944e-38, %v774_v27 }
 0x2e0   :  { %1333 = vrcp.f32 %v1818_v23  ;;  %v716_v54 = vsel %vm1820_vm10, %v715_v30, %v711_v43  ;;  %vm1854_vm9 = vcmp.eq.f32.partialorder %v772_v32, 8.507059e+37  ;;  %vm1858_vm11 = vcmp.eq.f32.partialorder %v742_v34, 8.507059e+37 }
 0x2e1   :  { %1335 = vrcp.f32 %v1815_v21  ;;  %v717_v58 = vmul.f32 %v1710_v45, %v716_v54  ;;  %v745_v19 = vor.u32 1.1754944e-38, %v744_v40  ;;  %v719_v5 = vmul.f32 %v1827_v29, %v1779_v57 }
 0x2e2   :  { %v1326_v48 = vpop.eup %1325  ;;  %vm1868_vm10 = vcmp.eq.f32.partialorder %v802_v39, 8.507059e+37  ;;  %vm753_vm4 = vweird.f32 %v1789_v1  ;;  %v847_v27 = vand.u32 2147483647, %v1818_v23  ;;  %1337 = vrcp.f32 %v1797_v7 }
 0x2e3   :  { %v1840_v44 = vpop.eup %1327  ;;  %v734_v31 = vmul.f32 %v1326_v48, %v1786_v60  ;;  %vm739_vm8 = vweird.f32 %v1326_v48  ;;  %885 = vperm.xlu2 %1244, %v717_v58   ;;  %v720_v45 = vsub.f32 1.0, %v719_v5  ;;  %v644_v57 = vmul.f32 %v1812_v20, %v1774_v3 }
 0x2e4   :  { %v1330_v47 = vpop.eup %1329  ;;  %v749_v25 = vmul.f32 %v1840_v44, %v1789_v1  ;;  %vm740_vm3 = vmor %vm738_vm14, %vm739_vm8  ;;  %vm754_vm2 = vweird.f32 %v1840_v44  ;;  %vm848_vm8 = vcmp.eq.f32.partialorder %v847_v27, 8.507059e+37  ;;  %v2025_v27 = vperm.slane %v1783_v59, 3 }
 0x2e5   :  { %v764_v6 = vmul.f32 %v1330_v47, %v1792_v4  ;;  %v735_v11 = vsub.f32 1.0, %v734_v31  ;;  %v1332_v2 = vpop.eup %1331  ;;  %vm769_vm12 = vweird.f32 %v1330_v47 }
 0x2e6   :  { %v794_v9 = vmul.f32 %v1332_v2, %v1801_v8  ;;  %vm799_vm6 = vweird.f32 %v1332_v2  ;;  %v750_v34 = vsub.f32 1.0, %v749_v25  ;;  %v1874_v15 = vpop.eup %1333  ;;  %vm770_vm1 = vmor %vm768_vm13, %vm769_vm12  ;;  %vm843_vm13 = vweird.f32 %v1818_v23 }
 0x2e7   :  { %v765_v30 = vsub.f32 1.0, %v764_v6  ;;  %v736_v32 = vmul.f32 %v1326_v48, %v735_v11  ;;  %v1877_v39 = vpop.eup %1335  ;;  %v839_v54 = vmul.f32 %v1874_v15, %v1818_v23  ;;  %v721_v6 = vmul.f32 %v1827_v29, %v720_v45  ;;  %vm1898_vm14 = vmor %vm798_vm15, %vm799_vm6 }
 0x2e8   :  { %v795_v40 = vsub.f32 1.0, %v794_v9  ;;  %v751_v11 = vmul.f32 %v1840_v44, %v750_v34  ;;  %v757_v9 = vand.u32 2147483647, %v1789_v1  ;;  %v849_v8 = vand.u32 2147483648, %v1818_v23 }
 0x2e9   :  { %v766_v31 = vmul.f32 %v1330_v47, %v765_v30  ;;  %v737_v43 = vadd.f32 %v1326_v48, %v736_v32  ;;  %v840_v30 = vsub.f32 1.0, %v839_v54  ;;  %v722_v32 = vadd.f32 %v1827_v29, %v721_v6 }
 0x2ea   :  { %v796_v58 = vmul.f32 %v1332_v2, %v795_v40  ;;  %v752_v45 = vadd.f32 %v1840_v44, %v751_v11  ;;  %vm844_vm6 = vweird.f32 %v1874_v15  ;;  %v809_v54 = vmul.f32 %v1877_v39, %v1815_v21 }
 0x2eb   :  { %v767_v5 = vadd.f32 %v1330_v47, %v766_v31  ;;  %v741_v25 = vsel %vm740_vm3, %v1326_v48, %v737_v43  ;;  %v759_v31 = vand.u32 2147483648, %v1789_v1  ;;  %vm618_vm3 = vweird.f32 %v1766_v49 }
 0x2ec   :  { %v746_v60 = vsel %vm1858_vm11, %v745_v19, %v741_v25  ;;  %v797_v34 = vadd.f32 %v1332_v2, %v796_v58  ;;  %v841_v19 = vmul.f32 %v1874_v15, %v840_v30  ;;  %v730_v11 = vor.u32 1.1754944e-38, %v729_v18 }
 0x2ed   :  { %v771_v40 = vsel %vm770_vm1, %v1330_v47, %v767_v5  ;;  %v747_v4 = vmul.f32 %v1673_v17, %v746_v60  ;;  %vm1914_vm1 = vmor %vm753_vm4, %vm754_vm2  ;;  %vm758_vm4 = vcmp.eq.f32.partialorder %v757_v9, 8.507059e+37  ;;  %v810_v5 = vsub.f32 1.0, %v809_v54 }
 0x2ee   :  { %v776_v14 = vsel %vm1854_vm9, %v775_v37, %v771_v40  ;;  %v801_v17 = vsel %vm1898_vm14, %v1332_v2, %v797_v34  ;;  %v756_v37 = vsel %vm1914_vm1, %v1840_v44, %v752_v45  ;;  %v842_v43 = vadd.f32 %v1874_v15, %v841_v19  ;;  %vm1933_vm2 = vmor %vm723_vm7, %vm724_vm5 }
 0x2ef   :  { %v777_v10 = vmul.f32 %v1668_v0, %v776_v14  ;;  %895 = vperm.xlu1 %1245, %v747_v4   ;;  %v806_v1 = vsel %vm1868_vm10, %v1844_v24, %v801_v17  ;;  %v760_v0 = vor.u32 1.1754944e-38, %v759_v31  ;;  %v726_v24 = vsel %vm1933_vm2, %v1827_v29, %v722_v32  ;;  %vm1946_vm5 = vmor %vm843_vm13, %vm844_vm6 }
 0x2f0   :  { %v807_v44 = vmul.f32 %v1719_v51, %v806_v1  ;;  %v630_v51 = vsub.f32 1.0, %v1833_v35  ;;  %v846_v25 = vsel %vm1946_vm5, %v1874_v15, %v842_v43  ;;  %vm728_vm7 = vcmp.eq.f32.partialorder %v727_v61, 8.507059e+37 }
 0x2f1   :  { %905 = vperm.xlu0 %1246, %v777_v10   ;;  %v761_v58 = vsel %vm758_vm4, %v760_v0, %v756_v37  ;;  %v617_v23 = vadd.f32 %v1776_v56, %v1838_v42  ;;  %vm619_vm15 = vweird.f32 %v1776_v56  ;;  %v850_v18 = vor.u32 1.1754944e-38, %v849_v8 }
 0x2f2   :  { %915 = vperm.xlu2 %1244, %v807_v44   ;;  %v731_v29 = vsel %vm728_vm7, %v730_v11, %v726_v24  ;;  %v811_v9 = vmul.f32 %v1877_v39, %v810_v5  ;;  %v762_v35 = vmul.f32 %v1670_v16, %v761_v58  ;;  %vm814_vm9 = vweird.f32 %v1877_v39  ;;  %vm1971_vm11 = vmor %vm618_vm3, %vm619_vm15 }
 0x2f3   :  { %v851_v61 = vsel %vm848_vm8, %v850_v18, %v846_v25  ;;  %v819_v42 = vand.u32 2147483648, %v1815_v21  ;;  %v631_v30 = vmul.f32 %v1808_v63, %v630_v51  ;;  %v732_v16 = vmul.f32 %v1694_v33, %v731_v29 }
 0x2f4   :  { %v812_v15 = vadd.f32 %v1877_v39, %v811_v9  ;;  %vm813_vm10 = vweird.f32 %v1815_v21  ;;  %v817_v32 = vand.u32 2147483647, %v1815_v21  ;;  %v621_v45 = vsel %vm1971_vm11, %v1776_v56, %v617_v23  ;;  %v1994_v21 = vpop.eup %1337 }
 0x2f5   :  { %vm1982_vm12 = vmor %vm813_vm10, %vm814_vm9  ;;  %v625_v48 = vor.u32 1.1754944e-38, %v624_v13  ;;  %v852_v40 = vmul.f32 %v1725_v52, %v851_v61  ;;  %vm623_vm14 = vcmp.eq.f32.partialorder %v622_v12, 8.507059e+37  ;;  %v1997_v56 = vperm.slane %v1763_v28, 4 }
 0x2f6   :  { %v816_v33 = vsel %vm1982_vm12, %v1877_v39, %v812_v15  ;;  %v820_v4 = vor.u32 1.1754944e-38, %v819_v42  ;;  %vm818_vm3 = vcmp.eq.f32.partialorder %v817_v32, 8.507059e+37  ;;  %v632_v13 = vadd.f32 %v1808_v63, %v631_v30 }
 0x2f7   :  { %900 = vperm.xlu1 %1245, %v762_v35   ;;  %v626_v31 = vsel %vm623_vm14, %v625_v48, %v621_v45  ;;  %vm634_vm13 = vweird.f32 %v1808_v63  ;;  %v645_v52 = vsub.f32 1.0, %v644_v57  ;;  %v639_v39 = vand.u32 2147483648, %v1771_v55 }
 0x2f8   :  { %v821_v14 = vsel %vm818_vm3, %v820_v4, %v816_v33  ;;  %v627_v49 = vmul.f32 %v1681_v22, %v626_v31  ;;  %vm633_vm1 = vweird.f32 %v1771_v55  ;;  %v637_v12 = vand.u32 2147483647, %v1771_v55 }
 0x2f9   :  { %890 = vperm.xlu0 %1246, %v732_v16   ;;  %1339 = vrcp.f32 %v1997_v56  ;;  %vm635_vm6 = vmor %vm633_vm1, %vm634_vm13  ;;  %v822_v19 = vmul.f32 %v1707_v41, %v821_v14  ;;  %v646_v47 = vmul.f32 %v1812_v20, %v645_v52  ;;  %v659_v17 = vmul.f32 %v1994_v21, %v1797_v7 }
 0x2fa   :  { %930 = vperm.xlu2 %1244, %v852_v40   ;;  %v636_v8 = vsel %vm635_vm6, %v1808_v63, %v632_v13  ;;  %v640_v10 = vor.u32 1.1754944e-38, %v639_v39  ;;  %vm638_vm2 = vcmp.eq.f32.partialorder %v637_v12, 8.507059e+37  ;;  %v2012_v22 = vperm.slane %v1763_v28, 5 }
 0x2fb   :  { %v647_v37 = vadd.f32 %v1812_v20, %v646_v47  ;;  %vm649_vm4 = vweird.f32 %v1812_v20  ;;  %v660_v41 = vsub.f32 1.0, %v659_v17  ;;  %v654_v63 = vand.u32 2147483648, %v1774_v3 }
 0x2fc   :  { %v641_v55 = vsel %vm638_vm2, %v640_v10, %v636_v8  ;;  %vm648_vm5 = vweird.f32 %v1774_v3  ;;  %v652_v2 = vand.u32 2147483647, %v1774_v3  ;;  %1341 = vrcp.f32 %v2012_v22 }
 0x2fd   :  { %v642_v43 = vmul.f32 %v1683_v26, %v641_v55  ;;  %vm650_vm7 = vmor %vm648_vm5, %vm649_vm4  ;;  %v661_v0 = vmul.f32 %v1994_v21, %v660_v41  ;;  %v655_v44 = vor.u32 1.1754944e-38, %v654_v63  ;;  %vm664_vm8 = vweird.f32 %v1994_v21 }
 0x2fe   :  { %v651_v28 = vsel %vm650_vm7, %v1812_v20, %v647_v37  ;;  %vm653_vm15 = vcmp.eq.f32.partialorder %v652_v2, 8.507059e+37  ;;  %v669_v11 = vand.u32 2147483648, %v1797_v7  ;;  %vm663_vm9 = vweird.f32 %v1797_v7  ;;  %v1064_v2 = vld [vmem:[%s2200_s6 + $0x18] sm:$0xff] }
 0x2ff   :  { %855 = vperm.xlu1 %1245, %v627_v49   ;;  %v1340_v1 = vpop.eup %1339  ;;  %v656_v26 = vsel %vm653_vm15, %v655_v44, %v651_v28  ;;  %v662_v24 = vadd.f32 %v1994_v21, %v661_v0  ;;  %v667_v58 = vand.u32 2147483647, %v1797_v7  ;;  %1343 = vrcp.f32 %v2025_v27  ;;  %vm665_vm11 = vmor %vm663_vm9, %vm664_vm8  ;;  %1118 = vmatpush.msrb.mxu3 %v1064_v2  ;;  %v1063_v28 = vld [vmem:[%s2200_s6 + $0x10] sm:$0xff]  ;;  %v1347_v44 = vld [vmem:[%s2195_s1 + $0x8] sm:$0xff] }
 0x300   :  { %v674_v54 = vmul.f32 %v1340_v1, %v1997_v56  ;;  %v657_v20 = vmul.f32 %v1686_v62, %v656_v26  ;;  %v670_v23 = vor.u32 1.1754944e-38, %v669_v11  ;;  %v595_v18 = vperm.slane %v1783_v59, 6  ;;  %v1348_v26 = vld [vmem:[%s2195_s1 + $0x30] sm:$0xff] }
 0x301   :  { %920 = vperm.xlu0 %1246, %v822_v19   ;;  %v666_v5 = vsel %vm665_vm11, %v1994_v21, %v662_v24  ;;  %vm668_vm10 = vcmp.eq.f32.partialorder %v667_v58, 8.507059e+37  ;;  %vm679_vm12 = vweird.f32 %v1340_v1  ;;  %v684_v7 = vand.u32 2147483648, %v1997_v56  ;;  %1119 = vmatpush.msrb.mxu3 %v1063_v28  ;;  %v1067_v11 = vld [vmem:[%s2201_s7 + $0x10] sm:$0xff]  ;;  %v1350_v58 = vld [vmem:[%s2195_s1] sm:$0xff] }
 0x302   :  { %v675_v3 = vsub.f32 1.0, %v674_v54  ;;  %v1342_v6 = vpop.eup %1341  ;;  %v671_v29 = vsel %vm668_vm10, %v670_v23, %v666_v5  ;;  %vm678_vm14 = vweird.f32 %v1997_v56  ;;  %v682_v61 = vand.u32 2147483647, %v1997_v56  ;;  %v1351_v23 = vld [vmem:[%s2195_s1 + $0x18] sm:$0xff]  ;;  %v1065_v28 = vld [vmem:[%s2201_s7] sm:$0xff] }
 0x303   :  { %v689_v25 = vmul.f32 %v1342_v6, %v2012_v22  ;;  %v672_v57 = vmul.f32 %v1700_v36, %v671_v29  ;;  %1345 = vrcp.f32 %v595_v18  ;;  %vm680_vm3 = vmor %vm678_vm14, %vm679_vm12  ;;  %v685_v60 = vor.u32 1.1754944e-38, %v684_v7 }
 0x304   :  { %v676_v51 = vmul.f32 %v1340_v1, %v675_v3  ;;  %vm683_vm13 = vcmp.eq.f32.partialorder %v682_v61, 8.507059e+37  ;;  %vm694_vm1 = vweird.f32 %v1342_v6  ;;  %v699_v36 = vand.u32 2147483648, %v2012_v22  ;;  %v1349_v3 = vld [vmem:[%s2195_s1 + $0x10] sm:$0xff] }
 0x305   :  { %v690_v62 = vsub.f32 1.0, %v689_v25  ;;  %v1344_v35 = vpop.eup %1343  ;;  %vm693_vm6 = vweird.f32 %v2012_v22  ;;  %v697_v48 = vand.u32 2147483647, %v2012_v22  ;;  %v789_v52 = vand.u32 2147483648, %v2025_v27 }
 0x306   :  { %v677_v9 = vadd.f32 %v1340_v1, %v676_v51  ;;  %v779_v59 = vmul.f32 %v1344_v35, %v2025_v27  ;;  %vm695_vm2 = vmor %vm693_vm6, %vm694_vm1  ;;  %v700_v56 = vor.u32 1.1754944e-38, %v699_v36  ;;  %vm784_vm5 = vweird.f32 %v1344_v35  ;;  %v1354_v36 = vld [vmem:[%s2195_s1 + $0x40] sm:$0xff] }
 0x307   :  { %860 = vperm.xlu1 %1245, %v642_v43   ;;  %v691_v42 = vmul.f32 %v1342_v6, %v690_v62  ;;  %vm698_vm4 = vcmp.eq.f32.partialorder %v697_v48, 8.507059e+37  ;;  %vm783_vm7 = vweird.f32 %v2025_v27  ;;  %v790_v12 = vor.u32 1.1754944e-38, %v789_v52 }
 0x308   :  { %v681_v15 = vsel %vm680_vm3, %v1340_v1, %v677_v9  ;;  %v780_v32 = vsub.f32 1.0, %v779_v59  ;;  %vm785_vm15 = vmor %vm783_vm7, %vm784_vm5  ;;  %v834_v47 = vand.u32 2147483648, %v595_v18  ;;  %vm828_vm11 = vweird.f32 %v595_v18 }
 0x309   :  { %v686_v30 = vsel %vm683_vm13, %v685_v60, %v681_v15  ;;  %v692_v16 = vadd.f32 %v1342_v6, %v691_v42  ;;  %v1346_v45 = vpop.eup %1345  ;;  %v832_v10 = vand.u32 2147483647, %v595_v18  ;;  %v1352_v15 = vld [vmem:[%s2195_s1 + $0x38] sm:$0xff]  ;;  %v1353_v60 = vld [vmem:[%s2195_s1 + $0x48] sm:$0xff]  ;;  %vm2234_vm14 = vcmask 1041409  }
 0x30a   :  { %v687_v34 = vmul.f32 %v1697_v38, %v686_v30  ;;  %v781_v33 = vmul.f32 %v1344_v35, %v780_v32  ;;  %v824_v21 = vmul.f32 %v1346_v45, %v595_v18  ;;  %v787_v38 = vand.u32 2147483647, %v2025_v27  ;;  %vm2241_vm5 = vmmov %vm2234_vm14 }
 0x30b   :  { %v696_v40 = vsel %vm695_vm2, %v1342_v6, %v692_v16  ;;  %vm829_vm9 = vweird.f32 %v1346_v45  ;;  %v835_v22 = vor.u32 1.1754944e-38, %v834_v47  ;;  %vm833_vm12 = vcmp.eq.f32.partialorder %v832_v10, 8.507059e+37 }
 0x30c   :  { %v701_v4 = vsel %vm698_vm4, %v700_v56, %v696_v40  ;;  %v782_v31 = vadd.f32 %v1344_v35, %v781_v33  ;;  %v825_v13 = vsub.f32 1.0, %v824_v21  ;;  %vm788_vm8 = vcmp.eq.f32.partialorder %v787_v38, 8.507059e+37  ;;  %vm830_vm10 = vmor %vm828_vm11, %vm829_vm9  ;;  %v1066_v33 = vld [vmem:[%s2201_s7 + $0x8] sm:$0xff]  ;;  %v1061_v21 = vld [vmem:[%s2200_s6] sm:$0xff] }
 0x30d   :  { %v702_v14 = vmul.f32 %v1713_v46, %v701_v4  ;;  %vm2235_vm3 = vcmask 1042434   ;;  %vm2236_vm13 = vcmask 1043459   ;;  %vm2237_vm1 = vcmask 1044484  }
 0x30e   :  { %v786_v39 = vsel %vm785_vm15, %v1344_v35, %v782_v31  ;;  %v826_v49 = vmul.f32 %v1346_v45, %v825_v13  ;;  %v1355_v13 = vld [vmem:[%s2195_s1 + $0x20] sm:$0xff]  ;;  %vm2238_vm6 = vcmask 1045509   ;;  %vm2239_vm2 = vcmask 1046534   ;;  %vm2242_vm7 = vmmov %vm2235_vm3 }
 0x30f   :  { %865 = vperm.xlu1 %1245, %v657_v20   ;;  %v791_v19 = vsel %vm788_vm8, %v790_v12, %v786_v39  ;;  %v1062_v20 = vld [vmem:[%s2200_s6 + $0x8] sm:$0xff]  ;;  %vm2240_vm4 = vcmask 1047559   ;;  %vm2243_vm15 = vmmov %vm2236_vm13 }
 0x310   :  { %v827_v8 = vadd.f32 %v1346_v45, %v826_v49  ;;  %v792_v17 = vmul.f32 %v1721_v50, %v791_v19  ;;  %v1068_v50 = vld [vmem:[%s2201_s7 + $0x18] sm:$0xff]  ;;  %1120 = vmatpush.msrb.mxu3 %v1062_v20  ;;  %v1357_v19 = vld [vmem:[%s2197_s0] sm:$0xff]  ;;  %vm2244_vm8 = vmmov %vm2237_vm1 }
 0x311   :  { %1098 = vmatpush.msrb.mxu2 %v1068_v50  ;;  %vm2245_vm9 = vmmov %vm2238_vm6 }
 0x312   :  { %v831_v46 = vsel %vm830_vm10, %v1346_v45, %v827_v8  ;;  %1121 = vmatpush.msrb.mxu3 %v1061_v21  ;;  %v1358_v8 = vld [vmem:[%s2195_s1 + $0x60] sm:$0xff]  ;;  %vm2246_vm11 = vmmov %vm2239_vm2 }
 0x313   :  { %v836_v55 = vsel %vm833_vm12, %v835_v22, %v831_v46  ;;  %1099 = vmatpush.msrb.mxu2 %v1067_v11  ;;  %1228 = vmatmul.msk.f32.vlgmr.msrb.gmra.mxu3 %vm62_vm0, %v1357_v19  ;;  %v1127_v11 = vld [vmem:[%s2202_s8 + $0x8] sm:$0xff]  ;;  %vm2247_vm10 = vmmov %vm2240_vm4 }
 0x314   :  { %v837_v37 = vmul.f32 %v1727_v53, %v836_v55 }
 0x315   :  { %1100 = vmatpush.msrb.mxu2 %v1066_v33 }
 0x317   :  { %870 = vperm.xlu1 %1245, %v672_v57   ;;  %1101 = vmatpush.msrb.mxu2 %v1065_v28 }
 0x31f   :  { %875 = vperm.xlu1 %1245, %v687_v34  }
 0x327   :  { %880 = vperm.xlu1 %1245, %v702_v14   ;;  %v1356_v14 = vld [vmem:[%s2195_s1 + $0x50] sm:$0xff] }
 0x32f   :  { %910 = vperm.xlu1 %1245, %v792_v17  }
 0x337   :  { %925 = vperm.xlu1 %1245, %v837_v37  }
 0x33d   :  { %v886_v54 = vpop.permute.xlu2 %885 }
 0x33e   :  { %v939_v24 = vmul.f32 %v1348_v26, %v886_v54 }
 0x340   :  { %v991_v29 = vsel %vm62_vm0, %v939_v24, 0.0 }
 0x341   :  { %v992_v61 = vrot.slane %v991_v29, 4 }
 0x343   :  { %v993_v56 = vadd.f32 %v992_v61, %v991_v29  ;;  %v1360_v29 = vld [vmem:[%s2195_s1 + $0x68] sm:$0xff] }
 0x345   :  { %v994_v37 = vrot.slane %v993_v56, 2 }
 0x34c   :  { %v916_v45 = vpop.permute.xlu2 %915 }
 0x34d   :  { %v945_v47 = vmul.f32 %v1358_v8, %v916_v45 }
 0x354   :  { %v931_v20 = vpop.permute.xlu2 %930 }
 0x361   :  { %v896_v41 = vpop.permute.xlu1 %895 }
 0x362   :  { %v941_v34 = vmul.f32 %v1354_v36, %v896_v41 }
 0x363   :  { %v906_v53 = vpop.permute.xlu0 %905 }
 0x364   :  { %v943_v38 = vmul.f32 %v1356_v14, %v906_v53  ;;  %v1005_v10 = vsel %vm62_vm0, %v941_v34, 0.0  ;;  %v1129_v53 = vld [vmem:[%s2202_s8 + $0x18] sm:$0xff] }
 0x365   :  { %v1006_v54 = vrot.slane %v1005_v10, 4  ;;  %1159 = vmatpush.msra.mxu1 %v1129_v53 }
 0x367   :  { %v1007_v61 = vadd.f32 %v1006_v54, %v1005_v10 }
 0x369   :  { %v901_v1 = vpop.permute.xlu1 %900 }
 0x36a   :  { %v942_v30 = vmul.f32 %v1353_v60, %v901_v1 }
 0x36b   :  { %v891_v9 = vpop.permute.xlu0 %890 }
 0x36c   :  { %v940_v42 = vmul.f32 %v1352_v15, %v891_v9  ;;  %v1012_v39 = vsel %vm62_vm0, %v942_v30, 0.0 }
 0x36d   :  { %v1013_v41 = vrot.slane %v1012_v39, 4 }
 0x36e   :  { %v998_v4 = vsel %vm62_vm0, %v940_v42, 0.0 }
 0x36f   :  { %v999_v46 = vrot.slane %v998_v4, 4 }
 0x371   :  { %v856_v63 = vpop.permute.xlu1 %855  ;;  %v1000_v26 = vadd.f32 %v999_v46, %v998_v4 }
 0x372   :  { %v933_v5 = vmul.f32 %v1350_v58, %v856_v63  ;;  %v1019_v63 = vsel %vm62_vm0, %v943_v38, 0.0 }
 0x373   :  { %v1020_v58 = vrot.slane %v1019_v63, 4  ;;  %v1001_v30 = vrot.slane %v1000_v26, 2 }
 0x374   :  { %v949_v35 = vsel %vm62_vm0, %v933_v5, 0.0  ;;  %v1014_v5 = vadd.f32 %v1013_v41, %v1012_v39 }
 0x375   :  { %v950_v16 = vrot.slane %v949_v35, 4  ;;  %v1021_v45 = vadd.f32 %v1020_v58, %v1019_v63  ;;  %v1002_v14 = vadd.f32 %v1001_v30, %v1000_v26 }
 0x376   :  { %v1015_v36 = vrot.slane %v1014_v5, 2 }
 0x377   :  { %v951_v49 = vadd.f32 %v950_v16, %v949_v35  ;;  %v1022_v10 = vrot.slane %v1021_v45, 2 }
 0x379   :  { %v861_v43 = vpop.permute.xlu1 %860 }
 0x37a   :  { %v934_v27 = vmul.f32 %v1347_v44, %v861_v43  ;;  %v952_v43 = vrot.slane %v951_v49, 2  ;;  %v921_v44 = vpop.permute.xlu0 %920 }
 0x37b   :  { %v946_v9 = vmul.f32 %v1360_v29, %v921_v44 }
 0x37c   :  { %v956_v25 = vsel %vm62_vm0, %v934_v27, 0.0  ;;  %v1033_v27 = vsel %vm62_vm0, %v945_v47, 0.0  ;;  %v1362_v47 = vld [vmem:[%s2195_s1 + $0x58] sm:$0xff] }
 0x37d   :  { %v957_v57 = vrot.slane %v956_v25, 4 }
 0x37f   :  { %v958_v48 = vadd.f32 %v957_v57, %v956_v25  ;;  %v1359_v25 = vld [vmem:[%s2195_s1 + $0x28] sm:$0xff]  ;;  %v1034_v57 = vrot.slane %v1033_v27, 4 }
 0x381   :  { %v866_v0 = vpop.permute.xlu1 %865  ;;  %v959_v22 = vrot.slane %v958_v48, 2  ;;  %v1035_v4 = vadd.f32 %v1034_v57, %v1033_v27  ;;  %v1023_v27 = vadd.f32 %v1022_v10, %v1021_v45  ;;  %v1177_v10 = vld [vmem:[%s2205_s10 + $0x18] sm:$0xff] }
 0x382   :  { %v935_v6 = vmul.f32 %v1349_v3, %v866_v0  ;;  %v1128_v0 = vld [vmem:[%s2202_s8 + $0x10] sm:$0xff]  ;;  %1197 = vmatpush.msra.mxu2 %v1177_v10 }
 0x383   :  { %v960_v24 = vadd.f32 %v959_v22, %v958_v48  ;;  %1160 = vmatpush.msra.mxu1 %v1128_v0  ;;  %v1040_v48 = vsel %vm62_vm0, %v946_v9, 0.0  ;;  %v1036_v53 = vrot.slane %v1035_v4, 2 }
 0x384   :  { %v963_v62 = vsel %vm62_vm0, %v935_v6, 0.0  ;;  %v1041_v19 = vrot.slane %v1040_v48, 4 }
 0x385   :  { %v964_v59 = vrot.slane %v963_v62, 4  ;;  %1161 = vmatpush.msra.mxu1 %v1127_v11  ;;  %v961_v16 = vrot.slane %v960_v24, 1  ;;  %v1037_v57 = vadd.f32 %v1036_v53, %v1035_v4  ;;  %v1250_v53 = vld [vmem:[%s2204_s11] ss:$0 sm:$0xff] }
 0x386   :  { %v1042_v54 = vadd.f32 %v1041_v19, %v1040_v48 }
 0x387   :  { %v965_v31 = vadd.f32 %v964_v59, %v963_v62  ;;  %v953_v62 = vadd.f32 %v952_v43, %v951_v49  ;;  %v1361_v59 = vld [vmem:[%s2195_s1 + $0x78] sm:$0xff]  ;;  %v962_v38 = vadd.f32 %v961_v16, %v960_v24  ;;  %v1003_v43 = vrot.slane %v1002_v14, 1 }
 0x388   :  { %v948_v60 = vmul.f32 %v1361_v59, %v931_v20  ;;  %v1043_v9 = vrot.slane %v1042_v54, 2 }
 0x389   :  { %v871_v51 = vpop.permute.xlu1 %870  ;;  %v966_v1 = vrot.slane %v965_v31, 2 }
 0x38a   :  { %v936_v18 = vmul.f32 %v1351_v23, %v871_v51  ;;  %v1044_v45 = vadd.f32 %v1043_v9, %v1042_v54 }
 0x38b   :  { %v967_v51 = vadd.f32 %v966_v1, %v965_v31  ;;  %v1008_v31 = vrot.slane %v1007_v61, 2 }
 0x38c   :  { %v970_v7 = vsel %vm62_vm0, %v936_v18, 0.0  ;;  %v995_v18 = vadd.f32 %v994_v37, %v993_v56  ;;  %v1045_v4 = vrot.slane %v1044_v45, 1 }
 0x38d   :  { %v971_v32 = vrot.slane %v970_v7, 4  ;;  %v968_v34 = vrot.slane %v967_v51, 1  ;;  %v1009_v41 = vadd.f32 %v1008_v31, %v1007_v61 }
 0x38e   :  { %v996_v56 = vrot.slane %v995_v18, 1 }
 0x38f   :  { %v972_v12 = vadd.f32 %v971_v32, %v970_v7  ;;  %v1126_v7 = vld [vmem:[%s2202_s8] sm:$0xff]  ;;  %v969_v8 = vadd.f32 %v968_v34, %v967_v51  ;;  %v1010_v20 = vrot.slane %v1009_v41, 1 }
 0x390   :  { %1162 = vmatpush.msra.mxu1 %v1126_v7 }
 0x391   :  { %v876_v40 = vpop.permute.xlu1 %875  ;;  %v973_v2 = vrot.slane %v972_v12, 2  ;;  %v1011_v59 = vadd.f32 %v1010_v20, %v1009_v41 }
 0x392   :  { %v937_v52 = vmul.f32 %v1355_v13, %v876_v40  ;;  %v954_v40 = vrot.slane %v953_v62, 1 }
 0x393   :  { %v974_v35 = vadd.f32 %v973_v2, %v972_v12  ;;  %v1016_v12 = vadd.f32 %v1015_v36, %v1014_v5  ;;  %v1004_v5 = vadd.f32 %v1003_v43, %v1002_v14  ;;  %v1038_v36 = vrot.slane %v1037_v57, 1 }
 0x394   :  { %v977_v17 = vsel %vm62_vm0, %v937_v52, 0.0  ;;  %v1054_v52 = vsel %vm62_vm0, %v948_v60, 0.0  ;;  %v955_v46 = vadd.f32 %v954_v40, %v953_v62  ;;  %v1363_v62 = vld [vmem:[%s2195_s1 + $0x70] sm:$0xff] }
 0x395   :  { %v978_v55 = vrot.slane %v977_v17, 4  ;;  %v975_v33 = vrot.slane %v974_v35, 1  ;;  %v1055_v37 = vrot.slane %v1054_v52, 4  ;;  %v1017_v0 = vrot.slane %v1016_v12, 1 }
 0x396   :  { %v1077_v2 = vsel %vm2234_vm14, %v962_v38, %v955_v46  ;;  %v1176_v46 = vld [vmem:[%s2205_s10 + $0x10] sm:$0xff]  ;;  %v1123_v41 = vpop.f32.mrf.mxu3 }
 0x397   :  { %v979_v50 = vadd.f32 %v978_v55, %v977_v17  ;;  %v976_v22 = vadd.f32 %v975_v33, %v974_v35  ;;  %v1078_v44 = vsel %vm2235_vm3, %v969_v8, %v1077_v2  ;;  %v1056_v11 = vadd.f32 %v1055_v37, %v1054_v52  ;;  %1198 = vmatpush.msra.mxu2 %v1176_v46 }
 0x398   :  { %v1018_v29 = vadd.f32 %v1017_v0, %v1016_v12 }
 0x399   :  { %v980_v3 = vrot.slane %v979_v50, 2  ;;  %v881_v6 = vpop.permute.xlu1 %880  ;;  %v1079_v26 = vsel %vm2236_vm13, %v976_v22, %v1078_v44  ;;  %v1175_v22 = vld [vmem:[%s2205_s10 + $0x8] sm:$0xff] }
 0x39a   :  { %v938_v23 = vmul.f32 %v1359_v25, %v881_v6  ;;  %v997_v6 = vadd.f32 %v996_v56, %v995_v18  ;;  %v1024_v18 = vrot.slane %v1023_v27, 1  ;;  %1199 = vmatpush.msra.mxu2 %v1175_v22 }
 0x39b   :  { %v981_v15 = vadd.f32 %v980_v3, %v979_v50 }
 0x39c   :  { %v984_v42 = vsel %vm62_vm0, %v938_v23, 0.0  ;;  %v1025_v34 = vadd.f32 %v1024_v18, %v1023_v27 }
 0x39d   :  { %v985_v32 = vrot.slane %v984_v42, 4  ;;  %v982_v13 = vrot.slane %v981_v15, 1 }
 0x39f   :  { %v986_v21 = vadd.f32 %v985_v32, %v984_v42  ;;  %v983_v1 = vadd.f32 %v982_v13, %v981_v15  ;;  %v1057_v42 = vrot.slane %v1056_v11, 2  ;;  %v1138_v32 = vsel %vm2241_vm5, %v1018_v29, %v1011_v59 }
 0x3a0   :  { %v1039_v13 = vadd.f32 %v1038_v36, %v1037_v57 }
 0x3a1   :  { %v987_v39 = vrot.slane %v986_v21, 2  ;;  %v911_v49 = vpop.permute.xlu1 %910  ;;  %v1080_v58 = vsel %vm2237_vm1, %v983_v1, %v1079_v26  ;;  %v1058_v33 = vadd.f32 %v1057_v42, %v1056_v11 }
 0x3a2   :  { %v944_v17 = vmul.f32 %v1362_v47, %v911_v49  ;;  %v1046_v49 = vadd.f32 %v1045_v4, %v1044_v45 }
 0x3a3   :  { %v988_v55 = vadd.f32 %v987_v39, %v986_v21  ;;  %v1139_v21 = vsel %vm2242_vm7, %v1025_v34, %v1138_v32  ;;  %v1059_v14 = vrot.slane %v1058_v33, 1 }
 0x3a4   :  { %v1026_v63 = vsel %vm62_vm0, %v944_v17, 0.0 }
 0x3a5   :  { %v989_v50 = vrot.slane %v988_v55, 1  ;;  %v1027_v28 = vrot.slane %v1026_v63, 4  ;;  %v1060_v19 = vadd.f32 %v1059_v14, %v1058_v33 }
 0x3a7   :  { %v990_v24 = vadd.f32 %v989_v50, %v988_v55  ;;  %v1028_v3 = vadd.f32 %v1027_v28, %v1026_v63  ;;  %v1174_v55 = vld [vmem:[%s2205_s10] sm:$0xff] }
 0x3a8   :  { %1200 = vmatpush.msra.mxu2 %v1174_v55  ;;  %v1249_v63 = vld [vmem:[%s2203_s9] ss:$0 sm:$0xff] }
 0x3a9   :  { %v1029_v51 = vrot.slane %v1028_v3, 2  ;;  %v926_v25 = vpop.permute.xlu1 %925  ;;  %v1081_v23 = vsel %vm2238_vm6, %v990_v24, %v1080_v58 }
 0x3aa   :  { %v947_v35 = vmul.f32 %v1363_v62, %v926_v25  ;;  %v1082_v7 = vsel %vm2239_vm2, %v997_v6, %v1081_v23 }
 0x3ab   :  { %v1030_v61 = vadd.f32 %v1029_v51, %v1028_v3  ;;  %v1083_v15 = vsel %vm2240_vm4, %v1004_v5, %v1082_v7 }
 0x3ac   :  { %v1047_v60 = vsel %vm62_vm0, %v947_v35, 0.0  ;;  %1227 = vmatmul.msk.f32.vlgmr.msrb.gmra.mxu2 %vm62_vm0, %v1083_v15 }
 0x3ad   :  { %v1031_v30 = vrot.slane %v1030_v61, 1  ;;  %v1048_v16 = vrot.slane %v1047_v60, 4 }
 0x3af   :  { %v1032_v48 = vadd.f32 %v1031_v30, %v1030_v61  ;;  %v1049_v40 = vadd.f32 %v1048_v16, %v1047_v60 }
 0x3b1   :  { %v1050_v56 = vrot.slane %v1049_v40, 2  ;;  %v1140_v31 = vsel %vm2243_vm15, %v1032_v48, %v1139_v21 }
 0x3b2   :  { %v1141_v39 = vsel %vm2244_vm8, %v1039_v13, %v1140_v31 }
 0x3b3   :  { %v1051_v52 = vadd.f32 %v1050_v56, %v1049_v40  ;;  %v1142_v8 = vsel %vm2245_vm9, %v1046_v49, %v1141_v39 }
 0x3b5   :  { %v1052_v38 = vrot.slane %v1051_v52, 1 }
 0x3b7   :  { %v1053_v12 = vadd.f32 %v1052_v38, %v1051_v52 }
 0x3b9   :  { %v1143_v47 = vsel %vm2246_vm11, %v1053_v12, %v1142_v8 }
 0x3ba   :  { %v1144_v17 = vsel %vm2247_vm10, %v1060_v19, %v1143_v47 }
 0x3bb   :  { %1229 = vmatmul.msk.f32.vlgmr.msra.gmra.mxu1 %vm62_vm0, %v1144_v17 }
 0x42f   :  { %v1103_v37 = vpop.f32.mrf.mxu2 }
 0x430   :  { %v1124_v1 = vadd.f32 %v1123_v41, %v1103_v37 }
 0x438   :  { %v1164_v43 = vpop.f32.mrf.mxu1 }
 0x439   :  { %v1167_v2 = vadd.f32 %v1164_v43, %v1124_v1 }
 0x43b   :  { %v1172_v50 = vadd.f32 %v1249_v63, %v1167_v2 }
 0x43d   :  { %v1173_v28 = vmax.f32 %v1172_v50, 0.0 }
 0x43f   :  { %1230 = vmatmul.msk.f32.vlgmr.msra.gmra.mxu2 %vm62_vm0, %v1173_v28 }
 0x4c2   :  { %v1202_v0 = vpop.f32.mrf.mxu2 }
 0x4c3   :  { %v1203_v54 = vadd.f32 %v1250_v53, %v1202_v0 }
 0x4c5   :  { %1205 = vst [vmem:[%s2206_s12] sm:$0xff] %v1203_v54 }

// kernel: forward_pallas.2
= control target key start
LH: loop header
LB: loop body
LE: loop exit
PB: predicated region body
PF: predicated region fallthrough
CT: control target
= control target key end

     0   :  { %9 = vsyncpa [#allocation4], 0  ;;  %s3135_s0 = inlined_call_operand.vmem [shape: f32[64,128], index: 0, kind: input, shape index: {}]   ;;  %s3136_s1 = inlined_call_operand.hbm [shape: f32[1,128,512], index: 1, kind: input, shape index: {}]   ;;  %s3137_s2 = inlined_call_operand.hbm [shape: f32[1,128,512], index: 2, kind: input, shape index: {}]   ;;  %s3138_s3 = inlined_call_operand.vmem [shape: f32[1,1,512], index: 3, kind: input, shape index: {}]   ;;  %s3139_s4 = inlined_call_operand.vmem [shape: f32[8,8,128], index: 4, kind: output, shape index: {}]  }
   0x1   :  { %s17_s17 = sshll.u32 %s3136_s1, 4  ;;  %s18_s17 = int_to_ptr.hbm [resolvable:$true] %s17_s17 }
   0x2   :  { %10 = vsyncpa [#allocation6], 0  ;;  %s2152_s18 = smov [#allocation3]   ;;  %s30_s22 = sshll.u32 %s3137_s2, 4  ;;  %s31_s22 = int_to_ptr.hbm [resolvable:$true] %s30_s22 }
   0x3   :  { %s19_s19 = sshll.u32 %s2152_s18, 4  ;;  %s2153_s23 = smov 512   ;;  %s20_s19 = int_to_ptr.vmem [resolvable:$true] %s19_s19 }
   0x4   :  { %s2154_s24 = smov 32   ;;  %s2155_s25 = smov [#allocation5]  }
   0x5   :  { %25 = dma.hbm_to_vmem [thread:$0]  %s18_s17, 8192, %s20_s19, [#allocation4], %s2153_s23, %s2153_s23, %s2154_s24  }
   0x6   :  { %s32_s26 = sshll.u32 %s2155_s25, 4  ;;  %s33_s26 = int_to_ptr.vmem [resolvable:$true] %s32_s26 }
   0x7   :  { %38 = dma.hbm_to_vmem [thread:$0]  %s31_s22, 8192, %s33_s26, [#allocation6], %s2153_s23, %s2153_s23, %s2154_s24  }
   0x8   :  { %2148 = dma.done.wait [#allocation4], 8192  }
   0x9   :  { %2149 = vsyncadd [#allocation4], 4294959104 }
   0xa   :  { %2150 = dma.done.wait [#allocation6], 8192  }
   0xb   :  { %2151 = vsyncadd [#allocation6], 4294959104  ;;  %v109_v0 = vld [vmem:[#allocation3 + $0x1e0] sm:$0xff]  ;;  %v110_v1 = vld [vmem:[#allocation3 + $0x1e8] sm:$0xff] }
   0xc   :  { %v111_v2 = vld [vmem:[#allocation3 + $0x1f0] sm:$0xff]  ;;  %199 = vmatpush.msra.mxu0 %v109_v0  ;;  %240 = vmatpush.msra.mxu1 %v110_v1  ;;  %v112_v3 = vld [vmem:[#allocation3 + $0x1f8] sm:$0xff]  ;;  %v105_v4 = vld [vmem:[#allocation3 + $0x1c0] sm:$0xff] }
   0xd   :  { %v106_v5 = vld [vmem:[#allocation3 + $0x1c8] sm:$0xff]  ;;  %281 = vmatpush.msra.mxu2 %v111_v2  ;;  %322 = vmatpush.msra.mxu3 %v112_v3  ;;  %v107_v6 = vld [vmem:[#allocation3 + $0x1d0] sm:$0xff]  ;;  %v108_v7 = vld [vmem:[#allocation3 + $0x1d8] sm:$0xff] }
   0xe   :  { %v101_v8 = vld [vmem:[#allocation3 + $0x1a0] sm:$0xff]  ;;  %200 = vmatpush.msra.mxu0 %v105_v4  ;;  %241 = vmatpush.msra.mxu1 %v106_v5  ;;  %v102_v9 = vld [vmem:[#allocation3 + $0x1a8] sm:$0xff]  ;;  %v103_v10 = vld [vmem:[#allocation3 + $0x1b0] sm:$0xff] }
   0xf   :  { %v104_v11 = vld [vmem:[#allocation3 + $0x1b8] sm:$0xff]  ;;  %282 = vmatpush.msra.mxu2 %v107_v6  ;;  %323 = vmatpush.msra.mxu3 %v108_v7  ;;  %v97_v12 = vld [vmem:[#allocation3 + $0x180] sm:$0xff]  ;;  %v98_v13 = vld [vmem:[#allocation3 + $0x188] sm:$0xff] }
  0x10   :  { %201 = vmatpush.msra.mxu0 %v101_v8  ;;  %242 = vmatpush.msra.mxu1 %v102_v9  ;;  %v99_v14 = vld [vmem:[#allocation3 + $0x190] sm:$0xff]  ;;  %v100_v15 = vld [vmem:[#allocation3 + $0x198] sm:$0xff]  ;;  %v93_v16 = vld [vmem:[#allocation3 + $0x160] sm:$0xff] }
  0x11   :  { %283 = vmatpush.msra.mxu2 %v103_v10  ;;  %324 = vmatpush.msra.mxu3 %v104_v11  ;;  %v94_v17 = vld [vmem:[#allocation3 + $0x168] sm:$0xff]  ;;  %v95_v18 = vld [vmem:[#allocation3 + $0x170] sm:$0xff]  ;;  %v96_v19 = vld [vmem:[#allocation3 + $0x178] sm:$0xff] }
  0x12   :  { %202 = vmatpush.msra.mxu0 %v97_v12  ;;  %243 = vmatpush.msra.mxu1 %v98_v13  ;;  %v89_v20 = vld [vmem:[#allocation3 + $0x140] sm:$0xff]  ;;  %v90_v21 = vld [vmem:[#allocation3 + $0x148] sm:$0xff]  ;;  %v91_v22 = vld [vmem:[#allocation3 + $0x150] sm:$0xff] }
  0x13   :  { %284 = vmatpush.msra.mxu2 %v99_v14  ;;  %325 = vmatpush.msra.mxu3 %v100_v15  ;;  %v92_v23 = vld [vmem:[#allocation3 + $0x158] sm:$0xff]  ;;  %v85_v24 = vld [vmem:[#allocation3 + $0x120] sm:$0xff]  ;;  %v86_v25 = vld [vmem:[#allocation3 + $0x128] sm:$0xff] }
  0x14   :  { %203 = vmatpush.msra.mxu0 %v93_v16  ;;  %244 = vmatpush.msra.mxu1 %v94_v17  ;;  %v87_v26 = vld [vmem:[#allocation3 + $0x130] sm:$0xff]  ;;  %v88_v27 = vld [vmem:[#allocation3 + $0x138] sm:$0xff]  ;;  %v81_v28 = vld [vmem:[#allocation3 + $0x100] sm:$0xff] }
  0x15   :  { %285 = vmatpush.msra.mxu2 %v95_v18  ;;  %326 = vmatpush.msra.mxu3 %v96_v19  ;;  %v82_v29 = vld [vmem:[#allocation3 + $0x108] sm:$0xff]  ;;  %v83_v30 = vld [vmem:[#allocation3 + $0x110] sm:$0xff]  ;;  %v84_v31 = vld [vmem:[#allocation3 + $0x118] sm:$0xff] }
  0x16   :  { %204 = vmatpush.msra.mxu0 %v89_v20  ;;  %245 = vmatpush.msra.mxu1 %v90_v21  ;;  %v77_v32 = vld [vmem:[#allocation3 + $0xe0] sm:$0xff]  ;;  %v78_v33 = vld [vmem:[#allocation3 + $0xe8] sm:$0xff]  ;;  %v79_v34 = vld [vmem:[#allocation3 + $0xf0] sm:$0xff] }
  0x17   :  { %286 = vmatpush.msra.mxu2 %v91_v22  ;;  %327 = vmatpush.msra.mxu3 %v92_v23  ;;  %v80_v35 = vld [vmem:[#allocation3 + $0xf8] sm:$0xff]  ;;  %v73_v36 = vld [vmem:[#allocation3 + $0xc0] sm:$0xff]  ;;  %v74_v37 = vld [vmem:[#allocation3 + $0xc8] sm:$0xff] }
  0x18   :  { %205 = vmatpush.msra.mxu0 %v85_v24  ;;  %246 = vmatpush.msra.mxu1 %v86_v25  ;;  %v75_v38 = vld [vmem:[#allocation3 + $0xd0] sm:$0xff]  ;;  %v76_v39 = vld [vmem:[#allocation3 + $0xd8] sm:$0xff]  ;;  %v69_v40 = vld [vmem:[#allocation3 + $0xa0] sm:$0xff] }
  0x19   :  { %287 = vmatpush.msra.mxu2 %v87_v26  ;;  %328 = vmatpush.msra.mxu3 %v88_v27  ;;  %v70_v41 = vld [vmem:[#allocation3 + $0xa8] sm:$0xff]  ;;  %v71_v42 = vld [vmem:[#allocation3 + $0xb0] sm:$0xff]  ;;  %v72_v43 = vld [vmem:[#allocation3 + $0xb8] sm:$0xff] }
  0x1a   :  { %206 = vmatpush.msra.mxu0 %v81_v28  ;;  %247 = vmatpush.msra.mxu1 %v82_v29  ;;  %v65_v44 = vld [vmem:[#allocation3 + $0x80] sm:$0xff]  ;;  %v66_v45 = vld [vmem:[#allocation3 + $0x88] sm:$0xff]  ;;  %v67_v46 = vld [vmem:[#allocation3 + $0x90] sm:$0xff] }
  0x1b   :  { %288 = vmatpush.msra.mxu2 %v83_v30  ;;  %329 = vmatpush.msra.mxu3 %v84_v31  ;;  %v68_v47 = vld [vmem:[#allocation3 + $0x98] sm:$0xff]  ;;  %v61_v48 = vld [vmem:[#allocation3 + $0x60] sm:$0xff]  ;;  %v62_v49 = vld [vmem:[#allocation3 + $0x68] sm:$0xff] }
  0x1c   :  { %207 = vmatpush.msra.mxu0 %v77_v32  ;;  %248 = vmatpush.msra.mxu1 %v78_v33  ;;  %v63_v50 = vld [vmem:[#allocation3 + $0x70] sm:$0xff]  ;;  %v64_v51 = vld [vmem:[#allocation3 + $0x78] sm:$0xff]  ;;  %v57_v52 = vld [vmem:[#allocation3 + $0x40] sm:$0xff] }
  0x1d   :  { %289 = vmatpush.msra.mxu2 %v79_v34  ;;  %330 = vmatpush.msra.mxu3 %v80_v35  ;;  %v58_v53 = vld [vmem:[#allocation3 + $0x48] sm:$0xff]  ;;  %v59_v54 = vld [vmem:[#allocation3 + $0x50] sm:$0xff]  ;;  %v60_v55 = vld [vmem:[#allocation3 + $0x58] sm:$0xff] }
  0x1e   :  { %208 = vmatpush.msra.mxu0 %v73_v36  ;;  %249 = vmatpush.msra.mxu1 %v74_v37  ;;  %v53_v56 = vld [vmem:[#allocation3 + $0x20] sm:$0xff]  ;;  %v54_v57 = vld [vmem:[#allocation3 + $0x28] sm:$0xff]  ;;  %v55_v58 = vld [vmem:[#allocation3 + $0x30] sm:$0xff] }
  0x1f   :  { %290 = vmatpush.msra.mxu2 %v75_v38  ;;  %331 = vmatpush.msra.mxu3 %v76_v39  ;;  %v56_v59 = vld [vmem:[#allocation3 + $0x38] sm:$0xff]  ;;  %v49_v60 = vld [vmem:[#allocation3] sm:$0xff]  ;;  %v50_v61 = vld [vmem:[#allocation3 + $0x8] sm:$0xff] }
  0x20   :  { %209 = vmatpush.msra.mxu0 %v69_v40  ;;  %250 = vmatpush.msra.mxu1 %v70_v41  ;;  %v51_v62 = vld [vmem:[#allocation3 + $0x10] sm:$0xff]  ;;  %v52_v63 = vld [vmem:[#allocation3 + $0x18] sm:$0xff]  ;;  %v182_v0 = vld [vmem:[%s3135_s0] sm:$0xff] }
  0x21   :  { %291 = vmatpush.msra.mxu2 %v71_v42  ;;  %332 = vmatpush.msra.mxu3 %v72_v43  ;;  %v2191_v1 = vld [vmem:[#allocation5 + $0x1e0] sm:$0xff]  ;;  %v2193_v2 = vld [vmem:[#allocation5 + $0x1e8] sm:$0xff]  ;;  %v2195_v3 = vld [vmem:[#allocation5 + $0x1f8] sm:$0xff] }
  0x22   :  { %210 = vmatpush.msra.mxu0 %v65_v44  ;;  %251 = vmatpush.msra.mxu1 %v66_v45  ;;  %v2197_v4 = vld [vmem:[#allocation5 + $0x1f0] sm:$0xff]  ;;  %v2199_v5 = vld [vmem:[#allocation5 + $0x1c0] sm:$0xff]  ;;  %v2201_v6 = vld [vmem:[#allocation5 + $0x1c8] sm:$0xff] }
  0x23   :  { %292 = vmatpush.msra.mxu2 %v67_v46  ;;  %333 = vmatpush.msra.mxu3 %v68_v47  ;;  %v2205_v7 = vld [vmem:[#allocation5 + $0x1d8] sm:$0xff]  ;;  %v2207_v8 = vld [vmem:[#allocation5 + $0x1d0] sm:$0xff]  ;;  %v2210_v9 = vld [vmem:[#allocation5 + $0x1a0] sm:$0xff] }
  0x24   :  { %211 = vmatpush.msra.mxu0 %v61_v48  ;;  %252 = vmatpush.msra.mxu1 %v62_v49  ;;  %v2212_v10 = vld [vmem:[#allocation5 + $0x1a8] sm:$0xff]  ;;  %v2217_v11 = vld [vmem:[#allocation5 + $0x1b8] sm:$0xff]  ;;  %v2219_v12 = vld [vmem:[#allocation5 + $0x1b0] sm:$0xff] }
  0x25   :  { %293 = vmatpush.msra.mxu2 %v63_v50  ;;  %334 = vmatpush.msra.mxu3 %v64_v51  ;;  %v183_v13 = vld [vmem:[%s3135_s0 + $0x8] sm:$0xff]  ;;  %v2228_v14 = vld [vmem:[#allocation5 + $0x180] sm:$0xff]  ;;  %v2234_v16 = vld [vmem:[#allocation5 + $0x198] sm:$0xff] }
  0x26   :  { %212 = vmatpush.msra.mxu0 %v57_v52  ;;  %253 = vmatpush.msra.mxu1 %v58_v53  ;;  %v2230_v15 = vld [vmem:[#allocation5 + $0x188] sm:$0xff]  ;;  %v2236_v17 = vld [vmem:[#allocation5 + $0x190] sm:$0xff]  ;;  %v2238_v18 = vld [vmem:[#allocation5 + $0x160] sm:$0xff] }
  0x27   :  { %294 = vmatpush.msra.mxu2 %v59_v54  ;;  %335 = vmatpush.msra.mxu3 %v60_v55  ;;  %v2240_v19 = vld [vmem:[#allocation5 + $0x168] sm:$0xff]  ;;  %v2244_v20 = vld [vmem:[#allocation5 + $0x178] sm:$0xff]  ;;  %v2246_v21 = vld [vmem:[#allocation5 + $0x170] sm:$0xff] }
  0x28   :  { %213 = vmatpush.msra.mxu0 %v53_v56  ;;  %254 = vmatpush.msra.mxu1 %v54_v57  ;;  %v2249_v22 = vld [vmem:[#allocation5 + $0x140] sm:$0xff]  ;;  %v2251_v23 = vld [vmem:[#allocation5 + $0x148] sm:$0xff]  ;;  %v2256_v24 = vld [vmem:[#allocation5 + $0x158] sm:$0xff] }
  0x29   :  { %295 = vmatpush.msra.mxu2 %v55_v58  ;;  %336 = vmatpush.msra.mxu3 %v56_v59  ;;  %v2258_v25 = vld [vmem:[#allocation5 + $0x150] sm:$0xff]  ;;  %v2267_v27 = vld [vmem:[#allocation5 + $0x120] sm:$0xff]  ;;  %v2269_v28 = vld [vmem:[#allocation5 + $0x128] sm:$0xff] }
  0x2a   :  { %214 = vmatpush.msra.mxu0 %v49_v60  ;;  %255 = vmatpush.msra.mxu1 %v50_v61  ;;  %v184_v26 = vld [vmem:[%s3135_s0 + $0x10] sm:$0xff]  ;;  %v2273_v29 = vld [vmem:[#allocation5 + $0x138] sm:$0xff]  ;;  %v2277_v31 = vld [vmem:[#allocation5 + $0x100] sm:$0xff] }
  0x2b   :  { %296 = vmatpush.msra.mxu2 %v51_v62  ;;  %337 = vmatpush.msra.mxu3 %v52_v63  ;;  %v2275_v30 = vld [vmem:[#allocation5 + $0x130] sm:$0xff]  ;;  %v2279_v32 = vld [vmem:[#allocation5 + $0x108] sm:$0xff]  ;;  %v2283_v33 = vld [vmem:[#allocation5 + $0x118] sm:$0xff] }
  0x2c   :  { %215 = vmatmul.f32.vlgmr.msra.gmra.mxu0 %v182_v0  ;;  %256 = vmatmul.f32.vlgmr.msra.gmra.mxu1 %v182_v0  ;;  %v2285_v34 = vld [vmem:[#allocation5 + $0x110] sm:$0xff]  ;;  %v2288_v35 = vld [vmem:[#allocation5 + $0xe0] sm:$0xff]  ;;  %v2290_v36 = vld [vmem:[#allocation5 + $0xe8] sm:$0xff] }
  0x2d   :  { %297 = vmatmul.f32.vlgmr.msra.gmra.mxu2 %v182_v0  ;;  %338 = vmatmul.f32.vlgmr.msra.gmra.mxu3 %v182_v0  ;;  %v2295_v37 = vld [vmem:[#allocation5 + $0xf8] sm:$0xff]  ;;  %v2297_v38 = vld [vmem:[#allocation5 + $0xf0] sm:$0xff]  ;;  %v2306_v40 = vld [vmem:[#allocation5 + $0xc0] sm:$0xff] }
  0x2e   :  { %619 = vmatpush.msrb.mxu0 %v2191_v1  ;;  %639 = vmatpush.msrb.mxu1 %v2193_v2  ;;  %v185_v39 = vld [vmem:[%s3135_s0 + $0x18] sm:$0xff]  ;;  %v2308_v41 = vld [vmem:[#allocation5 + $0xc8] sm:$0xff]  ;;  %v2314_v43 = vld [vmem:[#allocation5 + $0xd0] sm:$0xff] }
  0x2f   :  { %679 = vmatpush.msrb.mxu3 %v2195_v3  ;;  %659 = vmatpush.msrb.mxu2 %v2197_v4  ;;  %v2312_v42 = vld [vmem:[#allocation5 + $0xd8] sm:$0xff]  ;;  %3228 = vst [vmem:[#allocation10_spill] sm:$0xff] %v2314_v43  ;;  %v2316_v44 = vld [vmem:[#allocation5 + $0xa0] sm:$0xff]  ;;  %v2318_v45 = vld [vmem:[#allocation5 + $0xa8] sm:$0xff] }
  0x30   :  { %620 = vmatpush.msrb.mxu0 %v2199_v5  ;;  %640 = vmatpush.msrb.mxu1 %v2201_v6  ;;  %3227 = vst [vmem:[#allocation9_spill] sm:$0xff] %v2312_v42  ;;  %v2322_v46 = vld [vmem:[#allocation5 + $0xb8] sm:$0xff]  ;;  %v2324_v47 = vld [vmem:[#allocation5 + $0xb0] sm:$0xff]  ;;  %v2327_v48 = vld [vmem:[#allocation5 + $0x80] sm:$0xff] }
  0x31   :  { %680 = vmatpush.msrb.mxu3 %v2205_v7  ;;  %660 = vmatpush.msrb.mxu2 %v2207_v8  ;;  %3229 = vst [vmem:[#allocation11_spill] sm:$0xff] %v2316_v44  ;;  %v2329_v49 = vld [vmem:[#allocation5 + $0x88] sm:$0xff]  ;;  %v2334_v50 = vld [vmem:[#allocation5 + $0x98] sm:$0xff]  ;;  %v2336_v51 = vld [vmem:[#allocation5 + $0x90] sm:$0xff] }
  0x32   :  { %621 = vmatpush.msrb.mxu0 %v2210_v9  ;;  %641 = vmatpush.msrb.mxu1 %v2212_v10  ;;  %3230 = vst [vmem:[#allocation12_spill] sm:$0xff] %v2318_v45  ;;  %v186_v52 = vld [vmem:[%s3135_s0 + $0x20] sm:$0xff]  ;;  %v2347_v54 = vld [vmem:[#allocation5 + $0x68] sm:$0xff]  ;;  %v2351_v55 = vld [vmem:[#allocation5 + $0x78] sm:$0xff] }
  0x33   :  { %681 = vmatpush.msrb.mxu3 %v2217_v11  ;;  %661 = vmatpush.msrb.mxu2 %v2219_v12  ;;  %3231 = vst [vmem:[#allocation13_spill] sm:$0xff] %v2322_v46  ;;  %v2345_v53 = vld [vmem:[#allocation5 + $0x60] sm:$0xff]  ;;  %v2353_v56 = vld [vmem:[#allocation5 + $0x70] sm:$0xff]  ;;  %v2357_v58 = vld [vmem:[#allocation5 + $0x48] sm:$0xff] }
  0x34   :  { %218 = vmatmul.f32.gmra.mxu0 %v183_v13  ;;  %259 = vmatmul.f32.gmra.mxu1 %v183_v13  ;;  %3232 = vst [vmem:[#allocation14_spill] sm:$0xff] %v2324_v47  ;;  %v2355_v57 = vld [vmem:[#allocation5 + $0x40] sm:$0xff]  ;;  %v2361_v59 = vld [vmem:[#allocation5 + $0x58] sm:$0xff]  ;;  %v2363_v60 = vld [vmem:[#allocation5 + $0x50] sm:$0xff] }
  0x35   :  { %300 = vmatmul.f32.gmra.mxu2 %v183_v13  ;;  %341 = vmatmul.f32.gmra.mxu3 %v183_v13  ;;  %3233 = vst [vmem:[#allocation15_spill] sm:$0xff] %v2327_v48  ;;  %v2366_v61 = vld [vmem:[#allocation5 + $0x20] sm:$0xff]  ;;  %v2368_v62 = vld [vmem:[#allocation5 + $0x28] sm:$0xff]  ;;  %v2373_v63 = vld [vmem:[#allocation5 + $0x30] sm:$0xff] }
  0x36   :  { %622 = vmatpush.msrb.mxu0 %v2228_v14  ;;  %642 = vmatpush.msrb.mxu1 %v2230_v15  ;;  %3234 = vst [vmem:[#allocation16_spill] sm:$0xff] %v2329_v49  ;;  %v2375_v0 = vld [vmem:[#allocation5 + $0x38] sm:$0xff]  ;;  %v187_v13 = vld [vmem:[%s3135_s0 + $0x28] sm:$0xff] }
  0x37   :  { %682 = vmatpush.msrb.mxu3 %v2234_v16  ;;  %662 = vmatpush.msrb.mxu2 %v2236_v17  ;;  %3235 = vst [vmem:[#allocation17_spill] sm:$0xff] %v2334_v50 }
  0x38   :  { %623 = vmatpush.msrb.mxu0 %v2238_v18  ;;  %643 = vmatpush.msrb.mxu1 %v2240_v19  ;;  %3236 = vst [vmem:[#allocation18_spill] sm:$0xff] %v2336_v51 }
  0x39   :  { %683 = vmatpush.msrb.mxu3 %v2244_v20  ;;  %663 = vmatpush.msrb.mxu2 %v2246_v21  ;;  %3237 = vst [vmem:[#allocation19_spill] sm:$0xff] %v2345_v53 }
  0x3a   :  { %624 = vmatpush.msrb.mxu0 %v2249_v22  ;;  %644 = vmatpush.msrb.mxu1 %v2251_v23  ;;  %3238 = vst [vmem:[#allocation20_spill] sm:$0xff] %v2347_v54 }
  0x3b   :  { %684 = vmatpush.msrb.mxu3 %v2256_v24  ;;  %664 = vmatpush.msrb.mxu2 %v2258_v25  ;;  %3239 = vst [vmem:[#allocation21_spill] sm:$0xff] %v2351_v55 }
  0x3c   :  { %221 = vmatmul.f32.gmra.mxu0 %v184_v26  ;;  %262 = vmatmul.f32.gmra.mxu1 %v184_v26  ;;  %3240 = vst [vmem:[#allocation22_spill] sm:$0xff] %v2353_v56 }
  0x3d   :  { %303 = vmatmul.f32.gmra.mxu2 %v184_v26  ;;  %344 = vmatmul.f32.gmra.mxu3 %v184_v26  ;;  %3241 = vst [vmem:[#allocation23_spill] sm:$0xff] %v2355_v57  ;;  %v2384_v26 = vld [vmem:[#allocation5] sm:$0xff] }
  0x3e   :  { %625 = vmatpush.msrb.mxu0 %v2267_v27  ;;  %645 = vmatpush.msrb.mxu1 %v2269_v28  ;;  %3242 = vst [vmem:[#allocation24_spill] sm:$0xff] %v2357_v58 }
  0x3f   :  { %685 = vmatpush.msrb.mxu3 %v2273_v29  ;;  %665 = vmatpush.msrb.mxu2 %v2275_v30  ;;  %3243 = vst [vmem:[#allocation25_spill] sm:$0xff] %v2361_v59 }
  0x40   :  { %626 = vmatpush.msrb.mxu0 %v2277_v31  ;;  %646 = vmatpush.msrb.mxu1 %v2279_v32  ;;  %3244 = vst [vmem:[#allocation26_spill] sm:$0xff] %v2363_v60 }
  0x41   :  { %686 = vmatpush.msrb.mxu3 %v2283_v33  ;;  %666 = vmatpush.msrb.mxu2 %v2285_v34  ;;  %3245 = vst [vmem:[#allocation27_spill] sm:$0xff] %v2366_v61 }
  0x42   :  { %627 = vmatpush.msrb.mxu0 %v2288_v35  ;;  %647 = vmatpush.msrb.mxu1 %v2290_v36  ;;  %3246 = vst [vmem:[#allocation28_spill] sm:$0xff] %v2368_v62 }
  0x43   :  { %687 = vmatpush.msrb.mxu3 %v2295_v37  ;;  %667 = vmatpush.msrb.mxu2 %v2297_v38  ;;  %3247 = vst [vmem:[#allocation29_spill] sm:$0xff] %v2373_v63 }
  0x44   :  { %224 = vmatmul.f32.gmra.mxu0 %v185_v39  ;;  %265 = vmatmul.f32.gmra.mxu1 %v185_v39  ;;  %3248 = vst [vmem:[#allocation30_spill] sm:$0xff] %v2375_v0 }
  0x45   :  { %306 = vmatmul.f32.gmra.mxu2 %v185_v39  ;;  %347 = vmatmul.f32.gmra.mxu3 %v185_v39  ;;  %3249 = vst [vmem:[#allocation31_spill] sm:$0xff] %v2384_v26  ;;  %v2386_v39 = vld [vmem:[#allocation5 + $0x8] sm:$0xff] }
  0x46   :  { %628 = vmatpush.msrb.mxu0 %v2306_v40  ;;  %648 = vmatpush.msrb.mxu1 %v2308_v41  ;;  %3250 = vst [vmem:[#allocation32_spill] sm:$0xff] %v2386_v39 }
  0x47   :  { %688 = vmatpush.msrb.mxu3 %v2312_v42  ;;  %668 = vmatpush.msrb.mxu2 %v2314_v43 }
  0x48   :  { %629 = vmatpush.msrb.mxu0 %v2316_v44  ;;  %649 = vmatpush.msrb.mxu1 %v2318_v45 }
  0x49   :  { %689 = vmatpush.msrb.mxu3 %v2322_v46  ;;  %669 = vmatpush.msrb.mxu2 %v2324_v47 }
  0x4a   :  { %630 = vmatpush.msrb.mxu0 %v2327_v48  ;;  %650 = vmatpush.msrb.mxu1 %v2329_v49 }
  0x4b   :  { %690 = vmatpush.msrb.mxu3 %v2334_v50  ;;  %670 = vmatpush.msrb.mxu2 %v2336_v51 }
  0x4c   :  { %227 = vmatmul.f32.gmra.mxu0 %v186_v52  ;;  %268 = vmatmul.f32.gmra.mxu1 %v186_v52 }
  0x4d   :  { %309 = vmatmul.f32.gmra.mxu2 %v186_v52  ;;  %350 = vmatmul.f32.gmra.mxu3 %v186_v52  ;;  %v2390_v52 = vld [vmem:[#allocation5 + $0x10] sm:$0xff] }
  0x4e   :  { %631 = vmatpush.msrb.mxu0 %v2345_v53  ;;  %651 = vmatpush.msrb.mxu1 %v2347_v54  ;;  %3251 = vst [vmem:[#allocation33_spill] sm:$0xff] %v2390_v52 }
  0x4f   :  { %691 = vmatpush.msrb.mxu3 %v2351_v55  ;;  %671 = vmatpush.msrb.mxu2 %v2353_v56 }
  0x50   :  { %632 = vmatpush.msrb.mxu0 %v2355_v57  ;;  %652 = vmatpush.msrb.mxu1 %v2357_v58  ;;  %v2392_v58 = vld [vmem:[#allocation5 + $0x18] sm:$0xff] }
  0x51   :  { %692 = vmatpush.msrb.mxu3 %v2361_v59  ;;  %672 = vmatpush.msrb.mxu2 %v2363_v60  ;;  %3252 = vst [vmem:[#allocation34_spill] sm:$0xff] %v2392_v58 }
  0x52   :  { %633 = vmatpush.msrb.mxu0 %v2366_v61  ;;  %653 = vmatpush.msrb.mxu1 %v2368_v62 }
  0x53   :  { %673 = vmatpush.msrb.mxu2 %v2373_v63  ;;  %693 = vmatpush.msrb.mxu3 %v2375_v0  ;;  %v188_v0 = vld [vmem:[%s3135_s0 + $0x30] sm:$0xff] }
  0x54   :  { %230 = vmatmul.f32.gmra.mxu0 %v187_v13  ;;  %271 = vmatmul.f32.gmra.mxu1 %v187_v13 }
  0x55   :  { %312 = vmatmul.f32.gmra.mxu2 %v187_v13  ;;  %353 = vmatmul.f32.gmra.mxu3 %v187_v13  ;;  %v189_v13 = vld [vmem:[%s3135_s0 + $0x38] sm:$0xff] }
  0x56   :  { %634 = vmatpush.msrb.mxu0 %v2384_v26  ;;  %654 = vmatpush.msrb.mxu1 %v2386_v39 }
  0x57   :  { %674 = vmatpush.msrb.mxu2 %v2390_v52  ;;  %694 = vmatpush.msrb.mxu3 %v2392_v58 }
  0x58   :  { %774 = vmatpush.msra.mxu0 %v2191_v1  ;;  %794 = vmatpush.msra.mxu1 %v2193_v2 }
  0x59   :  { %814 = vmatpush.msra.mxu2 %v2197_v4  ;;  %834 = vmatpush.msra.mxu3 %v2195_v3 }
  0x5a   :  { %775 = vmatpush.msra.mxu0 %v2199_v5  ;;  %795 = vmatpush.msra.mxu1 %v2201_v6 }
  0x5b   :  { %815 = vmatpush.msra.mxu2 %v2207_v8  ;;  %835 = vmatpush.msra.mxu3 %v2205_v7 }
  0x5c   :  { %233 = vmatmul.f32.gmra.mxu0 %v188_v0  ;;  %274 = vmatmul.f32.gmra.mxu1 %v188_v0 }
  0x5d   :  { %315 = vmatmul.f32.gmra.mxu2 %v188_v0  ;;  %356 = vmatmul.f32.gmra.mxu3 %v188_v0  ;;  %v2156_v0 = vmov 0.0  }
  0x5e   :  { %776 = vmatpush.msra.mxu0 %v2210_v9  ;;  %796 = vmatpush.msra.mxu1 %v2212_v10 }
  0x5f   :  { %816 = vmatpush.msra.mxu2 %v2219_v12  ;;  %836 = vmatpush.msra.mxu3 %v2217_v11 }
  0x60   :  { %777 = vmatpush.msra.mxu0 %v2228_v14  ;;  %797 = vmatpush.msra.mxu1 %v2230_v15 }
  0x61   :  { %817 = vmatpush.msra.mxu2 %v2236_v17  ;;  %837 = vmatpush.msra.mxu3 %v2234_v16 }
  0x62   :  { %778 = vmatpush.msra.mxu0 %v2238_v18  ;;  %798 = vmatpush.msra.mxu1 %v2240_v19 }
  0x63   :  { %818 = vmatpush.msra.mxu2 %v2246_v21  ;;  %838 = vmatpush.msra.mxu3 %v2244_v20 }
  0x64   :  { %236 = vmatmul.f32.gmra.mxu0 %v189_v13  ;;  %277 = vmatmul.f32.gmra.mxu1 %v189_v13 }
  0x65   :  { %318 = vmatmul.f32.gmra.mxu2 %v189_v13  ;;  %359 = vmatmul.f32.gmra.mxu3 %v189_v13  ;;  %v3253_v13 = vld [vmem:[#allocation24_spill] sm:$0xff] }
  0x66   :  { %779 = vmatpush.msra.mxu0 %v2249_v22  ;;  %799 = vmatpush.msra.mxu1 %v2251_v23 }
  0x67   :  { %819 = vmatpush.msra.mxu2 %v2258_v25  ;;  %839 = vmatpush.msra.mxu3 %v2256_v24 }
  0x68   :  { %780 = vmatpush.msra.mxu0 %v2267_v27  ;;  %800 = vmatpush.msra.mxu1 %v2269_v28 }
  0x69   :  { %820 = vmatpush.msra.mxu2 %v2275_v30  ;;  %840 = vmatpush.msra.mxu3 %v2273_v29 }
  0x6a   :  { %781 = vmatpush.msra.mxu0 %v2277_v31  ;;  %801 = vmatpush.msra.mxu1 %v2279_v32 }
  0x6b   :  { %821 = vmatpush.msra.mxu2 %v2285_v34  ;;  %841 = vmatpush.msra.mxu3 %v2283_v33 }
  0x6c   :  { %635 = vmatmul.f32.vlgmr.msrb.gmra.mxu0 %v2156_v0  ;;  %655 = vmatmul.f32.vlgmr.msrb.gmra.mxu1 %v2156_v0 }
  0x6d   :  { %675 = vmatmul.f32.vlgmr.msrb.gmra.mxu2 %v2156_v0  ;;  %695 = vmatmul.f32.vlgmr.msrb.gmra.mxu3 %v2156_v0  ;;  %v3254_v0 = vld [vmem:[#allocation30_spill] sm:$0xff] }
  0x6e   :  { %782 = vmatpush.msra.mxu0 %v2288_v35  ;;  %802 = vmatpush.msra.mxu1 %v2290_v36 }
  0x6f   :  { %822 = vmatpush.msra.mxu2 %v2297_v38  ;;  %842 = vmatpush.msra.mxu3 %v2295_v37 }
  0x70   :  { %783 = vmatpush.msra.mxu0 %v2306_v40  ;;  %803 = vmatpush.msra.mxu1 %v2308_v41 }
  0x71   :  { %823 = vmatpush.msra.mxu2 %v2314_v43  ;;  %843 = vmatpush.msra.mxu3 %v2312_v42 }
  0x72   :  { %784 = vmatpush.msra.mxu0 %v2316_v44  ;;  %804 = vmatpush.msra.mxu1 %v2318_v45 }
  0x73   :  { %824 = vmatpush.msra.mxu2 %v2324_v47  ;;  %844 = vmatpush.msra.mxu3 %v2322_v46 }
  0x74   :  { %785 = vmatpush.msra.mxu0 %v2327_v48  ;;  %805 = vmatpush.msra.mxu1 %v2329_v49 }
  0x75   :  { %825 = vmatpush.msra.mxu2 %v2336_v51  ;;  %845 = vmatpush.msra.mxu3 %v2334_v50 }
  0x76   :  { %786 = vmatpush.msra.mxu0 %v2345_v53  ;;  %806 = vmatpush.msra.mxu1 %v2347_v54 }
  0x77   :  { %826 = vmatpush.msra.mxu2 %v2353_v56  ;;  %846 = vmatpush.msra.mxu3 %v2351_v55 }
  0x78   :  { %787 = vmatpush.msra.mxu0 %v2355_v57  ;;  %807 = vmatpush.msra.mxu1 %v3253_v13 }
  0x79   :  { %827 = vmatpush.msra.mxu2 %v2363_v60  ;;  %847 = vmatpush.msra.mxu3 %v2361_v59 }
  0x7a   :  { %788 = vmatpush.msra.mxu0 %v2366_v61  ;;  %808 = vmatpush.msra.mxu1 %v2368_v62 }
  0x7b   :  { %828 = vmatpush.msra.mxu2 %v2373_v63  ;;  %848 = vmatpush.msra.mxu3 %v3254_v0 }
  0x7c   :  { %789 = vmatpush.msra.mxu0 %v2384_v26  ;;  %809 = vmatpush.msra.mxu1 %v2386_v39 }
  0x7d   :  { %829 = vmatpush.msra.mxu2 %v2390_v52  ;;  %849 = vmatpush.msra.mxu3 %v2392_v58 }
  0x7e   :  { %930 = vmatpush.msrb.mxu0 %v2191_v1  ;;  %950 = vmatpush.msrb.mxu1 %v2193_v2 }
  0x7f   :  { %970 = vmatpush.msrb.mxu2 %v2197_v4  ;;  %990 = vmatpush.msrb.mxu3 %v2195_v3 }
  0x80   :  { %931 = vmatpush.msrb.mxu0 %v2199_v5  ;;  %951 = vmatpush.msrb.mxu1 %v2201_v6 }
  0x81   :  { %971 = vmatpush.msrb.mxu2 %v2207_v8  ;;  %991 = vmatpush.msrb.mxu3 %v2205_v7 }
  0x82   :  { %932 = vmatpush.msrb.mxu0 %v2210_v9  ;;  %952 = vmatpush.msrb.mxu1 %v2212_v10 }
  0x83   :  { %972 = vmatpush.msrb.mxu2 %v2219_v12  ;;  %992 = vmatpush.msrb.mxu3 %v2217_v11 }
  0x84   :  { %933 = vmatpush.msrb.mxu0 %v2228_v14  ;;  %953 = vmatpush.msrb.mxu1 %v2230_v15 }
  0x85   :  { %973 = vmatpush.msrb.mxu2 %v2236_v17  ;;  %993 = vmatpush.msrb.mxu3 %v2234_v16 }
  0x86   :  { %934 = vmatpush.msrb.mxu0 %v2238_v18  ;;  %954 = vmatpush.msrb.mxu1 %v2240_v19 }
  0x87   :  { %974 = vmatpush.msrb.mxu2 %v2246_v21  ;;  %994 = vmatpush.msrb.mxu3 %v2244_v20 }
  0x88   :  { %935 = vmatpush.msrb.mxu0 %v2249_v22  ;;  %955 = vmatpush.msrb.mxu1 %v2251_v23 }
  0x89   :  { %975 = vmatpush.msrb.mxu2 %v2258_v25  ;;  %995 = vmatpush.msrb.mxu3 %v2256_v24 }
  0x8a   :  { %936 = vmatpush.msrb.mxu0 %v2267_v27  ;;  %956 = vmatpush.msrb.mxu1 %v2269_v28 }
  0x8b   :  { %976 = vmatpush.msrb.mxu2 %v2275_v30  ;;  %996 = vmatpush.msrb.mxu3 %v2273_v29 }
  0x8c   :  { %937 = vmatpush.msrb.mxu0 %v2277_v31  ;;  %957 = vmatpush.msrb.mxu1 %v2279_v32 }
  0x8d   :  { %977 = vmatpush.msrb.mxu2 %v2285_v34  ;;  %997 = vmatpush.msrb.mxu3 %v2283_v33 }
  0x8e   :  { %938 = vmatpush.msrb.mxu0 %v2288_v35  ;;  %958 = vmatpush.msrb.mxu1 %v2290_v36 }
  0x8f   :  { %978 = vmatpush.msrb.mxu2 %v2297_v38  ;;  %998 = vmatpush.msrb.mxu3 %v2295_v37 }
  0x90   :  { %939 = vmatpush.msrb.mxu0 %v2306_v40  ;;  %959 = vmatpush.msrb.mxu1 %v2308_v41 }
  0x91   :  { %979 = vmatpush.msrb.mxu2 %v2314_v43  ;;  %999 = vmatpush.msrb.mxu3 %v2312_v42 }
  0x92   :  { %940 = vmatpush.msrb.mxu0 %v2316_v44  ;;  %960 = vmatpush.msrb.mxu1 %v2318_v45 }
  0x93   :  { %980 = vmatpush.msrb.mxu2 %v2324_v47  ;;  %1000 = vmatpush.msrb.mxu3 %v2322_v46 }
  0x94   :  { %941 = vmatpush.msrb.mxu0 %v2327_v48  ;;  %961 = vmatpush.msrb.mxu1 %v2329_v49 }
  0x95   :  { %981 = vmatpush.msrb.mxu2 %v2336_v51  ;;  %1001 = vmatpush.msrb.mxu3 %v2334_v50 }
  0x96   :  { %942 = vmatpush.msrb.mxu0 %v2345_v53  ;;  %962 = vmatpush.msrb.mxu1 %v2347_v54 }
  0x97   :  { %982 = vmatpush.msrb.mxu2 %v2353_v56  ;;  %1002 = vmatpush.msrb.mxu3 %v2351_v55 }
  0x98   :  { %943 = vmatpush.msrb.mxu0 %v2355_v57  ;;  %963 = vmatpush.msrb.mxu1 %v3253_v13 }
  0x99   :  { %983 = vmatpush.msrb.mxu2 %v2363_v60  ;;  %1003 = vmatpush.msrb.mxu3 %v2361_v59 }
  0x9a   :  { %944 = vmatpush.msrb.mxu0 %v2366_v61  ;;  %964 = vmatpush.msrb.mxu1 %v2368_v62  ;;  %v177_v61 = vld [vmem:[%s3138_s3] sm:$0xf] }
  0x9b   :  { %984 = vmatpush.msrb.mxu2 %v2373_v63  ;;  %1004 = vmatpush.msrb.mxu3 %v3254_v0  ;;  %v191_v59 = vperm.slane %v177_v61, 0  ;;  %v192_v62 = vperm.slane %v177_v61, 1 }
  0x9c   :  { %945 = vmatpush.msrb.mxu0 %v2384_v26  ;;  %965 = vmatpush.msrb.mxu1 %v2386_v39 }
  0x9d   :  { %985 = vmatpush.msrb.mxu2 %v2390_v52  ;;  %1005 = vmatpush.msrb.mxu3 %v2392_v58  ;;  %v2543_v52 = vperm.slane %v177_v61, 2  ;;  %v194_v58 = vperm.slane %v177_v61, 3 }
  0xa9   :  { %v216_v13 = vpop.f32.mrf.mxu0  ;;  %v257_v60 = vpop.f32.mrf.mxu1 }
  0xb0   :  { %v2535_v57 = vpop.f32.mrf.mxu2  ;;  %v2537_v63 = vpop.f32.mrf.mxu3 }
  0xb1   :  { %v219_v0 = vpop.f32.mrf.mxu0  ;;  %v260_v26 = vpop.f32.mrf.mxu1 }
  0xb2   :  { %v2539_v55 = vadd.f32 %v219_v0, %v191_v59  ;;  %v2541_v39 = vadd.f32 %v260_v26, %v192_v62 }
  0xb4   :  { %3255 = vst [vmem:[#allocation35_spill] sm:$0xff] %v2539_v55 }
  0xb5   :  { %3256 = vst [vmem:[#allocation36_spill] sm:$0xff] %v2541_v39 }
  0xb8   :  { %v301_v56 = vpop.f32.mrf.mxu2  ;;  %v342_v54 = vpop.f32.mrf.mxu3 }
  0xb9   :  { %v2546_v53 = vadd.f32 %v301_v56, %v2543_v52  ;;  %v2548_v50 = vadd.f32 %v342_v54, %v194_v58  ;;  %v222_v51 = vpop.f32.mrf.mxu0  ;;  %v263_v49 = vpop.f32.mrf.mxu1 }
  0xba   :  { %v2550_v48 = vadd.f32 %v222_v51, %v191_v59  ;;  %v2552_v46 = vadd.f32 %v263_v49, %v192_v62 }
  0xbb   :  { %3257 = vst [vmem:[#allocation37_spill] sm:$0xff] %v2546_v53 }
  0xbc   :  { %3258 = vst [vmem:[#allocation38_spill] sm:$0xff] %v2548_v50 }
  0xbd   :  { %3259 = vst [vmem:[#allocation39_spill] sm:$0xff] %v2550_v48 }
  0xbe   :  { %3260 = vst [vmem:[#allocation40_spill] sm:$0xff] %v2552_v46 }
  0xc0   :  { %v304_v0 = vpop.f32.mrf.mxu2  ;;  %v345_v55 = vpop.f32.mrf.mxu3 }
  0xc1   :  { %v2555_v26 = vadd.f32 %v304_v0, %v2543_v52  ;;  %v2557_v39 = vadd.f32 %v345_v55, %v194_v58  ;;  %v225_v61 = vpop.f32.mrf.mxu0  ;;  %v266_v47 = vpop.f32.mrf.mxu1 }
  0xc2   :  { %v2559_v45 = vadd.f32 %v225_v61, %v191_v59  ;;  %v2561_v56 = vadd.f32 %v266_v47, %v192_v62 }
  0xc3   :  { %3261 = vst [vmem:[#allocation41_spill] sm:$0xff] %v2555_v26 }
  0xc4   :  { %3262 = vst [vmem:[#allocation42_spill] sm:$0xff] %v2557_v39 }
  0xc5   :  { %3263 = vst [vmem:[#allocation43_spill] sm:$0xff] %v2559_v45 }
  0xc6   :  { %3264 = vst [vmem:[#allocation44_spill] sm:$0xff] %v2561_v56 }
  0xc8   :  { %v307_v54 = vpop.f32.mrf.mxu2  ;;  %v348_v53 = vpop.f32.mrf.mxu3 }
  0xc9   :  { %v2564_v51 = vadd.f32 %v307_v54, %v2543_v52  ;;  %v2566_v49 = vadd.f32 %v348_v53, %v194_v58  ;;  %v228_v46 = vpop.f32.mrf.mxu0  ;;  %v269_v48 = vpop.f32.mrf.mxu1 }
  0xca   :  { %v2568_v50 = vadd.f32 %v228_v46, %v191_v59  ;;  %v2570_v0 = vadd.f32 %v269_v48, %v192_v62 }
  0xcb   :  { %3265 = vst [vmem:[#allocation45_spill] sm:$0xff] %v2564_v51 }
  0xcc   :  { %3266 = vst [vmem:[#allocation46_spill] sm:$0xff] %v2566_v49 }
  0xcd   :  { %3267 = vst [vmem:[#allocation47_spill] sm:$0xff] %v2568_v50 }
  0xce   :  { %3268 = vst [vmem:[#allocation48_spill] sm:$0xff] %v2570_v0 }
  0xd0   :  { %v310_v55 = vpop.f32.mrf.mxu2  ;;  %v351_v26 = vpop.f32.mrf.mxu3 }
  0xd1   :  { %v2573_v61 = vadd.f32 %v310_v55, %v2543_v52  ;;  %v2575_v47 = vadd.f32 %v351_v26, %v194_v58  ;;  %v231_v56 = vpop.f32.mrf.mxu0  ;;  %v272_v45 = vpop.f32.mrf.mxu1 }
  0xd2   :  { %v2577_v39 = vadd.f32 %v231_v56, %v191_v59  ;;  %v2579_v54 = vadd.f32 %v272_v45, %v192_v62 }
  0xd3   :  { %3269 = vst [vmem:[#allocation49_spill] sm:$0xff] %v2573_v61 }
  0xd4   :  { %3270 = vst [vmem:[#allocation50_spill] sm:$0xff] %v2575_v47 }
  0xd5   :  { %3271 = vst [vmem:[#allocation51_spill] sm:$0xff] %v2577_v39 }
  0xd6   :  { %3272 = vst [vmem:[#allocation52_spill] sm:$0xff] %v2579_v54 }
  0xd8   :  { %v313_v53 = vpop.f32.mrf.mxu2  ;;  %v354_v51 = vpop.f32.mrf.mxu3 }
  0xd9   :  { %v2582_v46 = vadd.f32 %v313_v53, %v2543_v52  ;;  %v2584_v48 = vadd.f32 %v354_v51, %v194_v58  ;;  %v234_v0 = vpop.f32.mrf.mxu0  ;;  %v275_v50 = vpop.f32.mrf.mxu1  ;;  %v217_v51 = vadd.f32 %v216_v13, %v191_v59 }
  0xda   :  { %v2586_v49 = vadd.f32 %v234_v0, %v191_v59  ;;  %v2588_v55 = vadd.f32 %v275_v50, %v192_v62 }
  0xdb   :  { %3273 = vst [vmem:[#allocation53_spill] sm:$0xff] %v2582_v46  ;;  %v258_v46 = vadd.f32 %v257_v60, %v192_v62 }
  0xdc   :  { %3274 = vst [vmem:[#allocation54_spill] sm:$0xff] %v2584_v48 }
  0xdd   :  { %3275 = vst [vmem:[#allocation55_spill] sm:$0xff] %v2586_v49 }
  0xde   :  { %3276 = vst [vmem:[#allocation56_spill] sm:$0xff] %v2588_v55 }
  0xe0   :  { %v316_v26 = vpop.f32.mrf.mxu2  ;;  %v357_v61 = vpop.f32.mrf.mxu3 }
  0xe1   :  { %v2591_v56 = vadd.f32 %v316_v26, %v2543_v52  ;;  %v2593_v45 = vadd.f32 %v357_v61, %v194_v58  ;;  %v237_v54 = vpop.f32.mrf.mxu0  ;;  %v278_v39 = vpop.f32.mrf.mxu1 }
  0xe2   :  { %v2595_v47 = vadd.f32 %v237_v54, %v191_v59  ;;  %v2597_v53 = vadd.f32 %v278_v39, %v192_v62  ;;  %v340_v54 = vadd.f32 %v2537_v63, %v194_v58 }
  0xe3   :  { %3277 = vst [vmem:[#allocation57_spill] sm:$0xff] %v2591_v56 }
  0xe4   :  { %3278 = vst [vmem:[#allocation58_spill] sm:$0xff] %v2593_v45 }
  0xe5   :  { %3279 = vst [vmem:[#allocation59_spill] sm:$0xff] %v2595_v47 }
  0xe6   :  { %3280 = vst [vmem:[#allocation60_spill] sm:$0xff] %v2597_v53 }
  0xe8   :  { %v319_v48 = vpop.f32.mrf.mxu2  ;;  %v360_v0 = vpop.f32.mrf.mxu3 }
  0xe9   :  { %v2600_v50 = vadd.f32 %v319_v48, %v2543_v52  ;;  %v2602_v55 = vadd.f32 %v360_v0, %v194_v58  ;;  %v636_v49 = vpop.f32.mrf.mxu0  ;;  %v656_v26 = vpop.f32.mrf.mxu1 }
  0xea   :  { %v699_v56 = vadd.f32 %v636_v49, %v217_v51  ;;  %v700_v61 = vadd.f32 %v656_v26, %v258_v46  ;;  %v299_v49 = vadd.f32 %v2535_v57, %v2543_v52 }
  0xeb   :  { %3281 = vst [vmem:[#allocation61_spill] sm:$0xff] %v2600_v50 }
  0xec   :  { %3282 = vst [vmem:[#allocation62_spill] sm:$0xff] %v2602_v55  ;;  %v1872_v45 = vmul.f32 -1.442695, %v699_v56  ;;  %v1873_v44 = vmul.f32 -1.442695, %v700_v61 }
  0xee   :  { %1908 = vpow2.f32 %v1872_v45 }
  0xef   :  { %1910 = vpow2.f32 %v1873_v44 }
  0xf0   :  { %v696_v39 = vpop.f32.mrf.mxu3  ;;  %v676_v0 = vpop.f32.mrf.mxu2 }
  0xf1   :  { %v702_v59 = vadd.f32 %v696_v39, %v340_v54  ;;  %v701_v45 = vadd.f32 %v676_v0, %v299_v49 }
  0xf3   :  { %v1874_v60 = vmul.f32 -1.442695, %v702_v59 }
  0xf4   :  { %v1909_v62 = vpop.eup %1908 }
  0xf5   :  { %v1911_v13 = vpop.eup %1910  ;;  %v706_v53 = vadd.f32 1.0, %v1909_v62  ;;  %1912 = vpow2.f32 %v1874_v60 }
  0xf6   :  { %v725_v48 = vadd.f32 1.0, %v1911_v13 }
  0xf7   :  { %1914 = vrcp.f32 %v706_v53  ;;  %v718_v61 = vand.u32 2147483648, %v706_v53  ;;  %v716_v59 = vand.u32 2147483647, %v706_v53  ;;  %vm712_vm2 = vweird.f32 %v706_v53 }
  0xf8   :  { %1916 = vrcp.f32 %v725_v48  ;;  %v737_v54 = vand.u32 2147483648, %v725_v48  ;;  %v735_v62 = vand.u32 2147483647, %v725_v48  ;;  %vm731_vm3 = vweird.f32 %v725_v48 }
  0xf9   :  { %v719_v52 = vor.u32 1.1754944e-38, %v718_v61  ;;  %vm717_vm5 = vcmp.eq.f32.partialorder %v716_v59, 8.507059e+37 }
  0xfa   :  { %v738_v49 = vor.u32 1.1754944e-38, %v737_v54  ;;  %vm736_vm7 = vcmp.eq.f32.partialorder %v735_v62, 8.507059e+37 }
  0xfb   :  { %v1913_v50 = vpop.eup %1912 }
  0xfc   :  { %v745_v46 = vadd.f32 1.0, %v1913_v50 }
  0xfd   :  { %v1915_v56 = vpop.eup %1914 }
  0xfe   :  { %v1917_v58 = vpop.eup %1916  ;;  %v708_v44 = vmul.f32 %v1915_v56, %v706_v53  ;;  %1918 = vrcp.f32 %v745_v46  ;;  %vm713_vm0 = vweird.f32 %v1915_v56  ;;  %vm751_vm9 = vweird.f32 %v745_v46 }
  0xff   :  { %v727_v63 = vmul.f32 %v1917_v58, %v725_v48  ;;  %1920 = vtanh.f32 %v701_v45  ;;  %vm732_vm1 = vweird.f32 %v1917_v58  ;;  %vm714_vm4 = vmor %vm712_vm2, %vm713_vm0  ;;  %v757_v48 = vand.u32 2147483648, %v745_v46 }
 0x100   :  { %v709_v51 = vsub.f32 1.0, %v708_v44  ;;  %vm733_vm6 = vmor %vm731_vm3, %vm732_vm1 }
 0x101   :  { %v728_v26 = vsub.f32 1.0, %v727_v63  ;;  %v758_v54 = vor.u32 1.1754944e-38, %v757_v48 }
 0x102   :  { %v710_v39 = vmul.f32 %v1915_v56, %v709_v51 }
 0x103   :  { %v729_v60 = vmul.f32 %v1917_v58, %v728_v26 }
 0x104   :  { %v1919_v13 = vpop.eup %1918  ;;  %v711_v57 = vadd.f32 %v1915_v56, %v710_v39 }
 0x105   :  { %v730_v50 = vadd.f32 %v1917_v58, %v729_v60  ;;  %v747_v0 = vmul.f32 %v1919_v13, %v745_v46  ;;  %v1921_v45 = vpop.eup %1920  ;;  %vm752_vm8 = vweird.f32 %v1919_v13 }
 0x106   :  { %v715_v44 = vsel %vm714_vm4, %v1915_v56, %v711_v57  ;;  %v755_v56 = vand.u32 2147483647, %v745_v46  ;;  %vm753_vm10 = vmor %vm751_vm9, %vm752_vm8 }
 0x107   :  { %v720_v63 = vsel %vm717_vm5, %v719_v52, %v715_v44  ;;  %v734_v51 = vsel %vm733_vm6, %v1917_v58, %v730_v50  ;;  %v748_v55 = vsub.f32 1.0, %v747_v0  ;;  %v3312_v52 = vld [vmem:[#allocation37_spill] sm:$0xff] }
 0x108   :  { %v739_v26 = vsel %vm736_vm7, %v738_v49, %v734_v51  ;;  %v762_v47 = vmul.f32 %v1921_v45, %v720_v63  ;;  %vm756_vm11 = vcmp.eq.f32.partialorder %v755_v56, 8.507059e+37 }
 0x109   :  { %v761_v42 = vmul.f32 0.0, %v739_v26  ;;  %v749_v43 = vmul.f32 %v1919_v13, %v748_v55 }
 0x10b   :  { %v2607_v39 = vadd.f32 %v762_v47, %v761_v42  ;;  %v750_v53 = vadd.f32 %v1919_v13, %v749_v43 }
 0x10d   :  { %1922 = vtanh.f32 %v2607_v39  ;;  %v754_v61 = vsel %vm753_vm10, %v1919_v13, %v750_v53 }
 0x10e   :  { %v759_v59 = vsel %vm756_vm11, %v758_v54, %v754_v61 }
 0x113   :  { %v1923_v58 = vpop.eup %1922 }
 0x114   :  { %v765_v60 = vmul.f32 %v1923_v58, %v759_v59 }
 0x116   :  { %766 = vst [vmem:[%s3139_s4] sm:$0xff] %v765_v60  ;;  %790 = vmatmul.f32.vlgmr.msra.gmra.mxu0 %v765_v60  ;;  %810 = vmatmul.f32.vlgmr.msra.gmra.mxu1 %v765_v60 }
 0x117   :  { %830 = vmatmul.f32.vlgmr.msra.gmra.mxu2 %v765_v60  ;;  %850 = vmatmul.f32.vlgmr.msra.gmra.mxu3 %v765_v60 }
 0x118   :  { %1086 = vmatpush.msra.mxu0 %v2191_v1  ;;  %1106 = vmatpush.msra.mxu1 %v2193_v2  ;;  %v3283_v1 = vld [vmem:[#allocation10_spill] sm:$0xff]  ;;  %v3284_v2 = vld [vmem:[#allocation9_spill] sm:$0xff] }
 0x119   :  { %1126 = vmatpush.msra.mxu2 %v2197_v4  ;;  %1146 = vmatpush.msra.mxu3 %v2195_v3  ;;  %v3285_v3 = vld [vmem:[#allocation11_spill] sm:$0xff]  ;;  %v3286_v4 = vld [vmem:[#allocation12_spill] sm:$0xff] }
 0x11a   :  { %1087 = vmatpush.msra.mxu0 %v2199_v5  ;;  %1107 = vmatpush.msra.mxu1 %v2201_v6  ;;  %v3287_v5 = vld [vmem:[#allocation14_spill] sm:$0xff]  ;;  %v3288_v6 = vld [vmem:[#allocation13_spill] sm:$0xff] }
 0x11b   :  { %1127 = vmatpush.msra.mxu2 %v2207_v8  ;;  %1147 = vmatpush.msra.mxu3 %v2205_v7  ;;  %v3289_v7 = vld [vmem:[#allocation15_spill] sm:$0xff]  ;;  %v3290_v8 = vld [vmem:[#allocation16_spill] sm:$0xff] }
 0x11c   :  { %1088 = vmatpush.msra.mxu0 %v2210_v9  ;;  %1108 = vmatpush.msra.mxu1 %v2212_v10  ;;  %v3291_v9 = vld [vmem:[#allocation18_spill] sm:$0xff]  ;;  %v3292_v10 = vld [vmem:[#allocation17_spill] sm:$0xff] }
 0x11d   :  { %1128 = vmatpush.msra.mxu2 %v2219_v12  ;;  %1148 = vmatpush.msra.mxu3 %v2217_v11  ;;  %v3293_v11 = vld [vmem:[#allocation19_spill] sm:$0xff]  ;;  %v3294_v12 = vld [vmem:[#allocation20_spill] sm:$0xff] }
 0x11e   :  { %1089 = vmatpush.msra.mxu0 %v2228_v14  ;;  %1109 = vmatpush.msra.mxu1 %v2230_v15  ;;  %v3295_v14 = vld [vmem:[#allocation22_spill] sm:$0xff]  ;;  %v3296_v15 = vld [vmem:[#allocation21_spill] sm:$0xff] }
 0x11f   :  { %1129 = vmatpush.msra.mxu2 %v2236_v17  ;;  %1149 = vmatpush.msra.mxu3 %v2234_v16  ;;  %v3297_v16 = vld [vmem:[#allocation23_spill] sm:$0xff]  ;;  %v3298_v17 = vld [vmem:[#allocation24_spill] sm:$0xff] }
 0x120   :  { %1090 = vmatpush.msra.mxu0 %v2238_v18  ;;  %1110 = vmatpush.msra.mxu1 %v2240_v19  ;;  %v3299_v18 = vld [vmem:[#allocation26_spill] sm:$0xff]  ;;  %v3300_v19 = vld [vmem:[#allocation25_spill] sm:$0xff] }
 0x121   :  { %1130 = vmatpush.msra.mxu2 %v2246_v21  ;;  %1150 = vmatpush.msra.mxu3 %v2244_v20  ;;  %v3301_v20 = vld [vmem:[#allocation27_spill] sm:$0xff]  ;;  %v3302_v21 = vld [vmem:[#allocation28_spill] sm:$0xff] }
 0x122   :  { %1091 = vmatpush.msra.mxu0 %v2249_v22  ;;  %1111 = vmatpush.msra.mxu1 %v2251_v23  ;;  %v3303_v22 = vld [vmem:[#allocation29_spill] sm:$0xff]  ;;  %v3304_v23 = vld [vmem:[#allocation30_spill] sm:$0xff] }
 0x123   :  { %1131 = vmatpush.msra.mxu2 %v2258_v25  ;;  %1151 = vmatpush.msra.mxu3 %v2256_v24  ;;  %v3305_v24 = vld [vmem:[#allocation31_spill] sm:$0xff]  ;;  %v3306_v25 = vld [vmem:[#allocation32_spill] sm:$0xff] }
 0x124   :  { %1092 = vmatpush.msra.mxu0 %v2267_v27  ;;  %1112 = vmatpush.msra.mxu1 %v2269_v28  ;;  %v3307_v27 = vld [vmem:[#allocation33_spill] sm:$0xff]  ;;  %v3308_v28 = vld [vmem:[#allocation34_spill] sm:$0xff] }
 0x125   :  { %1132 = vmatpush.msra.mxu2 %v2275_v30  ;;  %1152 = vmatpush.msra.mxu3 %v2273_v29 }
 0x126   :  { %1093 = vmatpush.msra.mxu0 %v2277_v31  ;;  %1113 = vmatpush.msra.mxu1 %v2279_v32  ;;  %v3309_v31 = vld [vmem:[#allocation35_spill] sm:$0xff] }
 0x127   :  { %1133 = vmatpush.msra.mxu2 %v2285_v34  ;;  %1153 = vmatpush.msra.mxu3 %v2283_v33  ;;  %v3310_v33 = vld [vmem:[#allocation36_spill] sm:$0xff] }
 0x128   :  { %1094 = vmatpush.msra.mxu0 %v2288_v35  ;;  %1114 = vmatpush.msra.mxu1 %v2290_v36 }
 0x129   :  { %1134 = vmatpush.msra.mxu2 %v2297_v38  ;;  %1154 = vmatpush.msra.mxu3 %v2295_v37  ;;  %v3311_v38 = vld [vmem:[#allocation38_spill] sm:$0xff] }
 0x12a   :  { %1095 = vmatpush.msra.mxu0 %v2306_v40  ;;  %1115 = vmatpush.msra.mxu1 %v2308_v41 }
 0x12b   :  { %1135 = vmatpush.msra.mxu2 %v3283_v1  ;;  %1155 = vmatpush.msra.mxu3 %v3284_v2 }
 0x12c   :  { %1096 = vmatpush.msra.mxu0 %v3285_v3  ;;  %1116 = vmatpush.msra.mxu1 %v3286_v4 }
 0x12d   :  { %1136 = vmatpush.msra.mxu2 %v3287_v5  ;;  %1156 = vmatpush.msra.mxu3 %v3288_v6 }
 0x12e   :  { %1097 = vmatpush.msra.mxu0 %v3289_v7  ;;  %1117 = vmatpush.msra.mxu1 %v3290_v8 }
 0x12f   :  { %1137 = vmatpush.msra.mxu2 %v3291_v9  ;;  %1157 = vmatpush.msra.mxu3 %v3292_v10 }
 0x130   :  { %1098 = vmatpush.msra.mxu0 %v3293_v11  ;;  %1118 = vmatpush.msra.mxu1 %v3294_v12 }
 0x131   :  { %1138 = vmatpush.msra.mxu2 %v3295_v14  ;;  %1158 = vmatpush.msra.mxu3 %v3296_v15 }
 0x132   :  { %1099 = vmatpush.msra.mxu0 %v3297_v16  ;;  %1119 = vmatpush.msra.mxu1 %v3298_v17 }
 0x133   :  { %1139 = vmatpush.msra.mxu2 %v3299_v18  ;;  %1159 = vmatpush.msra.mxu3 %v3300_v19 }
 0x134   :  { %1100 = vmatpush.msra.mxu0 %v3301_v20  ;;  %1120 = vmatpush.msra.mxu1 %v3302_v21 }
 0x135   :  { %1140 = vmatpush.msra.mxu2 %v3303_v22  ;;  %1160 = vmatpush.msra.mxu3 %v3304_v23 }
 0x136   :  { %1101 = vmatpush.msra.mxu0 %v3305_v24  ;;  %1121 = vmatpush.msra.mxu1 %v3306_v25 }
 0x137   :  { %1141 = vmatpush.msra.mxu2 %v3307_v27  ;;  %1161 = vmatpush.msra.mxu3 %v3308_v28 }
 0x193   :  { %v791_v29 = vpop.f32.mrf.mxu0  ;;  %v811_v30 = vpop.f32.mrf.mxu1 }
 0x194   :  { %v854_v32 = vadd.f32 %v791_v29, %v3309_v31  ;;  %v855_v34 = vadd.f32 %v811_v30, %v3310_v33  ;;  %v2691_v29 = vld [vmem:[#allocation5 + $0x1e8] sm:$0xff]  ;;  %v2694_v30 = vld [vmem:[#allocation5 + $0x1f0] sm:$0xff]  ;;  %v2697_v31 = vld [vmem:[#allocation5 + $0x1f8] sm:$0xff] }
 0x195   :  { %v2703_v33 = vld [vmem:[#allocation5 + $0x1c8] sm:$0xff] }
 0x196   :  { %v1875_v35 = vmul.f32 -1.442695, %v854_v32  ;;  %v1876_v36 = vmul.f32 -1.442695, %v855_v34  ;;  %v2700_v32 = vld [vmem:[#allocation5 + $0x1c0] sm:$0xff]  ;;  %v2706_v34 = vld [vmem:[#allocation5 + $0x1d0] sm:$0xff] }
 0x198   :  { %1924 = vpow2.f32 %v1875_v35  ;;  %v2709_v35 = vld [vmem:[#allocation5 + $0x1d8] sm:$0xff] }
 0x199   :  { %1926 = vpow2.f32 %v1876_v36  ;;  %v2712_v36 = vld [vmem:[#allocation5 + $0x1a0] sm:$0xff] }
 0x19a   :  { %v851_v37 = vpop.f32.mrf.mxu3  ;;  %v831_v46 = vpop.f32.mrf.mxu2 }
 0x19b   :  { %v857_v40 = vadd.f32 %v851_v37, %v3311_v38  ;;  %v856_v50 = vadd.f32 %v831_v46, %v3312_v52  ;;  %v2715_v37 = vld [vmem:[#allocation5 + $0x1a8] sm:$0xff]  ;;  %v2718_v38 = vld [vmem:[#allocation5 + $0x1b0] sm:$0xff] }
 0x19c   :  { %v2739_v46 = vld [vmem:[#allocation5 + $0x168] sm:$0xff] }
 0x19d   :  { %v1877_v41 = vmul.f32 -1.442695, %v857_v40  ;;  %v2721_v40 = vld [vmem:[#allocation5 + $0x1b8] sm:$0xff]  ;;  %v2751_v52 = vld [vmem:[#allocation5 + $0x148] sm:$0xff] }
 0x19e   :  { %v1925_v42 = vpop.eup %1924 }
 0x19f   :  { %v1927_v43 = vpop.eup %1926  ;;  %v861_v47 = vadd.f32 1.0, %v1925_v42  ;;  %1928 = vpow2.f32 %v1877_v41  ;;  %v2724_v41 = vld [vmem:[#allocation5 + $0x180] sm:$0xff]  ;;  %v2727_v42 = vld [vmem:[#allocation5 + $0x188] sm:$0xff] }
 0x1a0   :  { %v880_v55 = vadd.f32 1.0, %v1927_v43  ;;  %v2730_v43 = vld [vmem:[#allocation5 + $0x190] sm:$0xff] }
 0x1a1   :  { %1930 = vrcp.f32 %v861_v47  ;;  %v873_v51 = vand.u32 2147483648, %v861_v47  ;;  %v871_v48 = vand.u32 2147483647, %v861_v47  ;;  %vm867_vm14 = vweird.f32 %v861_v47 }
 0x1a2   :  { %1932 = vrcp.f32 %v880_v55  ;;  %v892_v26 = vand.u32 2147483648, %v880_v55  ;;  %v890_v61 = vand.u32 2147483647, %v880_v55  ;;  %vm886_vm15 = vweird.f32 %v880_v55 }
 0x1a3   :  { %v874_v59 = vor.u32 1.1754944e-38, %v873_v51  ;;  %vm872_vm2 = vcmp.eq.f32.partialorder %v871_v48, 8.507059e+37  ;;  %v2772_v51 = vld [vmem:[#allocation5 + $0x100] sm:$0xff]  ;;  %v2781_v48 = vld [vmem:[#allocation5 + $0x118] sm:$0xff] }
 0x1a4   :  { %v893_v2 = vor.u32 1.1754944e-38, %v892_v26  ;;  %vm891_vm3 = vcmp.eq.f32.partialorder %v890_v61, 8.507059e+37  ;;  %v2775_v26 = vld [vmem:[#allocation5 + $0x108] sm:$0xff] }
 0x1a5   :  { %v1929_v62 = vpop.eup %1928  ;;  %v2787_v61 = vld [vmem:[#allocation5 + $0xe8] sm:$0xff] }
 0x1a6   :  { %v900_v13 = vadd.f32 1.0, %v1929_v62  ;;  %v2742_v62 = vld [vmem:[#allocation5 + $0x170] sm:$0xff] }
 0x1a7   :  { %v1931_v57 = vpop.eup %1930 }
 0x1a8   :  { %v1933_v0 = vpop.eup %1932  ;;  %v863_v49 = vmul.f32 %v1931_v57, %v861_v47  ;;  %1934 = vrcp.f32 %v900_v13  ;;  %vm868_vm12 = vweird.f32 %v1931_v57  ;;  %v912_v15 = vand.u32 2147483648, %v900_v13  ;;  %v2733_v47 = vld [vmem:[#allocation5 + $0x198] sm:$0xff] }
 0x1a9   :  { %v882_v44 = vmul.f32 %v1933_v0, %v880_v55  ;;  %1936 = vtanh.f32 %v856_v50  ;;  %vm887_vm13 = vweird.f32 %v1933_v0  ;;  %vm869_vm0 = vmor %vm867_vm14, %vm868_vm12  ;;  %vm906_vm5 = vweird.f32 %v900_v13  ;;  %v2736_v55 = vld [vmem:[#allocation5 + $0x160] sm:$0xff]  ;;  %v2754_v50 = vld [vmem:[#allocation5 + $0x150] sm:$0xff] }
 0x1aa   :  { %v864_v45 = vsub.f32 1.0, %v863_v49  ;;  %vm888_vm1 = vmor %vm886_vm15, %vm887_vm13  ;;  %v910_v16 = vand.u32 2147483647, %v900_v13  ;;  %v913_v18 = vor.u32 1.1754944e-38, %v912_v15  ;;  %v2760_v49 = vld [vmem:[#allocation5 + $0x120] sm:$0xff]  ;;  %v2838_v15 = vld [vmem:[#allocation5 + $0x70] sm:$0xff] }
 0x1ab   :  { %v883_v63 = vsub.f32 1.0, %v882_v44  ;;  %v2763_v44 = vld [vmem:[#allocation5 + $0x128] sm:$0xff]  ;;  %3325 = vst [vmem:[#allocation22_spill] sm:$0xff] %v2838_v15 }
 0x1ac   :  { %v865_v53 = vmul.f32 %v1931_v57, %v864_v45  ;;  %vm911_vm7 = vcmp.eq.f32.partialorder %v910_v16, 8.507059e+37  ;;  %v2766_v45 = vld [vmem:[#allocation5 + $0x130] sm:$0xff]  ;;  %v2841_v16 = vld [vmem:[#allocation5 + $0x78] sm:$0xff] }
 0x1ad   :  { %v884_v56 = vmul.f32 %v1933_v0, %v883_v63  ;;  %v2769_v63 = vld [vmem:[#allocation5 + $0x138] sm:$0xff]  ;;  %3326 = vst [vmem:[#allocation21_spill] sm:$0xff] %v2841_v16 }
 0x1ae   :  { %v1935_v54 = vpop.eup %1934  ;;  %v866_v58 = vadd.f32 %v1931_v57, %v865_v53  ;;  %v2778_v53 = vld [vmem:[#allocation5 + $0x110] sm:$0xff] }
 0x1af   :  { %v885_v60 = vadd.f32 %v1933_v0, %v884_v56  ;;  %v902_v1 = vmul.f32 %v1935_v54, %v900_v13  ;;  %v1937_v4 = vpop.eup %1936  ;;  %vm907_vm4 = vweird.f32 %v1935_v54  ;;  %v2745_v13 = vld [vmem:[#allocation5 + $0x178] sm:$0xff]  ;;  %v2784_v56 = vld [vmem:[#allocation5 + $0xe0] sm:$0xff] }
 0x1b0   :  { %v870_v3 = vsel %vm869_vm0, %v1931_v57, %v866_v58  ;;  %vm908_vm6 = vmor %vm906_vm5, %vm907_vm4  ;;  %v2748_v57 = vld [vmem:[#allocation5 + $0x140] sm:$0xff]  ;;  %v2793_v58 = vld [vmem:[#allocation5 + $0xf8] sm:$0xff] }
 0x1b1   :  { %v875_v5 = vsel %vm872_vm2, %v874_v59, %v870_v3  ;;  %v889_v6 = vsel %vm888_vm1, %v1933_v0, %v885_v60  ;;  %v903_v7 = vsub.f32 1.0, %v902_v1  ;;  %v2757_v0 = vld [vmem:[#allocation5 + $0x158] sm:$0xff]  ;;  %v2796_v59 = vld [vmem:[#allocation5 + $0xc0] sm:$0xff]  ;;  %v2799_v60 = vld [vmem:[#allocation5 + $0xc8] sm:$0xff] }
 0x1b2   :  { %v894_v8 = vsel %vm891_vm3, %v893_v2, %v889_v6  ;;  %v917_v9 = vmul.f32 %v1937_v4, %v875_v5  ;;  %v2802_v1 = vld [vmem:[#allocation5 + $0xd0] sm:$0xff]  ;;  %v2805_v2 = vld [vmem:[#allocation5 + $0xd8] sm:$0xff]  ;;  %v2808_v3 = vld [vmem:[#allocation5 + $0xa0] sm:$0xff] }
 0x1b3   :  { %v916_v10 = vmul.f32 %v894_v8, %v2607_v39  ;;  %v904_v11 = vmul.f32 %v1935_v54, %v903_v7  ;;  %v2688_v39 = vld [vmem:[#allocation5 + $0x1e0] sm:$0xff]  ;;  %3313 = vst [vmem:[#allocation10_spill] sm:$0xff] %v2802_v1  ;;  %v2811_v4 = vld [vmem:[#allocation5 + $0xa8] sm:$0xff]  ;;  %v2814_v5 = vld [vmem:[#allocation5 + $0xb0] sm:$0xff] }
 0x1b4   :  { %3314 = vst [vmem:[#allocation9_spill] sm:$0xff] %v2805_v2  ;;  %v2817_v6 = vld [vmem:[#allocation5 + $0xb8] sm:$0xff]  ;;  %v2820_v7 = vld [vmem:[#allocation5 + $0x80] sm:$0xff]  ;;  %v2823_v8 = vld [vmem:[#allocation5 + $0x88] sm:$0xff] }
 0x1b5   :  { %v2682_v12 = vadd.f32 %v917_v9, %v916_v10  ;;  %v905_v14 = vadd.f32 %v1935_v54, %v904_v11  ;;  %3315 = vst [vmem:[#allocation11_spill] sm:$0xff] %v2808_v3  ;;  %v2826_v9 = vld [vmem:[#allocation5 + $0x90] sm:$0xff]  ;;  %v2829_v10 = vld [vmem:[#allocation5 + $0x98] sm:$0xff]  ;;  %v2832_v11 = vld [vmem:[#allocation5 + $0x60] sm:$0xff] }
 0x1b6   :  { %3316 = vst [vmem:[#allocation12_spill] sm:$0xff] %v2811_v4 }
 0x1b7   :  { %1938 = vtanh.f32 %v2682_v12  ;;  %v909_v17 = vsel %vm908_vm6, %v1935_v54, %v905_v14  ;;  %v2790_v54 = vld [vmem:[#allocation5 + $0xf0] sm:$0xff]  ;;  %3317 = vst [vmem:[#allocation14_spill] sm:$0xff] %v2814_v5  ;;  %v2835_v14 = vld [vmem:[#allocation5 + $0x68] sm:$0xff] }
 0x1b8   :  { %v914_v20 = vsel %vm911_vm7, %v913_v18, %v909_v17  ;;  %3318 = vst [vmem:[#allocation13_spill] sm:$0xff] %v2817_v6  ;;  %v2844_v17 = vld [vmem:[#allocation5 + $0x40] sm:$0xff]  ;;  %v2847_v18 = vld [vmem:[#allocation5 + $0x48] sm:$0xff] }
 0x1b9   :  { %3319 = vst [vmem:[#allocation15_spill] sm:$0xff] %v2820_v7 }
 0x1ba   :  { %3320 = vst [vmem:[#allocation16_spill] sm:$0xff] %v2823_v8 }
 0x1bb   :  { %3321 = vst [vmem:[#allocation18_spill] sm:$0xff] %v2826_v9 }
 0x1bc   :  { %3322 = vst [vmem:[#allocation17_spill] sm:$0xff] %v2829_v10 }
 0x1bd   :  { %v1939_v19 = vpop.eup %1938  ;;  %3323 = vst [vmem:[#allocation19_spill] sm:$0xff] %v2832_v11 }
 0x1be   :  { %v920_v21 = vmul.f32 %v1939_v19, %v914_v20  ;;  %3324 = vst [vmem:[#allocation20_spill] sm:$0xff] %v2835_v14  ;;  %v2850_v19 = vld [vmem:[#allocation5 + $0x50] sm:$0xff]  ;;  %v2853_v20 = vld [vmem:[#allocation5 + $0x58] sm:$0xff] }
 0x1bf   :  { %3327 = vst [vmem:[#allocation23_spill] sm:$0xff] %v2844_v17 }
 0x1c0   :  { %1878 = vst [vmem:[%s3139_s4 + $0x8] sm:$0xff] %v920_v21  ;;  %946 = vmatmul.f32.vlgmr.msrb.gmra.mxu0 %v920_v21  ;;  %966 = vmatmul.f32.vlgmr.msrb.gmra.mxu1 %v920_v21 }
 0x1c1   :  { %986 = vmatmul.f32.vlgmr.msrb.gmra.mxu2 %v920_v21  ;;  %1006 = vmatmul.f32.vlgmr.msrb.gmra.mxu3 %v920_v21  ;;  %3328 = vst [vmem:[#allocation24_spill] sm:$0xff] %v2847_v18  ;;  %v2856_v21 = vld [vmem:[#allocation5 + $0x20] sm:$0xff] }
 0x1c2   :  { %1242 = vmatpush.msrb.mxu0 %v2688_v39  ;;  %1262 = vmatpush.msrb.mxu1 %v2691_v29  ;;  %3329 = vst [vmem:[#allocation26_spill] sm:$0xff] %v2850_v19 }
 0x1c3   :  { %1282 = vmatpush.msrb.mxu2 %v2694_v30  ;;  %1302 = vmatpush.msrb.mxu3 %v2697_v31  ;;  %3330 = vst [vmem:[#allocation25_spill] sm:$0xff] %v2853_v20 }
 0x1c4   :  { %1243 = vmatpush.msrb.mxu0 %v2700_v32  ;;  %1263 = vmatpush.msrb.mxu1 %v2703_v33  ;;  %3331 = vst [vmem:[#allocation27_spill] sm:$0xff] %v2856_v21 }
 0x1c5   :  { %1283 = vmatpush.msrb.mxu2 %v2706_v34  ;;  %1303 = vmatpush.msrb.mxu3 %v2709_v35 }
 0x1c6   :  { %1244 = vmatpush.msrb.mxu0 %v2712_v36  ;;  %1264 = vmatpush.msrb.mxu1 %v2715_v37 }
 0x1c7   :  { %1284 = vmatpush.msrb.mxu2 %v2718_v38  ;;  %1304 = vmatpush.msrb.mxu3 %v2721_v40 }
 0x1c8   :  { %1245 = vmatpush.msrb.mxu0 %v2724_v41  ;;  %1265 = vmatpush.msrb.mxu1 %v2727_v42 }
 0x1c9   :  { %1285 = vmatpush.msrb.mxu2 %v2730_v43  ;;  %1305 = vmatpush.msrb.mxu3 %v2733_v47 }
 0x1ca   :  { %1246 = vmatpush.msrb.mxu0 %v2736_v55  ;;  %1266 = vmatpush.msrb.mxu1 %v2739_v46 }
 0x1cb   :  { %1286 = vmatpush.msrb.mxu2 %v2742_v62  ;;  %1306 = vmatpush.msrb.mxu3 %v2745_v13 }
 0x1cc   :  { %1247 = vmatpush.msrb.mxu0 %v2748_v57  ;;  %1267 = vmatpush.msrb.mxu1 %v2751_v52 }
 0x1cd   :  { %1287 = vmatpush.msrb.mxu2 %v2754_v50  ;;  %1307 = vmatpush.msrb.mxu3 %v2757_v0 }
 0x1ce   :  { %1248 = vmatpush.msrb.mxu0 %v2760_v49  ;;  %1268 = vmatpush.msrb.mxu1 %v2763_v44 }
 0x1cf   :  { %1288 = vmatpush.msrb.mxu2 %v2766_v45  ;;  %1308 = vmatpush.msrb.mxu3 %v2769_v63 }
 0x1d0   :  { %1249 = vmatpush.msrb.mxu0 %v2772_v51  ;;  %1269 = vmatpush.msrb.mxu1 %v2775_v26 }
 0x1d1   :  { %1289 = vmatpush.msrb.mxu2 %v2778_v53  ;;  %1309 = vmatpush.msrb.mxu3 %v2781_v48 }
 0x1d2   :  { %1250 = vmatpush.msrb.mxu0 %v2784_v56  ;;  %1270 = vmatpush.msrb.mxu1 %v2787_v61 }
 0x1d3   :  { %1290 = vmatpush.msrb.mxu2 %v2790_v54  ;;  %1310 = vmatpush.msrb.mxu3 %v2793_v58 }
 0x1d4   :  { %1251 = vmatpush.msrb.mxu0 %v2796_v59  ;;  %1271 = vmatpush.msrb.mxu1 %v2799_v60 }
 0x1d5   :  { %1291 = vmatpush.msrb.mxu2 %v2802_v1  ;;  %1311 = vmatpush.msrb.mxu3 %v2805_v2 }
 0x1d6   :  { %1252 = vmatpush.msrb.mxu0 %v2808_v3  ;;  %1272 = vmatpush.msrb.mxu1 %v2811_v4 }
 0x1d7   :  { %1292 = vmatpush.msrb.mxu2 %v2814_v5  ;;  %1312 = vmatpush.msrb.mxu3 %v2817_v6 }
 0x1d8   :  { %1253 = vmatpush.msrb.mxu0 %v2820_v7  ;;  %1273 = vmatpush.msrb.mxu1 %v2823_v8 }
 0x1d9   :  { %1293 = vmatpush.msrb.mxu2 %v2826_v9  ;;  %1313 = vmatpush.msrb.mxu3 %v2829_v10 }
 0x1da   :  { %1254 = vmatpush.msrb.mxu0 %v2832_v11  ;;  %1274 = vmatpush.msrb.mxu1 %v2835_v14 }
 0x1db   :  { %1294 = vmatpush.msrb.mxu2 %v2838_v15  ;;  %1314 = vmatpush.msrb.mxu3 %v2841_v16  ;;  %v2859_v16 = vld [vmem:[#allocation5 + $0x28] sm:$0xff] }
 0x1dc   :  { %1255 = vmatpush.msrb.mxu0 %v2844_v17  ;;  %1275 = vmatpush.msrb.mxu1 %v2847_v18  ;;  %3332 = vst [vmem:[#allocation28_spill] sm:$0xff] %v2859_v16  ;;  %v3333_v18 = vld [vmem:[#allocation39_spill] sm:$0xff]  ;;  %v3334_v17 = vld [vmem:[#allocation40_spill] sm:$0xff] }
 0x1dd   :  { %1295 = vmatpush.msrb.mxu2 %v2850_v19  ;;  %1315 = vmatpush.msrb.mxu3 %v2853_v20 }
 0x1de   :  { %1256 = vmatpush.msrb.mxu0 %v2856_v21  ;;  %1276 = vmatpush.msrb.mxu1 %v2859_v16 }
 0x1df   :  { %1296 = vmatpush.msrb.mxu2 %v3303_v22  ;;  %1316 = vmatpush.msrb.mxu3 %v3304_v23  ;;  %v3335_v23 = vld [vmem:[#allocation42_spill] sm:$0xff] }
 0x1e0   :  { %1257 = vmatpush.msrb.mxu0 %v3305_v24  ;;  %1277 = vmatpush.msrb.mxu1 %v3306_v25 }
 0x1e1   :  { %1297 = vmatpush.msrb.mxu2 %v3307_v27  ;;  %1317 = vmatpush.msrb.mxu3 %v3308_v28 }
 0x23d   :  { %v947_v20 = vpop.f32.mrf.mxu0  ;;  %v967_v19 = vpop.f32.mrf.mxu1 }
 0x23e   :  { %v1010_v21 = vadd.f32 %v947_v20, %v3333_v18  ;;  %v1011_v15 = vadd.f32 %v967_v19, %v3334_v17  ;;  %v3336_v17 = vld [vmem:[#allocation41_spill] sm:$0xff] }
 0x240   :  { %v1879_v14 = vmul.f32 -1.442695, %v1010_v21  ;;  %v1880_v16 = vmul.f32 -1.442695, %v1011_v15 }
 0x242   :  { %1940 = vpow2.f32 %v1879_v14 }
 0x243   :  { %1942 = vpow2.f32 %v1880_v16 }
 0x244   :  { %v1007_v22 = vpop.f32.mrf.mxu3  ;;  %v987_v28 = vpop.f32.mrf.mxu2 }
 0x245   :  { %v1013_v11 = vadd.f32 %v1007_v22, %v3335_v23  ;;  %v1012_v19 = vadd.f32 %v987_v28, %v3336_v17 }
 0x247   :  { %v1881_v24 = vmul.f32 -1.442695, %v1013_v11 }
 0x248   :  { %v1941_v10 = vpop.eup %1940 }
 0x249   :  { %v1943_v25 = vpop.eup %1942  ;;  %v1017_v9 = vadd.f32 1.0, %v1941_v10  ;;  %1944 = vpow2.f32 %v1881_v24 }
 0x24a   :  { %v1036_v27 = vadd.f32 1.0, %v1943_v25 }
 0x24b   :  { %1946 = vrcp.f32 %v1017_v9  ;;  %v1029_v11 = vand.u32 2147483648, %v1017_v9  ;;  %v1027_v24 = vand.u32 2147483647, %v1017_v9  ;;  %vm1023_vm10 = vweird.f32 %v1017_v9 }
 0x24c   :  { %1948 = vrcp.f32 %v1036_v27  ;;  %v1048_v23 = vand.u32 2147483648, %v1036_v27  ;;  %v1046_v7 = vand.u32 2147483647, %v1036_v27  ;;  %vm1042_vm11 = vweird.f32 %v1036_v27 }
 0x24d   :  { %v1030_v28 = vor.u32 1.1754944e-38, %v1029_v11  ;;  %vm1028_vm14 = vcmp.eq.f32.partialorder %v1027_v24, 8.507059e+37 }
 0x24e   :  { %vm1047_vm15 = vcmp.eq.f32.partialorder %v1046_v7, 8.507059e+37 }
 0x24f   :  { %v1945_v8 = vpop.eup %1944 }
 0x250   :  { %v1056_v18 = vadd.f32 1.0, %v1945_v8 }
 0x251   :  { %v1947_v20 = vpop.eup %1946 }
 0x252   :  { %v1949_v15 = vpop.eup %1948  ;;  %v1019_v14 = vmul.f32 %v1947_v20, %v1017_v9  ;;  %1950 = vrcp.f32 %v1056_v18  ;;  %vm1024_vm8 = vweird.f32 %v1947_v20  ;;  %v1068_v11 = vand.u32 2147483648, %v1056_v18 }
 0x253   :  { %v1038_v16 = vmul.f32 %v1949_v15, %v1036_v27  ;;  %1952 = vtanh.f32 %v1012_v19  ;;  %vm1043_vm9 = vweird.f32 %v1949_v15  ;;  %vm1025_vm12 = vmor %vm1023_vm10, %vm1024_vm8  ;;  %vm1062_vm1 = vweird.f32 %v1056_v18 }
 0x254   :  { %v1020_v21 = vsub.f32 1.0, %v1019_v14  ;;  %vm1044_vm13 = vmor %vm1042_vm11, %vm1043_vm9  ;;  %v1049_v14 = vor.u32 1.1754944e-38, %v1048_v23  ;;  %v1069_v24 = vor.u32 1.1754944e-38, %v1068_v11  ;;  %v3355_v11 = vld [vmem:[#allocation27_spill] sm:$0xff] }
 0x255   :  { %v1039_v22 = vsub.f32 1.0, %v1038_v16 }
 0x256   :  { %v1021_v10 = vmul.f32 %v1947_v20, %v1020_v21 }
 0x257   :  { %v1040_v25 = vmul.f32 %v1949_v15, %v1039_v22 }
 0x258   :  { %v1951_v6 = vpop.eup %1950  ;;  %v1022_v8 = vadd.f32 %v1947_v20, %v1021_v10 }
 0x259   :  { %v1041_v17 = vadd.f32 %v1949_v15, %v1040_v25  ;;  %v1058_v5 = vmul.f32 %v1951_v6, %v1056_v18  ;;  %v1953_v19 = vpop.eup %1952  ;;  %vm1063_vm0 = vweird.f32 %v1951_v6  ;;  %v3344_v25 = vld [vmem:[#allocation16_spill] sm:$0xff] }
 0x25a   :  { %v1026_v16 = vsel %vm1025_vm12, %v1947_v20, %v1022_v8  ;;  %v1066_v20 = vand.u32 2147483647, %v1056_v18  ;;  %vm1064_vm2 = vmor %vm1062_vm1, %vm1063_vm0  ;;  %v3343_v18 = vld [vmem:[#allocation15_spill] sm:$0xff]  ;;  %v3345_v8 = vld [vmem:[#allocation18_spill] sm:$0xff] }
 0x25b   :  { %v1031_v4 = vsel %vm1028_vm14, %v1030_v28, %v1026_v16  ;;  %v1045_v21 = vsel %vm1044_vm13, %v1949_v15, %v1041_v17  ;;  %v1059_v3 = vsub.f32 1.0, %v1058_v5  ;;  %v3346_v28 = vld [vmem:[#allocation17_spill] sm:$0xff]  ;;  %v3347_v17 = vld [vmem:[#allocation19_spill] sm:$0xff]  ;;  %v3349_v16 = vld [vmem:[#allocation22_spill] sm:$0xff] }
 0x25c   :  { %v1050_v22 = vsel %vm1047_vm15, %v1049_v14, %v1045_v21  ;;  %v1073_v2 = vmul.f32 %v1953_v19, %v1031_v4  ;;  %vm1067_vm3 = vcmp.eq.f32.partialorder %v1066_v20, 8.507059e+37  ;;  %v3341_v4 = vld [vmem:[#allocation14_spill] sm:$0xff]  ;;  %v3348_v14 = vld [vmem:[#allocation20_spill] sm:$0xff]  ;;  %v3350_v19 = vld [vmem:[#allocation21_spill] sm:$0xff] }
 0x25d   :  { %v1072_v1 = vmul.f32 %v1050_v22, %v2682_v12  ;;  %v1060_v10 = vmul.f32 %v1951_v6, %v1059_v3  ;;  %v3337_v12 = vld [vmem:[#allocation10_spill] sm:$0xff]  ;;  %v3340_v3 = vld [vmem:[#allocation12_spill] sm:$0xff]  ;;  %v3351_v21 = vld [vmem:[#allocation23_spill] sm:$0xff] }
 0x25e   :  { %v3352_v22 = vld [vmem:[#allocation24_spill] sm:$0xff] }
 0x25f   :  { %v2873_v9 = vadd.f32 %v1073_v2, %v1072_v1  ;;  %v1061_v27 = vadd.f32 %v1951_v6, %v1060_v10  ;;  %v3338_v1 = vld [vmem:[#allocation9_spill] sm:$0xff]  ;;  %v3339_v2 = vld [vmem:[#allocation11_spill] sm:$0xff]  ;;  %v3353_v10 = vld [vmem:[#allocation26_spill] sm:$0xff] }
 0x260   :  { %v3356_v20 = vld [vmem:[#allocation28_spill] sm:$0xff] }
 0x261   :  { %1954 = vtanh.f32 %v2873_v9  ;;  %v1065_v23 = vsel %vm1064_vm2, %v1951_v6, %v1061_v27  ;;  %v3342_v6 = vld [vmem:[#allocation13_spill] sm:$0xff] }
 0x262   :  { %v1070_v5 = vsel %vm1067_vm3, %v1069_v24, %v1065_v23  ;;  %v3354_v27 = vld [vmem:[#allocation25_spill] sm:$0xff]  ;;  %v2937_v23 = vld [vmem:[#allocation5 + $0x30] sm:$0xff]  ;;  %v2940_v24 = vld [vmem:[#allocation5 + $0x38] sm:$0xff] }
 0x263   :  { %3357 = vst [vmem:[#allocation29_spill] sm:$0xff] %v2937_v23 }
 0x264   :  { %3358 = vst [vmem:[#allocation30_spill] sm:$0xff] %v2940_v24 }
 0x267   :  { %v1955_v7 = vpop.eup %1954 }
 0x268   :  { %v1076_v15 = vmul.f32 %v1955_v7, %v1070_v5  ;;  %v2943_v7 = vld [vmem:[#allocation5] sm:$0xff]  ;;  %v2946_v5 = vld [vmem:[#allocation5 + $0x8] sm:$0xff] }
 0x269   :  { %3359 = vst [vmem:[#allocation31_spill] sm:$0xff] %v2943_v7 }
 0x26a   :  { %1882 = vst [vmem:[%s3139_s4 + $0x10] sm:$0xff] %v1076_v15  ;;  %1102 = vmatmul.f32.vlgmr.msra.gmra.mxu0 %v1076_v15  ;;  %1122 = vmatmul.f32.vlgmr.msra.gmra.mxu1 %v1076_v15 }
 0x26b   :  { %1142 = vmatmul.f32.vlgmr.msra.gmra.mxu2 %v1076_v15  ;;  %1162 = vmatmul.f32.vlgmr.msra.gmra.mxu3 %v1076_v15  ;;  %3360 = vst [vmem:[#allocation32_spill] sm:$0xff] %v2946_v5  ;;  %v2949_v15 = vld [vmem:[#allocation5 + $0x10] sm:$0xff] }
 0x26c   :  { %1398 = vmatpush.msra.mxu0 %v2688_v39  ;;  %1418 = vmatpush.msra.mxu1 %v2691_v29  ;;  %3361 = vst [vmem:[#allocation33_spill] sm:$0xff] %v2949_v15 }
 0x26d   :  { %1438 = vmatpush.msra.mxu2 %v2694_v30  ;;  %1458 = vmatpush.msra.mxu3 %v2697_v31 }
 0x26e   :  { %1399 = vmatpush.msra.mxu0 %v2700_v32  ;;  %1419 = vmatpush.msra.mxu1 %v2703_v33 }
 0x26f   :  { %1439 = vmatpush.msra.mxu2 %v2706_v34  ;;  %1459 = vmatpush.msra.mxu3 %v2709_v35 }
 0x270   :  { %1400 = vmatpush.msra.mxu0 %v2712_v36  ;;  %1420 = vmatpush.msra.mxu1 %v2715_v37 }
 0x271   :  { %1440 = vmatpush.msra.mxu2 %v2718_v38  ;;  %1460 = vmatpush.msra.mxu3 %v2721_v40 }
 0x272   :  { %1401 = vmatpush.msra.mxu0 %v2724_v41  ;;  %1421 = vmatpush.msra.mxu1 %v2727_v42 }
 0x273   :  { %1441 = vmatpush.msra.mxu2 %v2730_v43  ;;  %1461 = vmatpush.msra.mxu3 %v2733_v47 }
 0x274   :  { %1402 = vmatpush.msra.mxu0 %v2736_v55  ;;  %1422 = vmatpush.msra.mxu1 %v2739_v46 }
 0x275   :  { %1442 = vmatpush.msra.mxu2 %v2742_v62  ;;  %1462 = vmatpush.msra.mxu3 %v2745_v13 }
 0x276   :  { %1403 = vmatpush.msra.mxu0 %v2748_v57  ;;  %1423 = vmatpush.msra.mxu1 %v2751_v52 }
 0x277   :  { %1443 = vmatpush.msra.mxu2 %v2754_v50  ;;  %1463 = vmatpush.msra.mxu3 %v2757_v0 }
 0x278   :  { %1404 = vmatpush.msra.mxu0 %v2760_v49  ;;  %1424 = vmatpush.msra.mxu1 %v2763_v44 }
 0x279   :  { %1444 = vmatpush.msra.mxu2 %v2766_v45  ;;  %1464 = vmatpush.msra.mxu3 %v2769_v63 }
 0x27a   :  { %1405 = vmatpush.msra.mxu0 %v2772_v51  ;;  %1425 = vmatpush.msra.mxu1 %v2775_v26 }
 0x27b   :  { %1445 = vmatpush.msra.mxu2 %v2778_v53  ;;  %1465 = vmatpush.msra.mxu3 %v2781_v48 }
 0x27c   :  { %1406 = vmatpush.msra.mxu0 %v2784_v56  ;;  %1426 = vmatpush.msra.mxu1 %v2787_v61 }
 0x27d   :  { %1446 = vmatpush.msra.mxu2 %v2790_v54  ;;  %1466 = vmatpush.msra.mxu3 %v2793_v58 }
 0x27e   :  { %1407 = vmatpush.msra.mxu0 %v2796_v59  ;;  %1427 = vmatpush.msra.mxu1 %v2799_v60 }
 0x27f   :  { %1447 = vmatpush.msra.mxu2 %v3337_v12  ;;  %1467 = vmatpush.msra.mxu3 %v3338_v1 }
 0x280   :  { %1408 = vmatpush.msra.mxu0 %v3339_v2  ;;  %1428 = vmatpush.msra.mxu1 %v3340_v3 }
 0x281   :  { %1448 = vmatpush.msra.mxu2 %v3341_v4  ;;  %1468 = vmatpush.msra.mxu3 %v3342_v6 }
 0x282   :  { %1409 = vmatpush.msra.mxu0 %v3343_v18  ;;  %1429 = vmatpush.msra.mxu1 %v3344_v25 }
 0x283   :  { %1449 = vmatpush.msra.mxu2 %v3345_v8  ;;  %1469 = vmatpush.msra.mxu3 %v3346_v28 }
 0x284   :  { %1410 = vmatpush.msra.mxu0 %v3347_v17  ;;  %1430 = vmatpush.msra.mxu1 %v3348_v14 }
 0x285   :  { %1450 = vmatpush.msra.mxu2 %v3349_v16  ;;  %1470 = vmatpush.msra.mxu3 %v3350_v19 }
 0x286   :  { %1411 = vmatpush.msra.mxu0 %v3351_v21  ;;  %1431 = vmatpush.msra.mxu1 %v3352_v22 }
 0x287   :  { %1451 = vmatpush.msra.mxu2 %v3353_v10  ;;  %1471 = vmatpush.msra.mxu3 %v3354_v27  ;;  %v3363_v27 = vld [vmem:[#allocation43_spill] sm:$0xff]  ;;  %v3364_v10 = vld [vmem:[#allocation44_spill] sm:$0xff] }
 0x288   :  { %1412 = vmatpush.msra.mxu0 %v3355_v11  ;;  %1432 = vmatpush.msra.mxu1 %v3356_v20  ;;  %v2952_v20 = vld [vmem:[#allocation5 + $0x18] sm:$0xff] }
 0x289   :  { %1452 = vmatpush.msra.mxu2 %v2937_v23  ;;  %1472 = vmatpush.msra.mxu3 %v2940_v24  ;;  %3362 = vst [vmem:[#allocation34_spill] sm:$0xff] %v2952_v20 }
 0x28a   :  { %1413 = vmatpush.msra.mxu0 %v2943_v7  ;;  %1433 = vmatpush.msra.mxu1 %v2946_v5  ;;  %v3365_v5 = vld [vmem:[#allocation46_spill] sm:$0xff] }
 0x28b   :  { %1453 = vmatpush.msra.mxu2 %v2949_v15  ;;  %1473 = vmatpush.msra.mxu3 %v2952_v20 }
 0x2e7   :  { %v1103_v23 = vpop.f32.mrf.mxu0  ;;  %v1123_v11 = vpop.f32.mrf.mxu1 }
 0x2e8   :  { %v1166_v24 = vadd.f32 %v1103_v23, %v3363_v27  ;;  %v1167_v22 = vadd.f32 %v1123_v11, %v3364_v10  ;;  %v3366_v10 = vld [vmem:[#allocation45_spill] sm:$0xff] }
 0x2ea   :  { %v1883_v21 = vmul.f32 -1.442695, %v1166_v24  ;;  %v1884_v7 = vmul.f32 -1.442695, %v1167_v22 }
 0x2ec   :  { %1956 = vpow2.f32 %v1883_v21 }
 0x2ed   :  { %1958 = vpow2.f32 %v1884_v7 }
 0x2ee   :  { %v1163_v19 = vpop.f32.mrf.mxu3  ;;  %v1143_v20 = vpop.f32.mrf.mxu2 }
 0x2ef   :  { %v1169_v16 = vadd.f32 %v1163_v19, %v3365_v5  ;;  %v1168_v11 = vadd.f32 %v1143_v20, %v3366_v10 }
 0x2f1   :  { %v1885_v14 = vmul.f32 -1.442695, %v1169_v16 }
 0x2f2   :  { %v1957_v17 = vpop.eup %1956 }
 0x2f3   :  { %v1959_v15 = vpop.eup %1958  ;;  %v1173_v28 = vadd.f32 1.0, %v1957_v17  ;;  %1960 = vpow2.f32 %v1885_v14 }
 0x2f4   :  { %v1192_v8 = vadd.f32 1.0, %v1959_v15 }
 0x2f5   :  { %1962 = vrcp.f32 %v1173_v28  ;;  %v1185_v16 = vand.u32 2147483648, %v1173_v28  ;;  %v1183_v14 = vand.u32 2147483647, %v1173_v28  ;;  %vm1179_vm6 = vweird.f32 %v1173_v28 }
 0x2f6   :  { %1964 = vrcp.f32 %v1192_v8  ;;  %v1204_v5 = vand.u32 2147483648, %v1192_v8  ;;  %v1202_v18 = vand.u32 2147483647, %v1192_v8  ;;  %vm1198_vm7 = vweird.f32 %v1192_v8 }
 0x2f7   :  { %v1186_v20 = vor.u32 1.1754944e-38, %v1185_v16  ;;  %vm1184_vm10 = vcmp.eq.f32.partialorder %v1183_v14, 8.507059e+37 }
 0x2f8   :  { %vm1203_vm11 = vcmp.eq.f32.partialorder %v1202_v18, 8.507059e+37 }
 0x2f9   :  { %v1961_v25 = vpop.eup %1960 }
 0x2fa   :  { %v1212_v27 = vadd.f32 1.0, %v1961_v25 }
 0x2fb   :  { %v1963_v23 = vpop.eup %1962 }
 0x2fc   :  { %v1965_v22 = vpop.eup %1964  ;;  %v1175_v21 = vmul.f32 %v1963_v23, %v1173_v28  ;;  %1966 = vrcp.f32 %v1212_v27  ;;  %vm1180_vm4 = vweird.f32 %v1963_v23  ;;  %v1224_v16 = vand.u32 2147483648, %v1212_v27 }
 0x2fd   :  { %v1194_v24 = vmul.f32 %v1965_v22, %v1192_v8  ;;  %1968 = vtanh.f32 %v1168_v11  ;;  %vm1199_vm5 = vweird.f32 %v1965_v22  ;;  %vm1181_vm8 = vmor %vm1179_vm6, %vm1180_vm4  ;;  %vm1218_vm13 = vweird.f32 %v1212_v27 }
 0x2fe   :  { %v1176_v7 = vsub.f32 1.0, %v1175_v21  ;;  %vm1200_vm9 = vmor %vm1198_vm7, %vm1199_vm5  ;;  %v1205_v21 = vor.u32 1.1754944e-38, %v1204_v5  ;;  %v1225_v14 = vor.u32 1.1754944e-38, %v1224_v16  ;;  %v3385_v16 = vld [vmem:[#allocation27_spill] sm:$0xff] }
 0x2ff   :  { %v1195_v19 = vsub.f32 1.0, %v1194_v24 }
 0x300   :  { %v1177_v17 = vmul.f32 %v1963_v23, %v1176_v7 }
 0x301   :  { %v1196_v15 = vmul.f32 %v1965_v22, %v1195_v19 }
 0x302   :  { %v1967_v6 = vpop.eup %1966  ;;  %v1178_v25 = vadd.f32 %v1963_v23, %v1177_v17 }
 0x303   :  { %v1197_v10 = vadd.f32 %v1965_v22, %v1196_v15  ;;  %v1214_v4 = vmul.f32 %v1967_v6, %v1212_v27  ;;  %v1969_v11 = vpop.eup %1968  ;;  %vm1219_vm12 = vweird.f32 %v1967_v6  ;;  %v3374_v15 = vld [vmem:[#allocation16_spill] sm:$0xff] }
 0x304   :  { %v1182_v24 = vsel %vm1181_vm8, %v1963_v23, %v1178_v25  ;;  %v1222_v23 = vand.u32 2147483647, %v1212_v27  ;;  %vm1220_vm14 = vmor %vm1218_vm13, %vm1219_vm12  ;;  %v3373_v27 = vld [vmem:[#allocation15_spill] sm:$0xff]  ;;  %v3375_v25 = vld [vmem:[#allocation18_spill] sm:$0xff] }
 0x305   :  { %v1187_v3 = vsel %vm1184_vm10, %v1186_v20, %v1182_v24  ;;  %v1201_v7 = vsel %vm1200_vm9, %v1965_v22, %v1197_v10  ;;  %v1215_v2 = vsub.f32 1.0, %v1214_v4  ;;  %v3376_v20 = vld [vmem:[#allocation17_spill] sm:$0xff]  ;;  %v3377_v10 = vld [vmem:[#allocation19_spill] sm:$0xff]  ;;  %v3379_v24 = vld [vmem:[#allocation22_spill] sm:$0xff] }
 0x306   :  { %v1206_v19 = vsel %vm1203_vm11, %v1205_v21, %v1201_v7  ;;  %v1229_v1 = vmul.f32 %v1969_v11, %v1187_v3  ;;  %vm1223_vm15 = vcmp.eq.f32.partialorder %v1222_v23, 8.507059e+37  ;;  %v3371_v3 = vld [vmem:[#allocation14_spill] sm:$0xff]  ;;  %v3378_v21 = vld [vmem:[#allocation20_spill] sm:$0xff]  ;;  %v3380_v11 = vld [vmem:[#allocation21_spill] sm:$0xff] }
 0x307   :  { %v1228_v12 = vmul.f32 %v1206_v19, %v2873_v9  ;;  %v1216_v17 = vmul.f32 %v1967_v6, %v1215_v2  ;;  %v3367_v9 = vld [vmem:[#allocation10_spill] sm:$0xff]  ;;  %v3370_v2 = vld [vmem:[#allocation12_spill] sm:$0xff]  ;;  %v3381_v7 = vld [vmem:[#allocation23_spill] sm:$0xff] }
 0x308   :  { %v3382_v19 = vld [vmem:[#allocation24_spill] sm:$0xff] }
 0x309   :  { %v2960_v28 = vadd.f32 %v1229_v1, %v1228_v12  ;;  %v1217_v8 = vadd.f32 %v1967_v6, %v1216_v17  ;;  %v3368_v12 = vld [vmem:[#allocation9_spill] sm:$0xff]  ;;  %v3369_v1 = vld [vmem:[#allocation11_spill] sm:$0xff]  ;;  %v3383_v17 = vld [vmem:[#allocation26_spill] sm:$0xff] }
 0x30a   :  { %v3386_v23 = vld [vmem:[#allocation28_spill] sm:$0xff] }
 0x30b   :  { %1970 = vtanh.f32 %v2960_v28  ;;  %v1221_v5 = vsel %vm1220_vm14, %v1967_v6, %v1217_v8  ;;  %v3372_v6 = vld [vmem:[#allocation13_spill] sm:$0xff] }
 0x30c   :  { %v1226_v4 = vsel %vm1223_vm15, %v1225_v14, %v1221_v5  ;;  %v3384_v8 = vld [vmem:[#allocation25_spill] sm:$0xff]  ;;  %v3388_v14 = vld [vmem:[#allocation30_spill] sm:$0xff] }
 0x30d   :  { %v3387_v5 = vld [vmem:[#allocation29_spill] sm:$0xff] }
 0x311   :  { %v1971_v18 = vpop.eup %1970 }
 0x312   :  { %v1232_v22 = vmul.f32 %v1971_v18, %v1226_v4  ;;  %v3389_v18 = vld [vmem:[#allocation31_spill] sm:$0xff]  ;;  %v3390_v4 = vld [vmem:[#allocation32_spill] sm:$0xff] }
 0x314   :  { %1886 = vst [vmem:[%s3139_s4 + $0x18] sm:$0xff] %v1232_v22  ;;  %1258 = vmatmul.f32.vlgmr.msrb.gmra.mxu0 %v1232_v22  ;;  %1278 = vmatmul.f32.vlgmr.msrb.gmra.mxu1 %v1232_v22 }
 0x315   :  { %1298 = vmatmul.f32.vlgmr.msrb.gmra.mxu2 %v1232_v22  ;;  %1318 = vmatmul.f32.vlgmr.msrb.gmra.mxu3 %v1232_v22  ;;  %v3391_v22 = vld [vmem:[#allocation33_spill] sm:$0xff] }
 0x316   :  { %1554 = vmatpush.msrb.mxu0 %v2688_v39  ;;  %1574 = vmatpush.msrb.mxu1 %v2691_v29 }
 0x317   :  { %1594 = vmatpush.msrb.mxu2 %v2694_v30  ;;  %1614 = vmatpush.msrb.mxu3 %v2697_v31 }
 0x318   :  { %1555 = vmatpush.msrb.mxu0 %v2700_v32  ;;  %1575 = vmatpush.msrb.mxu1 %v2703_v33 }
 0x319   :  { %1595 = vmatpush.msrb.mxu2 %v2706_v34  ;;  %1615 = vmatpush.msrb.mxu3 %v2709_v35 }
 0x31a   :  { %1556 = vmatpush.msrb.mxu0 %v2712_v36  ;;  %1576 = vmatpush.msrb.mxu1 %v2715_v37 }
 0x31b   :  { %1596 = vmatpush.msrb.mxu2 %v2718_v38  ;;  %1616 = vmatpush.msrb.mxu3 %v2721_v40 }
 0x31c   :  { %1557 = vmatpush.msrb.mxu0 %v2724_v41  ;;  %1577 = vmatpush.msrb.mxu1 %v2727_v42 }
 0x31d   :  { %1597 = vmatpush.msrb.mxu2 %v2730_v43  ;;  %1617 = vmatpush.msrb.mxu3 %v2733_v47 }
 0x31e   :  { %1558 = vmatpush.msrb.mxu0 %v2736_v55  ;;  %1578 = vmatpush.msrb.mxu1 %v2739_v46 }
 0x31f   :  { %1598 = vmatpush.msrb.mxu2 %v2742_v62  ;;  %1618 = vmatpush.msrb.mxu3 %v2745_v13 }
 0x320   :  { %1559 = vmatpush.msrb.mxu0 %v2748_v57  ;;  %1579 = vmatpush.msrb.mxu1 %v2751_v52 }
 0x321   :  { %1599 = vmatpush.msrb.mxu2 %v2754_v50  ;;  %1619 = vmatpush.msrb.mxu3 %v2757_v0 }
 0x322   :  { %1560 = vmatpush.msrb.mxu0 %v2760_v49  ;;  %1580 = vmatpush.msrb.mxu1 %v2763_v44 }
 0x323   :  { %1600 = vmatpush.msrb.mxu2 %v2766_v45  ;;  %1620 = vmatpush.msrb.mxu3 %v2769_v63 }
 0x324   :  { %1561 = vmatpush.msrb.mxu0 %v2772_v51  ;;  %1581 = vmatpush.msrb.mxu1 %v2775_v26 }
 0x325   :  { %1601 = vmatpush.msrb.mxu2 %v2778_v53  ;;  %1621 = vmatpush.msrb.mxu3 %v2781_v48 }
 0x326   :  { %1562 = vmatpush.msrb.mxu0 %v2784_v56  ;;  %1582 = vmatpush.msrb.mxu1 %v2787_v61 }
 0x327   :  { %1602 = vmatpush.msrb.mxu2 %v2790_v54  ;;  %1622 = vmatpush.msrb.mxu3 %v2793_v58 }
 0x328   :  { %1563 = vmatpush.msrb.mxu0 %v2796_v59  ;;  %1583 = vmatpush.msrb.mxu1 %v2799_v60 }
 0x329   :  { %1603 = vmatpush.msrb.mxu2 %v3367_v9  ;;  %1623 = vmatpush.msrb.mxu3 %v3368_v12 }
 0x32a   :  { %1564 = vmatpush.msrb.mxu0 %v3369_v1  ;;  %1584 = vmatpush.msrb.mxu1 %v3370_v2 }
 0x32b   :  { %1604 = vmatpush.msrb.mxu2 %v3371_v3  ;;  %1624 = vmatpush.msrb.mxu3 %v3372_v6 }
 0x32c   :  { %1565 = vmatpush.msrb.mxu0 %v3373_v27  ;;  %1585 = vmatpush.msrb.mxu1 %v3374_v15 }
 0x32d   :  { %1605 = vmatpush.msrb.mxu2 %v3375_v25  ;;  %1625 = vmatpush.msrb.mxu3 %v3376_v20 }
 0x32e   :  { %1566 = vmatpush.msrb.mxu0 %v3377_v10  ;;  %1586 = vmatpush.msrb.mxu1 %v3378_v21 }
 0x32f   :  { %1606 = vmatpush.msrb.mxu2 %v3379_v24  ;;  %1626 = vmatpush.msrb.mxu3 %v3380_v11  ;;  %v3393_v11 = vld [vmem:[#allocation47_spill] sm:$0xff]  ;;  %v3394_v24 = vld [vmem:[#allocation48_spill] sm:$0xff] }
 0x330   :  { %1567 = vmatpush.msrb.mxu0 %v3381_v7  ;;  %1587 = vmatpush.msrb.mxu1 %v3382_v19  ;;  %v3392_v7 = vld [vmem:[#allocation34_spill] sm:$0xff] }
 0x331   :  { %1607 = vmatpush.msrb.mxu2 %v3383_v17  ;;  %1627 = vmatpush.msrb.mxu3 %v3384_v8 }
 0x332   :  { %1568 = vmatpush.msrb.mxu0 %v3385_v16  ;;  %1588 = vmatpush.msrb.mxu1 %v3386_v23 }
 0x333   :  { %1608 = vmatpush.msrb.mxu2 %v3387_v5  ;;  %1628 = vmatpush.msrb.mxu3 %v3388_v14  ;;  %v3395_v14 = vld [vmem:[#allocation50_spill] sm:$0xff] }
 0x334   :  { %1569 = vmatpush.msrb.mxu0 %v3389_v18  ;;  %1589 = vmatpush.msrb.mxu1 %v3390_v4 }
 0x335   :  { %1609 = vmatpush.msrb.mxu2 %v3391_v22  ;;  %1629 = vmatpush.msrb.mxu3 %v3392_v7 }
 0x391   :  { %v1259_v19 = vpop.f32.mrf.mxu0  ;;  %v1279_v17 = vpop.f32.mrf.mxu1 }
 0x392   :  { %v1322_v8 = vadd.f32 %v1259_v19, %v3393_v11  ;;  %v1323_v16 = vadd.f32 %v1279_v17, %v3394_v24  ;;  %v3396_v24 = vld [vmem:[#allocation49_spill] sm:$0xff] }
 0x394   :  { %v1887_v21 = vmul.f32 -1.442695, %v1322_v8  ;;  %v1888_v23 = vmul.f32 -1.442695, %v1323_v16 }
 0x396   :  { %1972 = vpow2.f32 %v1887_v21 }
 0x397   :  { %1974 = vpow2.f32 %v1888_v23 }
 0x398   :  { %v1319_v5 = vpop.f32.mrf.mxu3  ;;  %v1299_v7 = vpop.f32.mrf.mxu2 }
 0x399   :  { %v1325_v10 = vadd.f32 %v1319_v5, %v3395_v14  ;;  %v1324_v17 = vadd.f32 %v1299_v7, %v3396_v24 }
 0x39b   :  { %v1889_v18 = vmul.f32 -1.442695, %v1325_v10 }
 0x39c   :  { %v1973_v20 = vpop.eup %1972 }
 0x39d   :  { %v1975_v4 = vpop.eup %1974  ;;  %v1329_v25 = vadd.f32 1.0, %v1973_v20  ;;  %1976 = vpow2.f32 %v1889_v18 }
 0x39e   :  { %v1348_v22 = vadd.f32 1.0, %v1975_v4 }
 0x39f   :  { %1978 = vrcp.f32 %v1329_v25  ;;  %v1341_v10 = vand.u32 2147483648, %v1329_v25  ;;  %v1339_v18 = vand.u32 2147483647, %v1329_v25  ;;  %vm1335_vm2 = vweird.f32 %v1329_v25 }
 0x3a0   :  { %1980 = vrcp.f32 %v1348_v22  ;;  %v1360_v14 = vand.u32 2147483648, %v1348_v22  ;;  %v1358_v27 = vand.u32 2147483647, %v1348_v22  ;;  %vm1354_vm3 = vweird.f32 %v1348_v22 }
 0x3a1   :  { %v1342_v7 = vor.u32 1.1754944e-38, %v1341_v10  ;;  %vm1340_vm6 = vcmp.eq.f32.partialorder %v1339_v18, 8.507059e+37 }
 0x3a2   :  { %vm1359_vm7 = vcmp.eq.f32.partialorder %v1358_v27, 8.507059e+37 }
 0x3a3   :  { %v1977_v15 = vpop.eup %1976 }
 0x3a4   :  { %v1368_v11 = vadd.f32 1.0, %v1977_v15 }
 0x3a5   :  { %v1979_v19 = vpop.eup %1978 }
 0x3a6   :  { %v1981_v8 = vpop.eup %1980  ;;  %v1331_v21 = vmul.f32 %v1979_v19, %v1329_v25  ;;  %1982 = vrcp.f32 %v1368_v11  ;;  %vm1336_vm0 = vweird.f32 %v1979_v19  ;;  %v1380_v10 = vand.u32 2147483648, %v1368_v11 }
 0x3a7   :  { %v1350_v16 = vmul.f32 %v1981_v8, %v1348_v22  ;;  %1984 = vtanh.f32 %v1324_v17  ;;  %vm1355_vm1 = vweird.f32 %v1981_v8  ;;  %vm1337_vm4 = vmor %vm1335_vm2, %vm1336_vm0  ;;  %vm1374_vm9 = vweird.f32 %v1368_v11 }
 0x3a8   :  { %v1332_v23 = vsub.f32 1.0, %v1331_v21  ;;  %vm1356_vm5 = vmor %vm1354_vm3, %vm1355_vm1  ;;  %v1361_v21 = vor.u32 1.1754944e-38, %v1360_v14  ;;  %v1381_v18 = vor.u32 1.1754944e-38, %v1380_v10 }
 0x3a9   :  { %v1351_v5 = vsub.f32 1.0, %v1350_v16 }
 0x3aa   :  { %v1333_v20 = vmul.f32 %v1979_v19, %v1332_v23 }
 0x3ab   :  { %v1352_v4 = vmul.f32 %v1981_v8, %v1351_v5 }
 0x3ac   :  { %v1983_v6 = vpop.eup %1982  ;;  %v1334_v15 = vadd.f32 %v1979_v19, %v1333_v20 }
 0x3ad   :  { %v1353_v24 = vadd.f32 %v1981_v8, %v1352_v4  ;;  %v1370_v3 = vmul.f32 %v1983_v6, %v1368_v11  ;;  %v1985_v17 = vpop.eup %1984  ;;  %vm1375_vm8 = vweird.f32 %v1983_v6 }
 0x3ae   :  { %v1338_v16 = vsel %vm1337_vm4, %v1979_v19, %v1334_v15  ;;  %v1378_v19 = vand.u32 2147483647, %v1368_v11  ;;  %vm1376_vm10 = vmor %vm1374_vm9, %vm1375_vm8  ;;  %v3426_v15 = vld [vmem:[#allocation53_spill] sm:$0xff] }
 0x3af   :  { %v1343_v2 = vsel %vm1340_vm6, %v1342_v7, %v1338_v16  ;;  %v1357_v23 = vsel %vm1356_vm5, %v1981_v8, %v1353_v24  ;;  %v1371_v1 = vsub.f32 1.0, %v1370_v3 }
 0x3b0   :  { %v1362_v5 = vsel %vm1359_vm7, %v1361_v21, %v1357_v23  ;;  %v1385_v12 = vmul.f32 %v1985_v17, %v1343_v2  ;;  %vm1379_vm11 = vcmp.eq.f32.partialorder %v1378_v19, 8.507059e+37 }
 0x3b1   :  { %v1384_v9 = vmul.f32 %v1362_v5, %v2960_v28  ;;  %v1372_v20 = vmul.f32 %v1983_v6, %v1371_v1 }
 0x3b3   :  { %v3035_v25 = vadd.f32 %v1385_v12, %v1384_v9  ;;  %v1373_v22 = vadd.f32 %v1983_v6, %v1372_v20 }
 0x3b5   :  { %1986 = vtanh.f32 %v3035_v25  ;;  %v1377_v14 = vsel %vm1376_vm10, %v1983_v6, %v1373_v22 }
 0x3b6   :  { %v1382_v3 = vsel %vm1379_vm11, %v1381_v18, %v1377_v14 }
 0x3bb   :  { %v1987_v27 = vpop.eup %1986 }
 0x3bc   :  { %v1388_v8 = vmul.f32 %v1987_v27, %v1382_v3 }
 0x3be   :  { %1890 = vst [vmem:[%s3139_s4 + $0x20] sm:$0xff] %v1388_v8  ;;  %1414 = vmatmul.f32.vlgmr.msra.gmra.mxu0 %v1388_v8  ;;  %1434 = vmatmul.f32.vlgmr.msra.gmra.mxu1 %v1388_v8 }
 0x3bf   :  { %1454 = vmatmul.f32.vlgmr.msra.gmra.mxu2 %v1388_v8  ;;  %1474 = vmatmul.f32.vlgmr.msra.gmra.mxu3 %v1388_v8 }
 0x3c0   :  { %1710 = vmatpush.msra.mxu0 %v2688_v39  ;;  %1730 = vmatpush.msra.mxu1 %v2691_v29  ;;  %v3397_v39 = vld [vmem:[#allocation10_spill] sm:$0xff]  ;;  %v3398_v29 = vld [vmem:[#allocation9_spill] sm:$0xff] }
 0x3c1   :  { %1750 = vmatpush.msra.mxu2 %v2694_v30  ;;  %1770 = vmatpush.msra.mxu3 %v2697_v31  ;;  %v3399_v30 = vld [vmem:[#allocation11_spill] sm:$0xff]  ;;  %v3400_v31 = vld [vmem:[#allocation12_spill] sm:$0xff] }
 0x3c2   :  { %1711 = vmatpush.msra.mxu0 %v2700_v32  ;;  %1731 = vmatpush.msra.mxu1 %v2703_v33  ;;  %v3401_v32 = vld [vmem:[#allocation14_spill] sm:$0xff]  ;;  %v3402_v33 = vld [vmem:[#allocation13_spill] sm:$0xff] }
 0x3c3   :  { %1751 = vmatpush.msra.mxu2 %v2706_v34  ;;  %1771 = vmatpush.msra.mxu3 %v2709_v35  ;;  %v3403_v34 = vld [vmem:[#allocation15_spill] sm:$0xff]  ;;  %v3404_v35 = vld [vmem:[#allocation16_spill] sm:$0xff] }
 0x3c4   :  { %1712 = vmatpush.msra.mxu0 %v2712_v36  ;;  %1732 = vmatpush.msra.mxu1 %v2715_v37  ;;  %v3405_v36 = vld [vmem:[#allocation18_spill] sm:$0xff]  ;;  %v3406_v37 = vld [vmem:[#allocation17_spill] sm:$0xff] }
 0x3c5   :  { %1752 = vmatpush.msra.mxu2 %v2718_v38  ;;  %1772 = vmatpush.msra.mxu3 %v2721_v40  ;;  %v3407_v38 = vld [vmem:[#allocation19_spill] sm:$0xff]  ;;  %v3408_v40 = vld [vmem:[#allocation20_spill] sm:$0xff] }
 0x3c6   :  { %1713 = vmatpush.msra.mxu0 %v2724_v41  ;;  %1733 = vmatpush.msra.mxu1 %v2727_v42  ;;  %v3409_v41 = vld [vmem:[#allocation22_spill] sm:$0xff]  ;;  %v3410_v42 = vld [vmem:[#allocation21_spill] sm:$0xff] }
 0x3c7   :  { %1753 = vmatpush.msra.mxu2 %v2730_v43  ;;  %1773 = vmatpush.msra.mxu3 %v2733_v47  ;;  %v3411_v43 = vld [vmem:[#allocation23_spill] sm:$0xff]  ;;  %v3412_v47 = vld [vmem:[#allocation24_spill] sm:$0xff] }
 0x3c8   :  { %1714 = vmatpush.msra.mxu0 %v2736_v55  ;;  %1734 = vmatpush.msra.mxu1 %v2739_v46  ;;  %v3413_v55 = vld [vmem:[#allocation26_spill] sm:$0xff]  ;;  %v3414_v46 = vld [vmem:[#allocation25_spill] sm:$0xff] }
 0x3c9   :  { %1754 = vmatpush.msra.mxu2 %v2742_v62  ;;  %1774 = vmatpush.msra.mxu3 %v2745_v13  ;;  %v3415_v62 = vld [vmem:[#allocation27_spill] sm:$0xff]  ;;  %v3416_v13 = vld [vmem:[#allocation28_spill] sm:$0xff] }
 0x3ca   :  { %1715 = vmatpush.msra.mxu0 %v2748_v57  ;;  %1735 = vmatpush.msra.mxu1 %v2751_v52  ;;  %v3417_v57 = vld [vmem:[#allocation29_spill] sm:$0xff]  ;;  %v3418_v52 = vld [vmem:[#allocation30_spill] sm:$0xff] }
 0x3cb   :  { %1755 = vmatpush.msra.mxu2 %v2754_v50  ;;  %1775 = vmatpush.msra.mxu3 %v2757_v0  ;;  %v3419_v50 = vld [vmem:[#allocation31_spill] sm:$0xff]  ;;  %v3420_v0 = vld [vmem:[#allocation32_spill] sm:$0xff] }
 0x3cc   :  { %1716 = vmatpush.msra.mxu0 %v2760_v49  ;;  %1736 = vmatpush.msra.mxu1 %v2763_v44  ;;  %v3421_v49 = vld [vmem:[#allocation33_spill] sm:$0xff]  ;;  %v3422_v44 = vld [vmem:[#allocation34_spill] sm:$0xff] }
 0x3cd   :  { %1756 = vmatpush.msra.mxu2 %v2766_v45  ;;  %1776 = vmatpush.msra.mxu3 %v2769_v63 }
 0x3ce   :  { %1717 = vmatpush.msra.mxu0 %v2772_v51  ;;  %1737 = vmatpush.msra.mxu1 %v2775_v26  ;;  %v3423_v51 = vld [vmem:[#allocation51_spill] sm:$0xff] }
 0x3cf   :  { %1757 = vmatpush.msra.mxu2 %v2778_v53  ;;  %1777 = vmatpush.msra.mxu3 %v2781_v48  ;;  %v3424_v53 = vld [vmem:[#allocation52_spill] sm:$0xff] }
 0x3d0   :  { %1718 = vmatpush.msra.mxu0 %v2784_v56  ;;  %1738 = vmatpush.msra.mxu1 %v2787_v61 }
 0x3d1   :  { %1758 = vmatpush.msra.mxu2 %v2790_v54  ;;  %1778 = vmatpush.msra.mxu3 %v2793_v58  ;;  %v3425_v58 = vld [vmem:[#allocation54_spill] sm:$0xff] }
 0x3d2   :  { %1719 = vmatpush.msra.mxu0 %v2796_v59  ;;  %1739 = vmatpush.msra.mxu1 %v2799_v60 }
 0x3d3   :  { %1759 = vmatpush.msra.mxu2 %v3397_v39  ;;  %1779 = vmatpush.msra.mxu3 %v3398_v29 }
 0x3d4   :  { %1720 = vmatpush.msra.mxu0 %v3399_v30  ;;  %1740 = vmatpush.msra.mxu1 %v3400_v31 }
 0x3d5   :  { %1760 = vmatpush.msra.mxu2 %v3401_v32  ;;  %1780 = vmatpush.msra.mxu3 %v3402_v33 }
 0x3d6   :  { %1721 = vmatpush.msra.mxu0 %v3403_v34  ;;  %1741 = vmatpush.msra.mxu1 %v3404_v35 }
 0x3d7   :  { %1761 = vmatpush.msra.mxu2 %v3405_v36  ;;  %1781 = vmatpush.msra.mxu3 %v3406_v37 }
 0x3d8   :  { %1722 = vmatpush.msra.mxu0 %v3407_v38  ;;  %1742 = vmatpush.msra.mxu1 %v3408_v40 }
 0x3d9   :  { %1762 = vmatpush.msra.mxu2 %v3409_v41  ;;  %1782 = vmatpush.msra.mxu3 %v3410_v42 }
 0x3da   :  { %1723 = vmatpush.msra.mxu0 %v3411_v43  ;;  %1743 = vmatpush.msra.mxu1 %v3412_v47 }
 0x3db   :  { %1763 = vmatpush.msra.mxu2 %v3413_v55  ;;  %1783 = vmatpush.msra.mxu3 %v3414_v46 }
 0x3dc   :  { %1724 = vmatpush.msra.mxu0 %v3415_v62  ;;  %1744 = vmatpush.msra.mxu1 %v3416_v13 }
 0x3dd   :  { %1764 = vmatpush.msra.mxu2 %v3417_v57  ;;  %1784 = vmatpush.msra.mxu3 %v3418_v52  ;;  %v3427_v52 = vld [vmem:[#allocation55_spill] sm:$0xff] }
 0x3de   :  { %1725 = vmatpush.msra.mxu0 %v3419_v50  ;;  %1745 = vmatpush.msra.mxu1 %v3420_v0  ;;  %v3428_v0 = vld [vmem:[#allocation56_spill] sm:$0xff] }
 0x3df   :  { %1765 = vmatpush.msra.mxu2 %v3421_v49  ;;  %1785 = vmatpush.msra.mxu3 %v3422_v44 }
 0x43b   :  { %v1415_v45 = vpop.f32.mrf.mxu0  ;;  %v1435_v63 = vpop.f32.mrf.mxu1 }
 0x43c   :  { %v1478_v26 = vadd.f32 %v1415_v45, %v3423_v51  ;;  %v1479_v48 = vadd.f32 %v1435_v63, %v3424_v53  ;;  %v3429_v51 = vld [vmem:[#allocation58_spill] sm:$0xff] }
 0x43e   :  { %v1891_v56 = vmul.f32 -1.442695, %v1478_v26  ;;  %v1892_v61 = vmul.f32 -1.442695, %v1479_v48 }
 0x440   :  { %1988 = vpow2.f32 %v1891_v56 }
 0x441   :  { %1990 = vpow2.f32 %v1892_v61 }
 0x442   :  { %v1475_v54 = vpop.f32.mrf.mxu3  ;;  %v1455_v2 = vpop.f32.mrf.mxu2 }
 0x443   :  { %v1481_v59 = vadd.f32 %v1475_v54, %v3425_v58  ;;  %v1480_v7 = vadd.f32 %v1455_v2, %v3426_v15 }
 0x445   :  { %v1893_v60 = vmul.f32 -1.442695, %v1481_v59 }
 0x446   :  { %v1989_v28 = vpop.eup %1988 }
 0x447   :  { %v1991_v9 = vpop.eup %1990  ;;  %v1485_v12 = vadd.f32 1.0, %v1989_v28  ;;  %1992 = vpow2.f32 %v1893_v60 }
 0x448   :  { %v1504_v1 = vadd.f32 1.0, %v1991_v9  ;;  %v3430_v9 = vld [vmem:[#allocation57_spill] sm:$0xff] }
 0x449   :  { %1994 = vrcp.f32 %v1485_v12  ;;  %v1497_v5 = vand.u32 2147483648, %v1485_v12  ;;  %v1495_v10 = vand.u32 2147483647, %v1485_v12  ;;  %vm1491_vm14 = vweird.f32 %v1485_v12 }
 0x44a   :  { %1996 = vrcp.f32 %v1504_v1  ;;  %v1516_v20 = vand.u32 2147483648, %v1504_v1  ;;  %v1514_v14 = vand.u32 2147483647, %v1504_v1  ;;  %vm1510_vm15 = vweird.f32 %v1504_v1 }
 0x44b   :  { %v1498_v3 = vor.u32 1.1754944e-38, %v1497_v5  ;;  %vm1496_vm2 = vcmp.eq.f32.partialorder %v1495_v10, 8.507059e+37 }
 0x44c   :  { %v1517_v29 = vor.u32 1.1754944e-38, %v1516_v20  ;;  %vm1515_vm3 = vcmp.eq.f32.partialorder %v1514_v14, 8.507059e+37 }
 0x44d   :  { %v1993_v6 = vpop.eup %1992 }
 0x44e   :  { %v1524_v11 = vadd.f32 1.0, %v1993_v6 }
 0x44f   :  { %v1995_v4 = vpop.eup %1994 }
 0x450   :  { %v1997_v24 = vpop.eup %1996  ;;  %v1487_v21 = vmul.f32 %v1995_v4, %v1485_v12  ;;  %1998 = vrcp.f32 %v1524_v11  ;;  %vm1492_vm12 = vweird.f32 %v1995_v4  ;;  %v1536_v42 = vand.u32 2147483648, %v1524_v11 }
 0x451   :  { %v1506_v16 = vmul.f32 %v1997_v24, %v1504_v1  ;;  %2000 = vtanh.f32 %v1480_v7  ;;  %vm1511_vm13 = vweird.f32 %v1997_v24  ;;  %vm1493_vm0 = vmor %vm1491_vm14, %vm1492_vm12  ;;  %vm1530_vm5 = vweird.f32 %v1524_v11 }
 0x452   :  { %v1488_v17 = vsub.f32 1.0, %v1487_v21  ;;  %vm1512_vm1 = vmor %vm1510_vm15, %vm1511_vm13  ;;  %v1534_v43 = vand.u32 2147483647, %v1524_v11  ;;  %v1537_v55 = vor.u32 1.1754944e-38, %v1536_v42 }
 0x453   :  { %v1507_v23 = vsub.f32 1.0, %v1506_v16 }
 0x454   :  { %v1489_v22 = vmul.f32 %v1995_v4, %v1488_v17  ;;  %vm1535_vm7 = vcmp.eq.f32.partialorder %v1534_v43, 8.507059e+37 }
 0x455   :  { %v1508_v19 = vmul.f32 %v1997_v24, %v1507_v23 }
 0x456   :  { %v1999_v18 = vpop.eup %1998  ;;  %v1490_v27 = vadd.f32 %v1995_v4, %v1489_v22 }
 0x457   :  { %v1509_v8 = vadd.f32 %v1997_v24, %v1508_v19  ;;  %v1526_v39 = vmul.f32 %v1999_v18, %v1524_v11  ;;  %v2001_v31 = vpop.eup %2000  ;;  %vm1531_vm4 = vweird.f32 %v1999_v18 }
 0x458   :  { %v1494_v30 = vsel %vm1493_vm0, %v1995_v4, %v1490_v27  ;;  %vm1532_vm6 = vmor %vm1530_vm5, %vm1531_vm4 }
 0x459   :  { %v1499_v32 = vsel %vm1496_vm2, %v1498_v3, %v1494_v30  ;;  %v1513_v33 = vsel %vm1512_vm1, %v1997_v24, %v1509_v8  ;;  %v1527_v34 = vsub.f32 1.0, %v1526_v39 }
 0x45a   :  { %v1518_v35 = vsel %vm1515_vm3, %v1517_v29, %v1513_v33  ;;  %v1541_v36 = vmul.f32 %v2001_v31, %v1499_v32 }
 0x45b   :  { %v1540_v37 = vmul.f32 %v1518_v35, %v3035_v25  ;;  %v1528_v38 = vmul.f32 %v1999_v18, %v1527_v34 }
 0x45d   :  { %v3110_v40 = vadd.f32 %v1541_v36, %v1540_v37  ;;  %v1529_v41 = vadd.f32 %v1999_v18, %v1528_v38 }
 0x45f   :  { %2002 = vtanh.f32 %v3110_v40  ;;  %v1533_v47 = vsel %vm1532_vm6, %v1999_v18, %v1529_v41 }
 0x460   :  { %v1538_v62 = vsel %vm1535_vm7, %v1537_v55, %v1533_v47  ;;  %v3431_v47 = vld [vmem:[#allocation59_spill] sm:$0xff] }
 0x465   :  { %v2003_v46 = vpop.eup %2002 }
 0x466   :  { %v1544_v13 = vmul.f32 %v2003_v46, %v1538_v62  ;;  %v3432_v46 = vld [vmem:[#allocation60_spill] sm:$0xff] }
 0x468   :  { %1894 = vst [vmem:[%s3139_s4 + $0x28] sm:$0xff] %v1544_v13  ;;  %1570 = vmatmul.f32.vlgmr.msrb.gmra.mxu0 %v1544_v13  ;;  %1590 = vmatmul.f32.vlgmr.msrb.gmra.mxu1 %v1544_v13 }
 0x469   :  { %1610 = vmatmul.f32.vlgmr.msrb.gmra.mxu2 %v1544_v13  ;;  %1630 = vmatmul.f32.vlgmr.msrb.gmra.mxu3 %v1544_v13 }
 0x4e5   :  { %v1571_v25 = vpop.f32.mrf.mxu0  ;;  %v1591_v57 = vpop.f32.mrf.mxu1 }
 0x4e6   :  { %v1634_v50 = vadd.f32 %v1571_v25, %v3427_v52  ;;  %v1635_v49 = vadd.f32 %v1591_v57, %v3428_v0  ;;  %v3433_v52 = vld [vmem:[#allocation62_spill] sm:$0xff] }
 0x4e8   :  { %v1895_v44 = vmul.f32 -1.442695, %v1634_v50  ;;  %v1896_v45 = vmul.f32 -1.442695, %v1635_v49 }
 0x4ea   :  { %2004 = vpow2.f32 %v1895_v44 }
 0x4eb   :  { %2006 = vpow2.f32 %v1896_v45 }
 0x4ec   :  { %v1631_v63 = vpop.f32.mrf.mxu3  ;;  %v1611_v58 = vpop.f32.mrf.mxu2 }
 0x4ed   :  { %v1637_v26 = vadd.f32 %v1631_v63, %v3429_v51  ;;  %v1636_v12 = vadd.f32 %v1611_v58, %v3430_v9 }
 0x4ef   :  { %v1897_v53 = vmul.f32 -1.442695, %v1637_v26 }
 0x4f0   :  { %v2005_v48 = vpop.eup %2004 }
 0x4f1   :  { %v2007_v56 = vpop.eup %2006  ;;  %v1641_v61 = vadd.f32 1.0, %v2005_v48  ;;  %2008 = vpow2.f32 %v1897_v53 }
 0x4f2   :  { %v1660_v54 = vadd.f32 1.0, %v2007_v56  ;;  %v3434_v56 = vld [vmem:[#allocation61_spill] sm:$0xff] }
 0x4f3   :  { %2010 = vrcp.f32 %v1641_v61  ;;  %v1653_v15 = vand.u32 2147483648, %v1641_v61  ;;  %v1651_v21 = vand.u32 2147483647, %v1641_v61  ;;  %vm1647_vm10 = vweird.f32 %v1641_v61 }
 0x4f4   :  { %2012 = vrcp.f32 %v1660_v54  ;;  %v1672_v7 = vand.u32 2147483648, %v1660_v54  ;;  %v1670_v17 = vand.u32 2147483647, %v1660_v54  ;;  %vm1666_vm11 = vweird.f32 %v1660_v54 }
 0x4f5   :  { %v1654_v20 = vor.u32 1.1754944e-38, %v1653_v15  ;;  %vm1652_vm14 = vcmp.eq.f32.partialorder %v1651_v21, 8.507059e+37 }
 0x4f6   :  { %v1673_v19 = vor.u32 1.1754944e-38, %v1672_v7  ;;  %vm1671_vm15 = vcmp.eq.f32.partialorder %v1670_v17, 8.507059e+37 }
 0x4f7   :  { %v2009_v59 = vpop.eup %2008 }
 0x4f8   :  { %v1680_v60 = vadd.f32 1.0, %v2009_v59 }
 0x4f9   :  { %v2011_v28 = vpop.eup %2010 }
 0x4fa   :  { %v2013_v1 = vpop.eup %2012  ;;  %v1643_v2 = vmul.f32 %v2011_v28, %v1641_v61  ;;  %2014 = vrcp.f32 %v1680_v60  ;;  %vm1648_vm8 = vweird.f32 %v2011_v28  ;;  %v1692_v34 = vand.u32 2147483648, %v1680_v60 }
 0x4fb   :  { %v1662_v6 = vmul.f32 %v2013_v1, %v1660_v54  ;;  %2016 = vtanh.f32 %v1636_v12  ;;  %vm1667_vm9 = vweird.f32 %v2013_v1  ;;  %vm1649_vm12 = vmor %vm1647_vm10, %vm1648_vm8  ;;  %vm1686_vm1 = vweird.f32 %v1680_v60 }
 0x4fc   :  { %v1644_v11 = vsub.f32 1.0, %v1643_v2  ;;  %vm1668_vm13 = vmor %vm1666_vm11, %vm1667_vm9  ;;  %v1690_v35 = vand.u32 2147483647, %v1680_v60  ;;  %v1693_v37 = vor.u32 1.1754944e-38, %v1692_v34 }
 0x4fd   :  { %v1663_v4 = vsub.f32 1.0, %v1662_v6 }
 0x4fe   :  { %v1645_v24 = vmul.f32 %v2011_v28, %v1644_v11  ;;  %vm1691_vm3 = vcmp.eq.f32.partialorder %v1690_v35, 8.507059e+37 }
 0x4ff   :  { %v1664_v16 = vmul.f32 %v2013_v1, %v1663_v4 }
 0x500   :  { %v2015_v23 = vpop.eup %2014  ;;  %v1646_v5 = vadd.f32 %v2011_v28, %v1645_v24 }
 0x501   :  { %v1665_v22 = vadd.f32 %v2013_v1, %v1664_v16  ;;  %v1682_v10 = vmul.f32 %v2015_v23, %v1680_v60  ;;  %v2017_v18 = vpop.eup %2016  ;;  %vm1687_vm0 = vweird.f32 %v2015_v23 }
 0x502   :  { %v1650_v14 = vsel %vm1649_vm12, %v2011_v28, %v1646_v5  ;;  %vm1688_vm2 = vmor %vm1686_vm1, %vm1687_vm0 }
 0x503   :  { %v1655_v27 = vsel %vm1652_vm14, %v1654_v20, %v1650_v14  ;;  %v1669_v3 = vsel %vm1668_vm13, %v2013_v1, %v1665_v22  ;;  %v1683_v8 = vsub.f32 1.0, %v1682_v10 }
 0x504   :  { %v1674_v39 = vsel %vm1671_vm15, %v1673_v19, %v1669_v3  ;;  %v1697_v29 = vmul.f32 %v2017_v18, %v1655_v27 }
 0x505   :  { %v1696_v30 = vmul.f32 %v1674_v39, %v3110_v40  ;;  %v1684_v31 = vmul.f32 %v2015_v23, %v1683_v8 }
 0x507   :  { %v3121_v32 = vadd.f32 %v1697_v29, %v1696_v30  ;;  %v1685_v33 = vadd.f32 %v2015_v23, %v1684_v31 }
 0x509   :  { %2018 = vtanh.f32 %v3121_v32  ;;  %v1689_v36 = vsel %vm1688_vm2, %v2015_v23, %v1685_v33 }
 0x50a   :  { %v1694_v41 = vsel %vm1691_vm3, %v1693_v37, %v1689_v36 }
 0x50f   :  { %v2019_v38 = vpop.eup %2018 }
 0x510   :  { %v1700_v42 = vmul.f32 %v2019_v38, %v1694_v41 }
 0x512   :  { %1898 = vst [vmem:[%s3139_s4 + $0x30] sm:$0xff] %v1700_v42  ;;  %1726 = vmatmul.f32.vlgmr.msra.gmra.mxu0 %v1700_v42  ;;  %1746 = vmatmul.f32.vlgmr.msra.gmra.mxu1 %v1700_v42 }
 0x513   :  { %1766 = vmatmul.f32.vlgmr.msra.gmra.mxu2 %v1700_v42  ;;  %1786 = vmatmul.f32.vlgmr.msra.gmra.mxu3 %v1700_v42 }
 0x58f   :  { %v1727_v40 = vpop.f32.mrf.mxu0  ;;  %v1747_v43 = vpop.f32.mrf.mxu1 }
 0x590   :  { %v1790_v55 = vadd.f32 %v1727_v40, %v3431_v47  ;;  %v1791_v62 = vadd.f32 %v1747_v43, %v3432_v46 }
 0x592   :  { %v1899_v13 = vmul.f32 -1.442695, %v1790_v55  ;;  %v1900_v25 = vmul.f32 -1.442695, %v1791_v62 }
 0x594   :  { %2020 = vpow2.f32 %v1899_v13 }
 0x595   :  { %2022 = vpow2.f32 %v1900_v25 }
 0x596   :  { %v1787_v57 = vpop.f32.mrf.mxu3  ;;  %v1767_v51 = vpop.f32.mrf.mxu2 }
 0x597   :  { %v1793_v50 = vadd.f32 %v1787_v57, %v3433_v52  ;;  %v1792_v61 = vadd.f32 %v1767_v51, %v3434_v56 }
 0x599   :  { %v1901_v0 = vmul.f32 -1.442695, %v1793_v50 }
 0x59a   :  { %v2021_v49 = vpop.eup %2020 }
 0x59b   :  { %v2023_v44 = vpop.eup %2022  ;;  %v1797_v45 = vadd.f32 1.0, %v2021_v49  ;;  %2024 = vpow2.f32 %v1901_v0 }
 0x59c   :  { %v1816_v63 = vadd.f32 1.0, %v2023_v44 }
 0x59d   :  { %2026 = vrcp.f32 %v1797_v45  ;;  %v1809_v9 = vand.u32 2147483648, %v1797_v45  ;;  %v1807_v2 = vand.u32 2147483647, %v1797_v45  ;;  %vm1803_vm6 = vweird.f32 %v1797_v45 }
 0x59e   :  { %2028 = vrcp.f32 %v1816_v63  ;;  %v1828_v12 = vand.u32 2147483648, %v1816_v63  ;;  %v1826_v11 = vand.u32 2147483647, %v1816_v63  ;;  %vm1822_vm7 = vweird.f32 %v1816_v63 }
 0x59f   :  { %v1810_v7 = vor.u32 1.1754944e-38, %v1809_v9  ;;  %vm1808_vm10 = vcmp.eq.f32.partialorder %v1807_v2, 8.507059e+37 }
 0x5a0   :  { %v1829_v16 = vor.u32 1.1754944e-38, %v1828_v12  ;;  %vm1827_vm11 = vcmp.eq.f32.partialorder %v1826_v11, 8.507059e+37 }
 0x5a1   :  { %v2025_v26 = vpop.eup %2024 }
 0x5a2   :  { %v1836_v53 = vadd.f32 1.0, %v2025_v26 }
 0x5a3   :  { %v2027_v48 = vpop.eup %2026 }
 0x5a4   :  { %v2029_v54 = vpop.eup %2028  ;;  %v1799_v58 = vmul.f32 %v2027_v48, %v1797_v45  ;;  %2030 = vrcp.f32 %v1836_v53  ;;  %vm1804_vm4 = vweird.f32 %v2027_v48  ;;  %v1848_v8 = vand.u32 2147483648, %v1836_v53 }
 0x5a5   :  { %v1818_v59 = vmul.f32 %v2029_v54, %v1816_v63  ;;  %2032 = vtanh.f32 %v1792_v61  ;;  %vm1823_vm5 = vweird.f32 %v2029_v54  ;;  %vm1805_vm8 = vmor %vm1803_vm6, %vm1804_vm4  ;;  %vm1842_vm13 = vweird.f32 %v1836_v53 }
 0x5a6   :  { %v1800_v60 = vsub.f32 1.0, %v1799_v58  ;;  %vm1824_vm9 = vmor %vm1822_vm7, %vm1823_vm5  ;;  %v1846_v39 = vand.u32 2147483647, %v1836_v53  ;;  %v1849_v30 = vor.u32 1.1754944e-38, %v1848_v8 }
 0x5a7   :  { %v1819_v28 = vsub.f32 1.0, %v1818_v59 }
 0x5a8   :  { %v1801_v1 = vmul.f32 %v2027_v48, %v1800_v60  ;;  %vm1847_vm15 = vcmp.eq.f32.partialorder %v1846_v39, 8.507059e+37 }
 0x5a9   :  { %v1820_v6 = vmul.f32 %v2029_v54, %v1819_v28 }
 0x5aa   :  { %v2031_v4 = vpop.eup %2030  ;;  %v1802_v15 = vadd.f32 %v2027_v48, %v1801_v1 }
 0x5ab   :  { %v1821_v24 = vadd.f32 %v2029_v54, %v1820_v6  ;;  %v1838_v21 = vmul.f32 %v2031_v4, %v1836_v53  ;;  %v2033_v23 = vpop.eup %2032  ;;  %vm1843_vm12 = vweird.f32 %v2031_v4 }
 0x5ac   :  { %v1806_v17 = vsel %vm1805_vm8, %v2027_v48, %v1802_v15  ;;  %vm1844_vm14 = vmor %vm1842_vm13, %vm1843_vm12 }
 0x5ad   :  { %v1811_v5 = vsel %vm1808_vm10, %v1810_v7, %v1806_v17  ;;  %v1825_v20 = vsel %vm1824_vm9, %v2029_v54, %v1821_v24  ;;  %v1839_v22 = vsub.f32 1.0, %v1838_v21 }
 0x5ae   :  { %v1830_v10 = vsel %vm1827_vm11, %v1829_v16, %v1825_v20  ;;  %v1853_v19 = vmul.f32 %v2033_v23, %v1811_v5 }
 0x5af   :  { %v1852_v14 = vmul.f32 %v1830_v10, %v3121_v32  ;;  %v1840_v18 = vmul.f32 %v2031_v4, %v1839_v22 }
 0x5b1   :  { %v1854_v27 = vadd.f32 %v1853_v19, %v1852_v14  ;;  %v1841_v3 = vadd.f32 %v2031_v4, %v1840_v18 }
 0x5b3   :  { %2034 = vtanh.f32 %v1854_v27  ;;  %v1845_v29 = vsel %vm1844_vm14, %v2031_v4, %v1841_v3 }
 0x5b4   :  { %v1850_v33 = vsel %vm1847_vm15, %v1849_v30, %v1845_v29 }
 0x5b9   :  { %v2035_v31 = vpop.eup %2034 }
 0x5ba   :  { %v1856_v34 = vmul.f32 %v2035_v31, %v1850_v33 }
 0x5bc   :  { %1902 = vst [vmem:[%s3139_s4 + $0x38] sm:$0xff] %v1856_v34 }
 0x5bd   :  { %1863 = vsyncpa [#allocation4], 1 }
 0x5be   :  { %1864 = vsyncpa [#allocation6], 1 }

</bundles_post_ra>
